<compile_context>
chip_gen: v7x
topology: tpu7x:2x2x1
jax: 0.10.0
libtpu: 0.0.40
codegen_flags: <defaults>
</compile_context>

<pallas_src>
import jax
import jax.numpy as jnp
from jax.experimental import pallas as pl
from jax.experimental.pallas import tpu as pltpu


# ----------------------------------------------------------------------------- helpers
def _round_up(a: int, b: int) -> int:
    return ((a + b - 1) // b) * b


def _lrelu(v):
    # nn.LeakyReLU(negative_slope=0.1)
    return jnp.where(v >= 0, v, 0.1 * v)


def _maxpool2_time(h2d, l_in: int, tb: int):
    """MaxPool1d(2) over time.  h2d rows are ordered (time-major, batch-minor)."""
    c = h2d.shape[-1]
    lp = l_in // 2
    h3 = h2d[: 2 * lp * tb].reshape(lp, 2 * tb, c)          # aligned split (tb % 8 == 0)
    p = jnp.maximum(h3[:, :tb, :], h3[:, tb:, :])            # pair-wise max over time
    return p.reshape(lp * tb, c), lp


def _conv_k3(p2d, w_ref, b_ref, l_out: int, tb: int):
    """Valid Conv1d with kernel 3 as three shifted MXU matmuls.

    p2d:  (l_in*tb, c_in)  rows ordered t*tb + b
    w_ref: (3, c_in, c_out), b_ref: (1, c_out)
    """
    acc = None
    for k in range(3):
        slab = p2d[k * tb:(k + l_out) * tb]                  # 8-aligned sublane slice
        t = jnp.dot(slab, w_ref[k], preferred_element_type=jnp.float32)
        acc = t if acc is None else acc + t
    return acc + b_ref[...]


# ----------------------------------------------------------------------------- kernel
def _sccnn_kernel(x_ref, w1_ref, b1_ref, w2_ref, b2_ref, w3_ref, b3_ref,
                  w4_ref, b4_ref, out_ref):
    t_len, tb, _ = x_ref.shape                               # static
    l1 = t_len - 2

    # (T, TB, 1) -> (T*TB, 1); rows ordered t*TB + b (aligned merge, TB % 8 == 0)
    x = x_ref[...].reshape(t_len * tb, 1)

    # ---- conv_block1: Conv1d(1->32) [+BN folded] + LeakyReLU(0.1) + MaxPool(2)
    acc = None
    for k in range(3):
        xk = x[k * tb:(k + l1) * tb]                         # (l1*tb, 1)
        term = xk * w1_ref[k:k + 1, :]                       # lane-broadcast outer product
        acc = term if acc is None else acc + term
    h = _lrelu(acc + b1_ref[...])                            # (l1*tb, 32)
    h, lp1 = _maxpool2_time(h, l1, tb)                       # (lp1*tb, 32)

    # ---- conv_block2: Conv1d(32->64) [+BN folded] + LeakyReLU(0.1) + MaxPool(2)
    l2 = lp1 - 2
    h = _lrelu(_conv_k3(h, w2_ref, b2_ref, l2, tb))          # (l2*tb, 64)
    h, lp2 = _maxpool2_time(h, l2, tb)                       # (lp2*tb, 64)

    # ---- conv_block3: Conv1d(64->96) + LeakyReLU(0.1)
    l3 = lp2 - 2
    h = _lrelu(_conv_k3(h, w3_ref, b3_ref, l3, tb))          # (l3*tb, 96)

    # ---- conv_block4: Conv1d(96->96) + LeakyReLU(0.1)
    l4 = l3 - 2
    h = _lrelu(_conv_k3(h, w4_ref, b4_ref, l4, tb))          # (l4*tb, 96)

    # ---- GAP: mean over time -> (tb, 96)
    gap = h[0:tb]
    for t in range(1, l4):
        gap = gap + h[t * tb:(t + 1) * tb]
    out_ref[...] = (gap * (1.0 / l4)).astype(out_ref.dtype)


# ----------------------------------------------------------------------------- wrapper
def sccnn_bn_forward(x, params, *, tile_b: int = 64):
    """x: (B, T) float32.  params: BN-folded weights in (k, c_in, c_out) layout."""
    b, t_len = x.shape
    l4 = ((t_len - 2) // 2 - 2) // 2 - 4
    assert l4 >= 1, "time_series too short for the conv/pool chain"

    tb = _round_up(min(tile_b, _round_up(b, 8)), 8)          # batch tile (multiple of 8)
    b_pad = _round_up(b, tb)
    if b_pad != b:
        x = jnp.pad(x, ((0, b_pad - b), (0, 0)))
    # layout plumbing only: time leading, batch on sublanes, single channel on lanes
    x_r = jnp.transpose(x)[:, :, None]                       # (T, B_pad, 1)

    c_out = params["w4"].shape[-1]
    grid = (b_pad // tb,)

    grid_spec = pltpu.PrefetchScalarGridSpec(
        num_scalar_prefetch=0,
        grid=grid,
        in_specs=[
            pl.BlockSpec((t_len, tb, 1), lambda i: (0, i, 0)),          # x tile
            pl.BlockSpec(params["w1"].shape, lambda i: (0, 0)),          # weights stay
            pl.BlockSpec(params["b1"].shape, lambda i: (0, 0)),          # VMEM-resident
            pl.BlockSpec(params["w2"].shape, lambda i: (0, 0, 0)),
            pl.BlockSpec(params["b2"].shape, lambda i: (0, 0)),
            pl.BlockSpec(params["w3"].shape, lambda i: (0, 0, 0)),
            pl.BlockSpec(params["b3"].shape, lambda i: (0, 0)),
            pl.BlockSpec(params["w4"].shape, lambda i: (0, 0, 0)),
            pl.BlockSpec(params["b4"].shape, lambda i: (0, 0)),
        ],
        out_specs=pl.BlockSpec((tb, c_out), lambda i: (i, 0)),
    )

    out = pl.pallas_call(
        _sccnn_kernel,
        out_shape=jax.ShapeDtypeStruct((b_pad, c_out), jnp.float32),
        grid_spec=grid_spec,
        compiler_params=pltpu.CompilerParams(
            dimension_semantics=("parallel",)),               # v7x: 2 TCs share batch
    )(x_r, params["w1"], params["b1"], params["w2"], params["b2"],
      params["w3"], params["b3"], params["w4"], params["b4"])

    return out[:b, :, None]                                   # (B, 96, 1) like PyTorch


# ----------------------------------------------------------------------------- params
def init_params(key, eps: float = 1e-5):
    """Synthetic parameters in PyTorch layout, then BN-folded into kernel layout.

    Kernel layout: w: (k, c_in, c_out) (block1 squeezed to (k, c_out)), b: (1, c_out).
    """
    cfg = [(1, 32, True), (32, 64, True), (64, 96, False), (96, 96, False)]
    keys = jax.random.split(key, 24)
    params = {}
    ki = 0
    for idx, (cin, cout, do_bn) in enumerate(cfg, start=1):
        w = jax.random.normal(keys[ki], (cout, cin, 3), jnp.float32) / jnp.sqrt(cin * 3.0)
        ki += 1
        bias = 0.05 * jax.random.normal(keys[ki], (cout,), jnp.float32)
        ki += 1
        if do_bn:
            gamma = 1.0 + 0.1 * jax.random.normal(keys[ki], (cout,), jnp.float32); ki += 1
            beta = 0.1 * jax.random.normal(keys[ki], (cout,), jnp.float32); ki += 1
            mean = 0.1 * jax.random.normal(keys[ki], (cout,), jnp.float32); ki += 1
            var = jnp.abs(1.0 + 0.1 * jax.random.normal(keys[ki], (cout,), jnp.float32)); ki += 1
            scale = gamma / jnp.sqrt(var + eps)
            shift = beta - mean * scale
        else:
            ki += 4
            scale = jnp.ones((cout,), jnp.float32)
            shift = jnp.zeros((cout,), jnp.float32)
        w_k = jnp.transpose(w, (2, 1, 0)) * scale[None, None, :]   # (k, c_in, c_out)
        b_k = (bias * scale + shift)[None, :]                      # (1, c_out)
        if idx == 1:
            w_k = w_k[:, 0, :]                                     # c_in == 1 -> (k, c_out)
        params[f"w{idx}"] = w_k
        params[f"b{idx}"] = b_k
    return params


# ----------------------------------------------------------------------------- reference
def _ref_conv(h, w, b):
    lout = h.shape[1] - w.shape[0] + 1
    acc = 0.0
    for k in range(w.shape[0]):
        acc = acc + jnp.einsum("blc,cd->bld", h[:, k:k + lout, :], w[k],
                               precision=jax.lax.Precision.HIGHEST)
    return acc + b[None, :, :]


def _ref_pool(h):
    bsz, l, c = h.shape
    lp = l // 2
    return jnp.max(h[:, :2 * lp, :].reshape(bsz, lp, 2, c), axis=2)


def sccnn_reference(x, params):
    h = x[:, :, None]                                              # (B, T, 1)
    h = _ref_pool(jax.nn.leaky_relu(_ref_conv(h, params["w1"][:, None, :], params["b1"]), 0.1))
    h = _ref_pool(jax.nn.leaky_relu(_ref_conv(h, params["w2"], params["b2"]), 0.1))
    h = jax.nn.leaky_relu(_ref_conv(h, params["w3"], params["b3"]), 0.1)
    h = jax.nn.leaky_relu(_ref_conv(h, params["w4"], params["b4"]), 0.1)
    return jnp.mean(h, axis=1)[:, :, None]                         # (B, 96, 1)


# ----------------------------------------------------------------------------- main
if __name__ == "__main__":
    key = jax.random.PRNGKey(0)
    kx, kp = jax.random.split(key)

    batch, time_series = 4, 64
    x = jax.random.normal(kx, (batch, time_series), jnp.float32)
    params = init_params(kp)

    out = sccnn_bn_forward(x, params)
    out = jax.block_until_ready(out)

    ref = sccnn_reference(x, params)

    assert out.shape == (batch, 96, 1)
    assert bool(jnp.all(jnp.isfinite(out)))
    assert bool(jnp.allclose(out, ref, atol=2e-2, rtol=2e-2)), \
        f"max abs diff = {float(jnp.max(jnp.abs(out - ref)))}"
    print("KERNEL_OK")
</pallas_src>

<mosaic_0001>
module attributes {stable_mosaic.version = 11 : i64} {
  func.func @_sccnn_kernel(%arg0: i32, %arg1: memref<64x8x1xf32, #tpu.memory_space<vmem>>, %arg2: memref<3x32xf32, #tpu.memory_space<vmem>>, %arg3: memref<1x32xf32, #tpu.memory_space<vmem>>, %arg4: memref<3x32x64xf32, #tpu.memory_space<vmem>>, %arg5: memref<1x64xf32, #tpu.memory_space<vmem>>, %arg6: memref<3x64x96xf32, #tpu.memory_space<vmem>>, %arg7: memref<1x96xf32, #tpu.memory_space<vmem>>, %arg8: memref<3x96x96xf32, #tpu.memory_space<vmem>>, %arg9: memref<1x96xf32, #tpu.memory_space<vmem>>, %arg10: memref<8x96xf32, #tpu.memory_space<vmem>>) attributes {dimension_semantics = [#tpu.dimension_semantics<parallel>], iteration_bounds = array<i64: 1>, scalar_prefetch = 0 : i64, scratch_operands = 0 : i64, tpu.core_type = #tpu.core_type<tc>, window_params = [{transform_indices = @transform_0, window_bounds = array<i64: 64, 8, 1>}, {pipeline_mode = #tpu.pipeline_mode<synchronous>, transform_indices = @transform_1, window_bounds = array<i64: 3, 32>}, {pipeline_mode = #tpu.pipeline_mode<synchronous>, transform_indices = @transform_2, window_bounds = array<i64: 1, 32>}, {pipeline_mode = #tpu.pipeline_mode<synchronous>, transform_indices = @transform_3, window_bounds = array<i64: 3, 32, 64>}, {pipeline_mode = #tpu.pipeline_mode<synchronous>, transform_indices = @transform_4, window_bounds = array<i64: 1, 64>}, {pipeline_mode = #tpu.pipeline_mode<synchronous>, transform_indices = @transform_5, window_bounds = array<i64: 3, 64, 96>}, {pipeline_mode = #tpu.pipeline_mode<synchronous>, transform_indices = @transform_6, window_bounds = array<i64: 1, 96>}, {pipeline_mode = #tpu.pipeline_mode<synchronous>, transform_indices = @transform_7, window_bounds = array<i64: 3, 96, 96>}, {pipeline_mode = #tpu.pipeline_mode<synchronous>, transform_indices = @transform_8, window_bounds = array<i64: 1, 96>}, {transform_indices = @transform_9, window_bounds = array<i64: 8, 96>}]} {
    %c0 = arith.constant 0 : index
    %c0_0 = arith.constant 0 : index
    %c0_1 = arith.constant 0 : index
    %0 = vector.load %arg1[%c0, %c0_0, %c0_1] : memref<64x8x1xf32, #tpu.memory_space<vmem>>, vector<64x8x1xf32>
    %1 = vector.shape_cast %0 : vector<64x8x1xf32> to vector<512x1xf32>
    %2 = vector.extract_strided_slice %1 {offsets = [0, 0], sizes = [496, 1], strides = [1, 1]} : vector<512x1xf32> to vector<496x1xf32>
    %c0_2 = arith.constant 0 : index
    %c0_3 = arith.constant 0 : index
    %3 = vector.load %arg2[%c0_2, %c0_3] : memref<3x32xf32, #tpu.memory_space<vmem>>, vector<1x32xf32>
    %4 = vector.broadcast %2 : vector<496x1xf32> to vector<496x32xf32>
    %5 = vector.broadcast %3 : vector<1x32xf32> to vector<496x32xf32>
    %6 = arith.mulf %4, %5 : vector<496x32xf32>
    %7 = vector.extract_strided_slice %1 {offsets = [8, 0], sizes = [496, 1], strides = [1, 1]} : vector<512x1xf32> to vector<496x1xf32>
    %c1 = arith.constant 1 : index
    %c0_4 = arith.constant 0 : index
    %8 = vector.load %arg2[%c1, %c0_4] : memref<3x32xf32, #tpu.memory_space<vmem>>, vector<1x32xf32>
    %9 = vector.broadcast %7 : vector<496x1xf32> to vector<496x32xf32>
    %10 = vector.broadcast %8 : vector<1x32xf32> to vector<496x32xf32>
    %11 = arith.mulf %9, %10 : vector<496x32xf32>
    %12 = arith.addf %6, %11 : vector<496x32xf32>
    %13 = vector.extract_strided_slice %1 {offsets = [16, 0], sizes = [496, 1], strides = [1, 1]} : vector<512x1xf32> to vector<496x1xf32>
    %c2 = arith.constant 2 : index
    %c0_5 = arith.constant 0 : index
    %14 = vector.load %arg2[%c2, %c0_5] : memref<3x32xf32, #tpu.memory_space<vmem>>, vector<1x32xf32>
    %15 = vector.broadcast %13 : vector<496x1xf32> to vector<496x32xf32>
    %16 = vector.broadcast %14 : vector<1x32xf32> to vector<496x32xf32>
    %17 = arith.mulf %15, %16 : vector<496x32xf32>
    %18 = arith.addf %12, %17 : vector<496x32xf32>
    %c0_6 = arith.constant 0 : index
    %c0_7 = arith.constant 0 : index
    %19 = vector.load %arg3[%c0_6, %c0_7] : memref<1x32xf32, #tpu.memory_space<vmem>>, vector<1x32xf32>
    %20 = vector.broadcast %19 : vector<1x32xf32> to vector<496x32xf32>
    %21 = arith.addf %18, %20 : vector<496x32xf32>
    %cst = arith.constant 0.000000e+00 : f32
    %22 = vector.broadcast %cst : f32 to vector<496x32xf32>
    %23 = arith.cmpf oge, %21, %22 : vector<496x32xf32>
    %cst_8 = arith.constant 1.000000e-01 : f32
    %24 = vector.broadcast %cst_8 : f32 to vector<496x32xf32>
    %25 = arith.mulf %24, %21 : vector<496x32xf32>
    %26 = arith.select %23, %21, %25 : vector<496x32xi1>, vector<496x32xf32>
    %27 = vector.shape_cast %26 : vector<496x32xf32> to vector<31x16x32xf32>
    %28 = vector.extract_strided_slice %27 {offsets = [0, 0, 0], sizes = [31, 8, 32], strides = [1, 1, 1]} : vector<31x16x32xf32> to vector<31x8x32xf32>
    %29 = vector.extract_strided_slice %27 {offsets = [0, 8, 0], sizes = [31, 8, 32], strides = [1, 1, 1]} : vector<31x16x32xf32> to vector<31x8x32xf32>
    %30 = arith.maximumf %28, %29 : vector<31x8x32xf32>
    %31 = vector.shape_cast %30 : vector<31x8x32xf32> to vector<248x32xf32>
    %32 = vector.extract_strided_slice %31 {offsets = [0, 0], sizes = [232, 32], strides = [1, 1]} : vector<248x32xf32> to vector<232x32xf32>
    %c0_9 = arith.constant 0 : index
    %c0_10 = arith.constant 0 : index
    %c0_11 = arith.constant 0 : index
    %33 = vector.load %arg4[%c0_9, %c0_10, %c0_11] : memref<3x32x64xf32, #tpu.memory_space<vmem>>, vector<1x32x64xf32>
    %34 = vector.shape_cast %33 : vector<1x32x64xf32> to vector<32x64xf32>
    %cst_12 = arith.constant dense<0.000000e+00> : vector<232x64xf32>
    %35 = tpu.matmul %32, %34, %cst_12 {dimension_numbers = #tpu.dot_dimension_numbers<[1], [0], [0], [1], [0, 0, 1, 1], [], []>} : vector<232x32xf32>, vector<32x64xf32>, vector<232x64xf32> -> vector<232x64xf32>
    %36 = vector.extract_strided_slice %31 {offsets = [8, 0], sizes = [232, 32], strides = [1, 1]} : vector<248x32xf32> to vector<232x32xf32>
    %c1_13 = arith.constant 1 : index
    %c0_14 = arith.constant 0 : index
    %c0_15 = arith.constant 0 : index
    %37 = vector.load %arg4[%c1_13, %c0_14, %c0_15] : memref<3x32x64xf32, #tpu.memory_space<vmem>>, vector<1x32x64xf32>
    %38 = vector.shape_cast %37 : vector<1x32x64xf32> to vector<32x64xf32>
    %cst_16 = arith.constant dense<0.000000e+00> : vector<232x64xf32>
    %39 = tpu.matmul %36, %38, %cst_16 {dimension_numbers = #tpu.dot_dimension_numbers<[1], [0], [0], [1], [0, 0, 1, 1], [], []>} : vector<232x32xf32>, vector<32x64xf32>, vector<232x64xf32> -> vector<232x64xf32>
    %40 = arith.addf %35, %39 : vector<232x64xf32>
    %41 = vector.extract_strided_slice %31 {offsets = [16, 0], sizes = [232, 32], strides = [1, 1]} : vector<248x32xf32> to vector<232x32xf32>
    %c2_17 = arith.constant 2 : index
    %c0_18 = arith.constant 0 : index
    %c0_19 = arith.constant 0 : index
    %42 = vector.load %arg4[%c2_17, %c0_18, %c0_19] : memref<3x32x64xf32, #tpu.memory_space<vmem>>, vector<1x32x64xf32>
    %43 = vector.shape_cast %42 : vector<1x32x64xf32> to vector<32x64xf32>
    %cst_20 = arith.constant dense<0.000000e+00> : vector<232x64xf32>
    %44 = tpu.matmul %41, %43, %cst_20 {dimension_numbers = #tpu.dot_dimension_numbers<[1], [0], [0], [1], [0, 0, 1, 1], [], []>} : vector<232x32xf32>, vector<32x64xf32>, vector<232x64xf32> -> vector<232x64xf32>
    %45 = arith.addf %40, %44 : vector<232x64xf32>
    %c0_21 = arith.constant 0 : index
    %c0_22 = arith.constant 0 : index
    %46 = vector.load %arg5[%c0_21, %c0_22] : memref<1x64xf32, #tpu.memory_space<vmem>>, vector<1x64xf32>
    %47 = vector.broadcast %46 : vector<1x64xf32> to vector<232x64xf32>
    %48 = arith.addf %45, %47 : vector<232x64xf32>
    %cst_23 = arith.constant 0.000000e+00 : f32
    %49 = vector.broadcast %cst_23 : f32 to vector<232x64xf32>
    %50 = arith.cmpf oge, %48, %49 : vector<232x64xf32>
    %cst_24 = arith.constant 1.000000e-01 : f32
    %51 = vector.broadcast %cst_24 : f32 to vector<232x64xf32>
    %52 = arith.mulf %51, %48 : vector<232x64xf32>
    %53 = arith.select %50, %48, %52 : vector<232x64xi1>, vector<232x64xf32>
    %54 = vector.extract_strided_slice %53 {offsets = [0, 0], sizes = [224, 64], strides = [1, 1]} : vector<232x64xf32> to vector<224x64xf32>
    %55 = vector.shape_cast %54 : vector<224x64xf32> to vector<14x16x64xf32>
    %56 = vector.extract_strided_slice %55 {offsets = [0, 0, 0], sizes = [14, 8, 64], strides = [1, 1, 1]} : vector<14x16x64xf32> to vector<14x8x64xf32>
    %57 = vector.extract_strided_slice %55 {offsets = [0, 8, 0], sizes = [14, 8, 64], strides = [1, 1, 1]} : vector<14x16x64xf32> to vector<14x8x64xf32>
    %58 = arith.maximumf %56, %57 : vector<14x8x64xf32>
    %59 = vector.shape_cast %58 : vector<14x8x64xf32> to vector<112x64xf32>
    %60 = vector.extract_strided_slice %59 {offsets = [0, 0], sizes = [96, 64], strides = [1, 1]} : vector<112x64xf32> to vector<96x64xf32>
    %c0_25 = arith.constant 0 : index
    %c0_26 = arith.constant 0 : index
    %c0_27 = arith.constant 0 : index
    %61 = vector.load %arg6[%c0_25, %c0_26, %c0_27] : memref<3x64x96xf32, #tpu.memory_space<vmem>>, vector<1x64x96xf32>
    %62 = vector.shape_cast %61 : vector<1x64x96xf32> to vector<64x96xf32>
    %cst_28 = arith.constant dense<0.000000e+00> : vector<96x96xf32>
    %63 = tpu.matmul %60, %62, %cst_28 {dimension_numbers = #tpu.dot_dimension_numbers<[1], [0], [0], [1], [0, 0, 1, 1], [], []>} : vector<96x64xf32>, vector<64x96xf32>, vector<96x96xf32> -> vector<96x96xf32>
    %64 = vector.extract_strided_slice %59 {offsets = [8, 0], sizes = [96, 64], strides = [1, 1]} : vector<112x64xf32> to vector<96x64xf32>
    %c1_29 = arith.constant 1 : index
    %c0_30 = arith.constant 0 : index
    %c0_31 = arith.constant 0 : index
    %65 = vector.load %arg6[%c1_29, %c0_30, %c0_31] : memref<3x64x96xf32, #tpu.memory_space<vmem>>, vector<1x64x96xf32>
    %66 = vector.shape_cast %65 : vector<1x64x96xf32> to vector<64x96xf32>
    %cst_32 = arith.constant dense<0.000000e+00> : vector<96x96xf32>
    %67 = tpu.matmul %64, %66, %cst_32 {dimension_numbers = #tpu.dot_dimension_numbers<[1], [0], [0], [1], [0, 0, 1, 1], [], []>} : vector<96x64xf32>, vector<64x96xf32>, vector<96x96xf32> -> vector<96x96xf32>
    %68 = arith.addf %63, %67 : vector<96x96xf32>
    %69 = vector.extract_strided_slice %59 {offsets = [16, 0], sizes = [96, 64], strides = [1, 1]} : vector<112x64xf32> to vector<96x64xf32>
    %c2_33 = arith.constant 2 : index
    %c0_34 = arith.constant 0 : index
    %c0_35 = arith.constant 0 : index
    %70 = vector.load %arg6[%c2_33, %c0_34, %c0_35] : memref<3x64x96xf32, #tpu.memory_space<vmem>>, vector<1x64x96xf32>
    %71 = vector.shape_cast %70 : vector<1x64x96xf32> to vector<64x96xf32>
    %cst_36 = arith.constant dense<0.000000e+00> : vector<96x96xf32>
    %72 = tpu.matmul %69, %71, %cst_36 {dimension_numbers = #tpu.dot_dimension_numbers<[1], [0], [0], [1], [0, 0, 1, 1], [], []>} : vector<96x64xf32>, vector<64x96xf32>, vector<96x96xf32> -> vector<96x96xf32>
    %73 = arith.addf %68, %72 : vector<96x96xf32>
    %c0_37 = arith.constant 0 : index
    %c0_38 = arith.constant 0 : index
    %74 = vector.load %arg7[%c0_37, %c0_38] : memref<1x96xf32, #tpu.memory_space<vmem>>, vector<1x96xf32>
    %75 = vector.broadcast %74 : vector<1x96xf32> to vector<96x96xf32>
    %76 = arith.addf %73, %75 : vector<96x96xf32>
    %cst_39 = arith.constant 0.000000e+00 : f32
    %77 = vector.broadcast %cst_39 : f32 to vector<96x96xf32>
    %78 = arith.cmpf oge, %76, %77 : vector<96x96xf32>
    %cst_40 = arith.constant 1.000000e-01 : f32
    %79 = vector.broadcast %cst_40 : f32 to vector<96x96xf32>
    %80 = arith.mulf %79, %76 : vector<96x96xf32>
    %81 = arith.select %78, %76, %80 : vector<96x96xi1>, vector<96x96xf32>
    %82 = vector.extract_strided_slice %81 {offsets = [0, 0], sizes = [80, 96], strides = [1, 1]} : vector<96x96xf32> to vector<80x96xf32>
    %c0_41 = arith.constant 0 : index
    %c0_42 = arith.constant 0 : index
    %c0_43 = arith.constant 0 : index
    %83 = vector.load %arg8[%c0_41, %c0_42, %c0_43] : memref<3x96x96xf32, #tpu.memory_space<vmem>>, vector<1x96x96xf32>
    %84 = vector.shape_cast %83 : vector<1x96x96xf32> to vector<96x96xf32>
    %cst_44 = arith.constant dense<0.000000e+00> : vector<80x96xf32>
    %85 = tpu.matmul %82, %84, %cst_44 {dimension_numbers = #tpu.dot_dimension_numbers<[1], [0], [0], [1], [0, 0, 1, 1], [], []>} : vector<80x96xf32>, vector<96x96xf32>, vector<80x96xf32> -> vector<80x96xf32>
    %86 = vector.extract_strided_slice %81 {offsets = [8, 0], sizes = [80, 96], strides = [1, 1]} : vector<96x96xf32> to vector<80x96xf32>
    %c1_45 = arith.constant 1 : index
    %c0_46 = arith.constant 0 : index
    %c0_47 = arith.constant 0 : index
    %87 = vector.load %arg8[%c1_45, %c0_46, %c0_47] : memref<3x96x96xf32, #tpu.memory_space<vmem>>, vector<1x96x96xf32>
    %88 = vector.shape_cast %87 : vector<1x96x96xf32> to vector<96x96xf32>
    %cst_48 = arith.constant dense<0.000000e+00> : vector<80x96xf32>
    %89 = tpu.matmul %86, %88, %cst_48 {dimension_numbers = #tpu.dot_dimension_numbers<[1], [0], [0], [1], [0, 0, 1, 1], [], []>} : vector<80x96xf32>, vector<96x96xf32>, vector<80x96xf32> -> vector<80x96xf32>
    %90 = arith.addf %85, %89 : vector<80x96xf32>
    %91 = vector.extract_strided_slice %81 {offsets = [16, 0], sizes = [80, 96], strides = [1, 1]} : vector<96x96xf32> to vector<80x96xf32>
    %c2_49 = arith.constant 2 : index
    %c0_50 = arith.constant 0 : index
    %c0_51 = arith.constant 0 : index
    %92 = vector.load %arg8[%c2_49, %c0_50, %c0_51] : memref<3x96x96xf32, #tpu.memory_space<vmem>>, vector<1x96x96xf32>
    %93 = vector.shape_cast %92 : vector<1x96x96xf32> to vector<96x96xf32>
    %cst_52 = arith.constant dense<0.000000e+00> : vector<80x96xf32>
    %94 = tpu.matmul %91, %93, %cst_52 {dimension_numbers = #tpu.dot_dimension_numbers<[1], [0], [0], [1], [0, 0, 1, 1], [], []>} : vector<80x96xf32>, vector<96x96xf32>, vector<80x96xf32> -> vector<80x96xf32>
    %95 = arith.addf %90, %94 : vector<80x96xf32>
    %c0_53 = arith.constant 0 : index
    %c0_54 = arith.constant 0 : index
    %96 = vector.load %arg9[%c0_53, %c0_54] : memref<1x96xf32, #tpu.memory_space<vmem>>, vector<1x96xf32>
    %97 = vector.broadcast %96 : vector<1x96xf32> to vector<80x96xf32>
    %98 = arith.addf %95, %97 : vector<80x96xf32>
    %cst_55 = arith.constant 0.000000e+00 : f32
    %99 = vector.broadcast %cst_55 : f32 to vector<80x96xf32>
    %100 = arith.cmpf oge, %98, %99 : vector<80x96xf32>
    %cst_56 = arith.constant 1.000000e-01 : f32
    %101 = vector.broadcast %cst_56 : f32 to vector<80x96xf32>
    %102 = arith.mulf %101, %98 : vector<80x96xf32>
    %103 = arith.select %100, %98, %102 : vector<80x96xi1>, vector<80x96xf32>
    %104 = vector.extract_strided_slice %103 {offsets = [0, 0], sizes = [8, 96], strides = [1, 1]} : vector<80x96xf32> to vector<8x96xf32>
    %105 = vector.extract_strided_slice %103 {offsets = [8, 0], sizes = [8, 96], strides = [1, 1]} : vector<80x96xf32> to vector<8x96xf32>
    %106 = arith.addf %104, %105 : vector<8x96xf32>
    %107 = vector.extract_strided_slice %103 {offsets = [16, 0], sizes = [8, 96], strides = [1, 1]} : vector<80x96xf32> to vector<8x96xf32>
    %108 = arith.addf %106, %107 : vector<8x96xf32>
    %109 = vector.extract_strided_slice %103 {offsets = [24, 0], sizes = [8, 96], strides = [1, 1]} : vector<80x96xf32> to vector<8x96xf32>
    %110 = arith.addf %108, %109 : vector<8x96xf32>
    %111 = vector.extract_strided_slice %103 {offsets = [32, 0], sizes = [8, 96], strides = [1, 1]} : vector<80x96xf32> to vector<8x96xf32>
    %112 = arith.addf %110, %111 : vector<8x96xf32>
    %113 = vector.extract_strided_slice %103 {offsets = [40, 0], sizes = [8, 96], strides = [1, 1]} : vector<80x96xf32> to vector<8x96xf32>
    %114 = arith.addf %112, %113 : vector<8x96xf32>
    %115 = vector.extract_strided_slice %103 {offsets = [48, 0], sizes = [8, 96], strides = [1, 1]} : vector<80x96xf32> to vector<8x96xf32>
    %116 = arith.addf %114, %115 : vector<8x96xf32>
    %117 = vector.extract_strided_slice %103 {offsets = [56, 0], sizes = [8, 96], strides = [1, 1]} : vector<80x96xf32> to vector<8x96xf32>
    %118 = arith.addf %116, %117 : vector<8x96xf32>
    %119 = vector.extract_strided_slice %103 {offsets = [64, 0], sizes = [8, 96], strides = [1, 1]} : vector<80x96xf32> to vector<8x96xf32>
    %120 = arith.addf %118, %119 : vector<8x96xf32>
    %121 = vector.extract_strided_slice %103 {offsets = [72, 0], sizes = [8, 96], strides = [1, 1]} : vector<80x96xf32> to vector<8x96xf32>
    %122 = arith.addf %120, %121 : vector<8x96xf32>
    %cst_57 = arith.constant 1.000000e-01 : f32
    %123 = vector.broadcast %cst_57 : f32 to vector<8x96xf32>
    %124 = arith.mulf %122, %123 : vector<8x96xf32>
    %c0_58 = arith.constant 0 : index
    %c0_59 = arith.constant 0 : index
    %125 = vector.load %arg10[%c0_58, %c0_59] : memref<8x96xf32, #tpu.memory_space<vmem>>, vector<8x96xf32>
    tpu.vector_store %arg10[%c0_58, %c0_59], %124 {strides = array<i32>} : memref<8x96xf32, #tpu.memory_space<vmem>>, vector<8x96xf32>,
    return
  }
  func.func @transform_0(%arg0: i32) -> (i32, i32, i32) {
    %c0_i32 = arith.constant 0 : i32
    %c0_i32_0 = arith.constant 0 : i32
    %c0_i32_1 = arith.constant 0 : i32
    return %c0_i32, %arg0, %c0_i32_0 : i32, i32, i32
  }
  func.func @transform_1(%arg0: i32) -> (i32, i32) {
    %c0_i32 = arith.constant 0 : i32
    %c0_i32_0 = arith.constant 0 : i32
    %c0_i32_1 = arith.constant 0 : i32
    return %c0_i32, %c0_i32_0 : i32, i32
  }
  func.func @transform_2(%arg0: i32) -> (i32, i32) {
    %c0_i32 = arith.constant 0 : i32
    %c0_i32_0 = arith.constant 0 : i32
    %c0_i32_1 = arith.constant 0 : i32
    return %c0_i32, %c0_i32_0 : i32, i32
  }
  func.func @transform_3(%arg0: i32) -> (i32, i32, i32) {
    %c0_i32 = arith.constant 0 : i32
    %c0_i32_0 = arith.constant 0 : i32
    %c0_i32_1 = arith.constant 0 : i32
    %c0_i32_2 = arith.constant 0 : i32
    return %c0_i32, %c0_i32_0, %c0_i32_1 : i32, i32, i32
  }
  func.func @transform_4(%arg0: i32) -> (i32, i32) {
    %c0_i32 = arith.constant 0 : i32
    %c0_i32_0 = arith.constant 0 : i32
    %c0_i32_1 = arith.constant 0 : i32
    return %c0_i32, %c0_i32_0 : i32, i32
  }
  func.func @transform_5(%arg0: i32) -> (i32, i32, i32) {
    %c0_i32 = arith.constant 0 : i32
    %c0_i32_0 = arith.constant 0 : i32
    %c0_i32_1 = arith.constant 0 : i32
    %c0_i32_2 = arith.constant 0 : i32
    return %c0_i32, %c0_i32_0, %c0_i32_1 : i32, i32, i32
  }
  func.func @transform_6(%arg0: i32) -> (i32, i32) {
    %c0_i32 = arith.constant 0 : i32
    %c0_i32_0 = arith.constant 0 : i32
    %c0_i32_1 = arith.constant 0 : i32
    return %c0_i32, %c0_i32_0 : i32, i32
  }
  func.func @transform_7(%arg0: i32) -> (i32, i32, i32) {
    %c0_i32 = arith.constant 0 : i32
    %c0_i32_0 = arith.constant 0 : i32
    %c0_i32_1 = arith.constant 0 : i32
    %c0_i32_2 = arith.constant 0 : i32
    return %c0_i32, %c0_i32_0, %c0_i32_1 : i32, i32, i32
  }
  func.func @transform_8(%arg0: i32) -> (i32, i32) {
    %c0_i32 = arith.constant 0 : i32
    %c0_i32_0 = arith.constant 0 : i32
    %c0_i32_1 = arith.constant 0 : i32
    return %c0_i32, %c0_i32_0 : i32, i32
  }
  func.func @transform_9(%arg0: i32) -> (i32, i32) {
    %c0_i32 = arith.constant 0 : i32
    %c0_i32_0 = arith.constant 0 : i32
    return %arg0, %c0_i32 : i32, i32
  }
}

</mosaic_0001>

<bundles_post_ra>
// kernel: tpu_custom_call.1
= control target key start
LH: loop header
LB: loop body
LE: loop exit
PB: predicated region body
PF: predicated region fallthrough
CT: control target
= control target key end

     0   :  { %14 = vsyncpa [#allocation3], 0  ;;  %s5875_s0 = inlined_call_operand.vmem [shape: f32[64,8,1], index: 0, kind: input, shape index: {}]   ;;  %s5876_s1 = inlined_call_operand.vmem [shape: f32[3,32], index: 1, kind: input, shape index: {}]   ;;  %s5877_s2 = inlined_call_operand.vmem [shape: f32[1,32], index: 2, kind: input, shape index: {}]   ;;  %s5878_s3 = inlined_call_operand.hbm [shape: f32[3,32,64], index: 3, kind: input, shape index: {}]   ;;  %s5879_s4 = inlined_call_operand.vmem [shape: f32[1,64], index: 4, kind: input, shape index: {}]   ;;  %s5880_s5 = inlined_call_operand.vmem [shape: f32[3,64,96], index: 5, kind: input, shape index: {}]   ;;  %s5881_s6 = inlined_call_operand.vmem [shape: f32[1,96], index: 6, kind: input, shape index: {}]   ;;  %s5882_s7 = inlined_call_operand.vmem [shape: f32[3,96,96], index: 7, kind: input, shape index: {}]   ;;  %s5883_s8 = inlined_call_operand.vmem [shape: f32[1,96], index: 8, kind: input, shape index: {}]   ;;  %s5884_s9 = inlined_call_operand.hbm [shape: f32[8,96], index: 9, kind: output, shape index: {}]  }
   0x1   :  { %15 = vsyncpa [#allocation4], 0  ;;  %s4129_s30 = smov [#allocation2]   ;;  %s4081_s13 = scalar_lea.hbm %s5878_s3, 1536 }
   0x2   :  { %s27_s10 = sshll.u32 %s4129_s30, 4  ;;  %p4082_p0 = scmp.ne.s32.totalorder %s5878_s3, %s4081_s13  ;;  %s28_s10 = int_to_ptr.vmem [resolvable:$true] %s27_s10 }
   0x3   :  { %p4085_p1 = scmp.lt.u32.totalorder %s4081_s13, %s5878_s3 }
   0x5   :  { %p4087_p2 = pnand %p4085_p1, %p4082_p0 }
   0x7   :  { %4090 = shalt.err (!%p4087_p2)
}
   0x8   :  { %s4091_s18 = scalar_lea.vmem %s28_s10, 1536  ;;  %p4096_p4 = scmp.lt.s32.totalorder %s28_s10, %s28_s10 }
   0x9   :  { %p4092_p3 = scmp.ne.s32.totalorder %s28_s10, %s4091_s18  ;;  %p4097_p5 = scmp.lt.s32.totalorder %s4091_s18, %s4091_s18 }
   0xb   :  { %p4098_p6 = por %p4097_p5, %p4096_p4 }
   0xd   :  { %p4099_p7 = pnand %p4098_p6, %p4092_p3 }
   0xf   :  { %4102 = shalt.err (!%p4099_p7)
}
  0x10   :  { %s4130_s19 = smov 128   ;;  %s4131_s20 = smov 8  }
  0x11   :  { %33 = dma.hbm_to_vmem [thread:$0]  %s5878_s3, 1536, %s28_s10, [#allocation3], %s4130_s19, %s4130_s19, %s4131_s20  }
  0x12   :  { %4125 = dma.done.wait [#allocation3], 1536  }
  0x13   :  { %4126 = vsyncadd [#allocation3], 4294965760  ;;  %v4132_v0 = vmov 0   ;;  %v51_v1 = vld [vmem:[%s5875_s0 + $0x20] sm:$0xff]  ;;  %v49_v2 = vld [vmem:[%s5875_s0 + $0x10] sm:$0xff]  ;;  %v4133_v9 = vmov 0.0|0.0  }
  0x14   :  { %4076 = vset.pattern.permute.xlu1 %v4132_v0  ;;  %4075 = vset.pattern.permute.xlu0 %v4132_v0  ;;  %v52_v3 = vld [vmem:[%s5875_s0 + $0x28] sm:$0xff]  ;;  %v50_v4 = vld [vmem:[%s5875_s0 + $0x18] sm:$0xff]  ;;  %v53_v6 = vld [vmem:[%s5875_s0 + $0x30] sm:$0xff]  ;;  %vm4134_vm0 = vmmov 0   ;;  %v4135_v14 = vmov 0.0   ;;  %vm1051_vm1 = vcmask 261120  }
  0x15   :  { %134 = vperm.xlu1 %4076, %v51_v1   ;;  %124 = vperm.xlu0 %4075, %v49_v2   ;;  %v54_v5 = vld [vmem:[%s5875_s0 + $0x38] sm:$0xff]  ;;  %v56_v7 = vld [vmem:[%s5875_s0 + $0x48] sm:$0xff]  ;;  %v55_v8 = vld [vmem:[%s5875_s0 + $0x40] sm:$0xff] }
  0x16   :  { %3881 = vmatprep.subr.bf16.mxu0 %v4133_v9  ;;  %4019 = vmatprep.subr.bf16.mxu1 %v4133_v9  ;;  %v58_v10 = vld [vmem:[%s5875_s0 + $0x58] sm:$0xff]  ;;  %v57_v11 = vld [vmem:[%s5875_s0 + $0x50] sm:$0xff]  ;;  %v60_v12 = vld [vmem:[%s5875_s0 + $0x68] sm:$0xff] }
  0x17   :  { %v59_v13 = vld [vmem:[%s5875_s0 + $0x60] sm:$0xff]  ;;  %3385 = vmatprep.mubr.msk.f32.mxu0 %vm4134_vm0, %v4135_v14  ;;  %3489 = vmatprep.mubr.msk.f32.mxu1 %vm4134_vm0, %v4135_v14  ;;  %v62_v15 = vld [vmem:[%s5875_s0 + $0x78] sm:$0xff]  ;;  %v61_v16 = vld [vmem:[%s5875_s0 + $0x70] sm:$0xff] }
  0x18   :  { %v1047_v17 = vld [vmem:[#allocation2 + $0x20] sm:$0xff]  ;;  %v1048_v18 = vld [vmem:[#allocation2 + $0x28] sm:$0xff]  ;;  %v1049_v19 = vld [vmem:[#allocation2 + $0x30] sm:$0xff] }
  0x19   :  { %139 = vperm.xlu1 %4076, %v52_v3   ;;  %129 = vperm.xlu0 %4075, %v50_v4   ;;  %v1050_v20 = vld [vmem:[#allocation2 + $0x38] sm:$0xff]  ;;  %v3882_v21 = vpack.c.bf16 %v1048_v18, %v1047_v17  ;;  %v1042_v22 = vld [vmem:[#allocation2] sm:$0xff]  ;;  %v1043_v23 = vld [vmem:[#allocation2 + $0x8] sm:$0xff] }
  0x1a   :  { %v4247_v24 = vpack.c.bf16 %v1043_v23, %v1042_v22  ;;  %v64_v25 = vld [vmem:[%s5875_s0 + $0x88] sm:$0xff]  ;;  %v63_v26 = vld [vmem:[%s5875_s0 + $0x80] sm:$0xff]  ;;  %v3885_v27 = vpack.c.bf16 %v1050_v20, %v1049_v19  ;;  %v1044_v28 = vld [vmem:[#allocation2 + $0x10] sm:$0xff] }
  0x1b   :  { %3883 = vmatpush3.bf16.msra.mxu0 %v3882_v21  ;;  %v1045_v29 = vld [vmem:[#allocation2 + $0x18] sm:$0xff]  ;;  %v65_v32 = vld [vmem:[%s5875_s0 + $0x90] sm:$0xff]  ;;  %v68_v33 = vld [vmem:[%s5875_s0 + $0xa8] sm:$0xff] }
  0x1c   :  { %3884 = vmatprep.subr.bf16.mxu0 %v4133_v9  ;;  %4021 = vmatpush3.bf16.msra.mxu1 %v4247_v24  ;;  %v4258_v30 = vpack.c.bf16 %v1045_v29, %v1044_v28  ;;  %v66_v31 = vld [vmem:[%s5875_s0 + $0x98] sm:$0xff]  ;;  %v67_v34 = vld [vmem:[%s5875_s0 + $0xa0] sm:$0xff]  ;;  %v69_v36 = vld [vmem:[%s5875_s0 + $0xb0] sm:$0xff] }
  0x1d   :  { %149 = vperm.xlu1 %4076, %v54_v5   ;;  %144 = vperm.xlu0 %4075, %v53_v6   ;;  %v70_v35 = vld [vmem:[%s5875_s0 + $0xb8] sm:$0xff]  ;;  %v72_v37 = vld [vmem:[%s5875_s0 + $0xc8] sm:$0xff]  ;;  %v71_v38 = vld [vmem:[%s5875_s0 + $0xc0] sm:$0xff] }
  0x1e   :  { %4020 = vmatprep.subr.bf16.mxu1 %v4133_v9  ;;  %v74_v39 = vld [vmem:[%s5875_s0 + $0xd8] sm:$0xff]  ;;  %v73_v40 = vld [vmem:[%s5875_s0 + $0xd0] sm:$0xff]  ;;  %v76_v41 = vld [vmem:[%s5875_s0 + $0xe8] sm:$0xff] }
  0x1f   :  { %3886 = vmatpush3.bf16.msra.mxu0 %v3885_v27  ;;  %v75_v42 = vld [vmem:[%s5875_s0 + $0xe0] sm:$0xff]  ;;  %v78_v43 = vld [vmem:[%s5875_s0 + $0xf8] sm:$0xff]  ;;  %v77_v44 = vld [vmem:[%s5875_s0 + $0xf0] sm:$0xff] }
  0x20   :  { %3887 = vmatprep.subr.bf16.mxu0 %v4133_v9  ;;  %4022 = vmatpush3.bf16.msra.mxu1 %v4258_v30  ;;  %v80_v45 = vld [vmem:[%s5875_s0 + $0x108] sm:$0xff]  ;;  %v79_v46 = vld [vmem:[%s5875_s0 + $0x100] sm:$0xff]  ;;  %v82_v47 = vld [vmem:[%s5875_s0 + $0x118] sm:$0xff] }
  0x21   :  { %159 = vperm.xlu1 %4076, %v56_v7   ;;  %154 = vperm.xlu0 %4075, %v55_v8   ;;  %v81_v48 = vld [vmem:[%s5875_s0 + $0x110] sm:$0xff]  ;;  %v84_v49 = vld [vmem:[%s5875_s0 + $0x128] sm:$0xff]  ;;  %v83_v50 = vld [vmem:[%s5875_s0 + $0x120] sm:$0xff] }
  0x22   :  { %v86_v51 = vld [vmem:[%s5875_s0 + $0x138] sm:$0xff]  ;;  %v85_v52 = vld [vmem:[%s5875_s0 + $0x130] sm:$0xff]  ;;  %v88_v53 = vld [vmem:[%s5875_s0 + $0x148] sm:$0xff] }
  0x23   :  { %v87_v54 = vld [vmem:[%s5875_s0 + $0x140] sm:$0xff]  ;;  %v90_v55 = vld [vmem:[%s5875_s0 + $0x158] sm:$0xff]  ;;  %v89_v56 = vld [vmem:[%s5875_s0 + $0x150] sm:$0xff] }
  0x24   :  { %v92_v57 = vld [vmem:[%s5875_s0 + $0x168] sm:$0xff]  ;;  %v91_v58 = vld [vmem:[%s5875_s0 + $0x160] sm:$0xff]  ;;  %v94_v59 = vld [vmem:[%s5875_s0 + $0x178] sm:$0xff] }
  0x25   :  { %169 = vperm.xlu1 %4076, %v58_v10   ;;  %164 = vperm.xlu0 %4075, %v57_v11   ;;  %v93_v60 = vld [vmem:[%s5875_s0 + $0x170] sm:$0xff]  ;;  %v96_v61 = vld [vmem:[%s5875_s0 + $0x188] sm:$0xff]  ;;  %v95_v62 = vld [vmem:[%s5875_s0 + $0x180] sm:$0xff] }
  0x26   :  { %v98_v63 = vld [vmem:[%s5875_s0 + $0x198] sm:$0xff]  ;;  %v97_v0 = vld [vmem:[%s5875_s0 + $0x190] sm:$0xff]  ;;  %v100_v1 = vld [vmem:[%s5875_s0 + $0x1a8] sm:$0xff] }
  0x27   :  { %v99_v2 = vld [vmem:[%s5875_s0 + $0x1a0] sm:$0xff]  ;;  %v102_v3 = vld [vmem:[%s5875_s0 + $0x1b8] sm:$0xff]  ;;  %v101_v4 = vld [vmem:[%s5875_s0 + $0x1b0] sm:$0xff] }
  0x28   :  { %v104_v5 = vld [vmem:[%s5875_s0 + $0x1c8] sm:$0xff]  ;;  %v103_v6 = vld [vmem:[%s5875_s0 + $0x1c0] sm:$0xff]  ;;  %v106_v7 = vld [vmem:[%s5875_s0 + $0x1d8] sm:$0xff] }
  0x29   :  { %179 = vperm.xlu1 %4076, %v60_v12   ;;  %174 = vperm.xlu0 %4075, %v59_v13   ;;  %v105_v8 = vld [vmem:[%s5875_s0 + $0x1d0] sm:$0xff]  ;;  %v108_v10 = vld [vmem:[%s5875_s0 + $0x1e8] sm:$0xff]  ;;  %v107_v11 = vld [vmem:[%s5875_s0 + $0x1e0] sm:$0xff] }
  0x2a   :  { %v48_v12 = vld [vmem:[%s5875_s0 + $0x8] sm:$0xff]  ;;  %v47_v13 = vld [vmem:[%s5875_s0] sm:$0xff] }
  0x2b   :  { %v4409_v19 = vld [vmem:[%s5876_s1 + $0x1] ss:$0 sm:$0xff]  ;;  %v4414_v20 = vld [vmem:[%s5876_s1] ss:$0 sm:$0xff]  ;;  %v4419_v23 = vld [vmem:[%s5876_s1 + $0x2] ss:$0 sm:$0xff] }
  0x2d   :  { %189 = vperm.xlu1 %4076, %v62_v15   ;;  %184 = vperm.xlu0 %4075, %v61_v16   ;;  %v110_v15 = vld [vmem:[%s5875_s0 + $0x1f8] sm:$0xff]  ;;  %v109_v16 = vld [vmem:[%s5875_s0 + $0x1f0] sm:$0xff] }
  0x31   :  { %199 = vperm.xlu1 %4076, %v64_v25   ;;  %194 = vperm.xlu0 %4075, %v63_v26  }
  0x35   :  { %209 = vperm.xlu1 %4076, %v66_v31   ;;  %204 = vperm.xlu0 %4075, %v65_v32  }
  0x39   :  { %219 = vperm.xlu1 %4076, %v68_v33   ;;  %214 = vperm.xlu0 %4075, %v67_v34  }
  0x3d   :  { %229 = vperm.xlu1 %4076, %v70_v35   ;;  %224 = vperm.xlu0 %4075, %v69_v36  }
  0x41   :  { %239 = vperm.xlu1 %4076, %v72_v37   ;;  %234 = vperm.xlu0 %4075, %v71_v38   ;;  %v4438_v37 = vld [vmem:[%s5877_s2] ss:$0 sm:$0xff] }
  0x45   :  { %249 = vperm.xlu1 %4076, %v74_v39   ;;  %244 = vperm.xlu0 %4075, %v73_v40  }
  0x49   :  { %259 = vperm.xlu1 %4076, %v76_v41   ;;  %254 = vperm.xlu0 %4075, %v75_v42  }
  0x4d   :  { %269 = vperm.xlu1 %4076, %v78_v43   ;;  %264 = vperm.xlu0 %4075, %v77_v44  }
  0x51   :  { %279 = vperm.xlu1 %4076, %v80_v45   ;;  %274 = vperm.xlu0 %4075, %v79_v46  }
  0x55   :  { %289 = vperm.xlu1 %4076, %v82_v47   ;;  %284 = vperm.xlu0 %4075, %v81_v48  }
  0x59   :  { %299 = vperm.xlu1 %4076, %v84_v49   ;;  %294 = vperm.xlu0 %4075, %v83_v50  }
  0x5d   :  { %309 = vperm.xlu1 %4076, %v86_v51   ;;  %304 = vperm.xlu0 %4075, %v85_v52  }
  0x61   :  { %319 = vperm.xlu1 %4076, %v88_v53   ;;  %314 = vperm.xlu0 %4075, %v87_v54  }
  0x65   :  { %329 = vperm.xlu1 %4076, %v90_v55   ;;  %324 = vperm.xlu0 %4075, %v89_v56  }
  0x69   :  { %339 = vperm.xlu1 %4076, %v92_v57   ;;  %334 = vperm.xlu0 %4075, %v91_v58  }
  0x6d   :  { %349 = vperm.xlu1 %4076, %v94_v59   ;;  %344 = vperm.xlu0 %4075, %v93_v60  }
  0x71   :  { %359 = vperm.xlu1 %4076, %v96_v61   ;;  %354 = vperm.xlu0 %4075, %v95_v62  }
  0x75   :  { %369 = vperm.xlu1 %4076, %v98_v63   ;;  %364 = vperm.xlu0 %4075, %v97_v0  }
  0x79   :  { %379 = vperm.xlu1 %4076, %v100_v1   ;;  %374 = vperm.xlu0 %4075, %v99_v2  }
  0x7d   :  { %389 = vperm.xlu1 %4076, %v102_v3   ;;  %384 = vperm.xlu0 %4075, %v101_v4  }
  0x81   :  { %399 = vperm.xlu1 %4076, %v104_v5   ;;  %394 = vperm.xlu0 %4075, %v103_v6  }
  0x85   :  { %409 = vperm.xlu1 %4076, %v106_v7   ;;  %404 = vperm.xlu0 %4075, %v105_v8  }
  0x89   :  { %419 = vperm.xlu1 %4076, %v108_v10   ;;  %414 = vperm.xlu0 %4075, %v107_v11  }
  0x8d   :  { %119 = vperm.xlu1 %4076, %v48_v12   ;;  %114 = vperm.xlu0 %4075, %v47_v13  }
  0x91   :  { %625 = vperm.xlu1 %4076, %v110_v15   ;;  %491 = vperm.xlu0 %4075, %v109_v16  }
  0x94   :  { %v135_v17 = vpop.permute.xlu1 %134  ;;  %v125_v18 = vpop.permute.xlu0 %124 }
  0x95   :  { %v501_v25 = vmul.f32 %v4409_v19, %v135_v17  ;;  %v428_v28 = vmul.f32 %v4414_v20, %v125_v18  ;;  %v430_v31 = vmul.f32 %v4414_v20, %v135_v17  ;;  %v634_v34 = vmul.f32 %v4419_v23, %v135_v17 }
  0x96   :  { %v4430_v35 = vmul.f32 %v4409_v19, %v125_v18  ;;  %v4433_v36 = vmul.f32 %v4419_v23, %v125_v18 }
  0x98   :  { %v140_v21 = vpop.permute.xlu1 %139  ;;  %v130_v22 = vpop.permute.xlu0 %129 }
  0x99   :  { %v502_v26 = vmul.f32 %v4409_v19, %v140_v21  ;;  %v429_v27 = vmul.f32 %v4414_v20, %v130_v22  ;;  %v500_v29 = vmul.f32 %v4409_v19, %v130_v22  ;;  %v635_v32 = vmul.f32 %v4419_v23, %v140_v21 }
  0x9a   :  { %v431_v41 = vmul.f32 %v4414_v20, %v140_v21  ;;  %v4446_v49 = vmul.f32 %v4419_v23, %v130_v22 }
  0x9b   :  { %v563_v33 = vadd.f32 %v501_v25, %v429_v27  ;;  %v562_v38 = vadd.f32 %v500_v29, %v428_v28  ;;  %v564_v42 = vadd.f32 %v502_v26, %v430_v31 }
  0x9c   :  { %v150_v39 = vpop.permute.xlu1 %149  ;;  %v145_v40 = vpop.permute.xlu0 %144 }
  0x9d   :  { %v697_v43 = vadd.f32 %v635_v32, %v563_v33  ;;  %v504_v44 = vmul.f32 %v4409_v19, %v150_v39  ;;  %v696_v45 = vadd.f32 %v634_v34, %v562_v38  ;;  %v432_v46 = vmul.f32 %v4414_v20, %v145_v40 }
  0x9e   :  { %v503_v47 = vmul.f32 %v4409_v19, %v145_v40  ;;  %v636_v48 = vmul.f32 %v4419_v23, %v145_v40  ;;  %v433_v51 = vmul.f32 %v4414_v20, %v150_v39  ;;  %v637_v52 = vmul.f32 %v4419_v23, %v150_v39 }
  0x9f   :  { %v766_v50 = vadd.f32 %v4438_v37, %v697_v43  ;;  %v765_v53 = vadd.f32 %v4438_v37, %v696_v45  ;;  %v566_v55 = vadd.f32 %v504_v44, %v432_v46 }
  0xa0   :  { %v565_v54 = vadd.f32 %v503_v47, %v431_v41  ;;  %v698_v56 = vadd.f32 %v636_v48, %v564_v42  ;;  %v160_v57 = vpop.permute.xlu1 %159  ;;  %v155_v58 = vpop.permute.xlu0 %154 }
  0xa1   :  { %v435_v59 = vmul.f32 %v4414_v20, %v160_v57  ;;  %v506_v60 = vmul.f32 %v4409_v19, %v160_v57  ;;  %v639_v61 = vmul.f32 %v4419_v23, %v160_v57  ;;  %v434_v62 = vmul.f32 %v4414_v20, %v155_v58 }
  0xa2   :  { %v699_v63 = vadd.f32 %v637_v52, %v565_v54  ;;  %v767_v0 = vadd.f32 %v4438_v37, %v698_v56  ;;  %v505_v1 = vmul.f32 %v4409_v19, %v155_v58  ;;  %v638_v2 = vmul.f32 %v4419_v23, %v155_v58 }
  0xa3   :  { %v568_v3 = vadd.f32 %v506_v60, %v434_v62  ;;  %vm827_vm2 = vcmp.ge.f32.partialorder %v765_v53, 0.0  ;;  %vm828_vm3 = vcmp.ge.f32.partialorder %v766_v50, 0.0  ;;  %v889_v4 = vmul.f32 0.1, %v765_v53 }
  0xa4   :  { %v768_v5 = vadd.f32 %v4438_v37, %v699_v63  ;;  %v891_v6 = vmul.f32 0.1, %v767_v0  ;;  %v567_v7 = vadd.f32 %v505_v1, %v433_v51  ;;  %v700_v8 = vadd.f32 %v638_v2, %v566_v55  ;;  %v170_v10 = vpop.permute.xlu1 %169  ;;  %v165_v11 = vpop.permute.xlu0 %164 }
  0xa5   :  { %v437_v12 = vmul.f32 %v4414_v20, %v170_v10  ;;  %v508_v13 = vmul.f32 %v4409_v19, %v170_v10  ;;  %v641_v15 = vmul.f32 %v4419_v23, %v170_v10  ;;  %v436_v16 = vmul.f32 %v4414_v20, %v165_v11 }
  0xa6   :  { %v701_v17 = vadd.f32 %v639_v61, %v567_v7  ;;  %v769_v18 = vadd.f32 %v4438_v37, %v700_v8  ;;  %v507_v21 = vmul.f32 %v4409_v19, %v165_v11  ;;  %v640_v22 = vmul.f32 %v4419_v23, %v165_v11 }
  0xa7   :  { %v570_v25 = vadd.f32 %v508_v13, %v436_v16  ;;  %v890_v26 = vmul.f32 0.1, %v766_v50  ;;  %v951_v27 = vsel %vm827_vm2, %v765_v53, %v889_v4  ;;  %vm829_vm4 = vcmp.ge.f32.partialorder %v767_v0, 0.0 }
  0xa8   :  { %v770_v28 = vadd.f32 %v4438_v37, %v701_v17  ;;  %v893_v29 = vmul.f32 0.1, %v769_v18  ;;  %v569_v31 = vadd.f32 %v507_v21, %v435_v59  ;;  %v702_v32 = vadd.f32 %v640_v22, %v568_v3  ;;  %v180_v33 = vpop.permute.xlu1 %179  ;;  %v175_v34 = vpop.permute.xlu0 %174 }
  0xa9   :  { %v952_v38 = vsel %vm828_vm3, %v766_v50, %v890_v26  ;;  %v439_v39 = vmul.f32 %v4414_v20, %v180_v33  ;;  %v510_v40 = vmul.f32 %v4409_v19, %v180_v33  ;;  %v643_v41 = vmul.f32 %v4419_v23, %v180_v33 }
  0xaa   :  { %v703_v42 = vadd.f32 %v641_v15, %v569_v31  ;;  %v4474_v43 = vadd.f32 %v4438_v37, %v702_v32  ;;  %v4476_v44 = vmax.f32 %v951_v27, %v952_v38  ;;  %v438_v45 = vmul.f32 %v4414_v20, %v175_v34 }
  0xab   :  { %v509_v46 = vmul.f32 %v4409_v19, %v175_v34  ;;  %v642_v47 = vmul.f32 %v4419_v23, %v175_v34  ;;  %vm830_vm5 = vcmp.ge.f32.partialorder %v768_v5, 0.0  ;;  %v892_v48 = vmul.f32 0.1, %v768_v5 }
  0xac   :  { %v4482_v50 = vadd.f32 %v4438_v37, %v703_v42  ;;  %v895_v51 = vmul.f32 0.1, %v4474_v43  ;;  %3386 = vmatmul.mubr.msk.f32.vlgmr.msra.gmra.mrb[0].mxu0 %vm1051_vm1, %v4476_v44  ;;  %v572_v52 = vadd.f32 %v510_v40, %v438_v45  ;;  %v953_v53 = vsel %vm829_vm4, %v767_v0, %v891_v6  ;;  %v190_v54 = vpop.permute.xlu1 %189  ;;  %v185_v55 = vpop.permute.xlu0 %184 }
  0xad   :  { %3889 = vmatpush3.bf16.msra.mxu0 %v4247_v24  ;;  %v571_v56 = vadd.f32 %v509_v46, %v437_v12  ;;  %v704_v57 = vadd.f32 %v642_v47, %v570_v25  ;;  %3388 = vmatprep.mubr.msk.f32.mxu0 %vm4134_vm0, %v4135_v14  ;;  %v954_v58 = vsel %vm830_vm5, %v768_v5, %v892_v48  ;;  %vm831_vm6 = vcmp.ge.f32.partialorder %v769_v18, 0.0 }
  0xae   :  { %v4491_v59 = vmax.f32 %v953_v53, %v954_v58  ;;  %v441_v60 = vmul.f32 %v4414_v20, %v190_v54  ;;  %v512_v61 = vmul.f32 %v4409_v19, %v190_v54  ;;  %v645_v62 = vmul.f32 %v4419_v23, %v190_v54  ;;  %3890 = vmatprep.subr.bf16.mxu0 %v4133_v9 }
  0xaf   :  { %v705_v63 = vadd.f32 %v643_v41, %v571_v56  ;;  %v4498_v24 = vadd.f32 %v4438_v37, %v704_v57  ;;  %v440_v0 = vmul.f32 %v4414_v20, %v185_v55  ;;  %v511_v1 = vmul.f32 %v4409_v19, %v185_v55 }
  0xb0   :  { %3389 = vmatmul.mubr.msk.f32.gmra.mrb[2].mxu0 %vm1051_vm1, %v4491_v59  ;;  %v644_v2 = vmul.f32 %v4419_v23, %v185_v55  ;;  %vm832_vm7 = vcmp.ge.f32.partialorder %v770_v28, 0.0  ;;  %v894_v3 = vmul.f32 0.1, %v770_v28  ;;  %v955_v4 = vsel %vm831_vm6, %v769_v18, %v893_v29  ;;  %v200_v5 = vpop.permute.xlu1 %199  ;;  %v195_v6 = vpop.permute.xlu0 %194 }
  0xb1   :  { %v774_v7 = vadd.f32 %v4438_v37, %v705_v63  ;;  %v897_v8 = vmul.f32 0.1, %v4498_v24  ;;  %v573_v10 = vadd.f32 %v511_v1, %v439_v39  ;;  %v574_v11 = vadd.f32 %v512_v61, %v440_v0  ;;  %3391 = vmatprep.mubr.msk.f32.mxu0 %vm4134_vm0, %v4135_v14  ;;  %3892 = vmatpush3.bf16.msra.mxu0 %v4258_v30 }
  0xb2   :  { %v706_v12 = vadd.f32 %v644_v2, %v572_v52  ;;  %v956_v13 = vsel %vm832_vm7, %v770_v28, %v894_v3  ;;  %v443_v15 = vmul.f32 %v4414_v20, %v200_v5  ;;  %v514_v16 = vmul.f32 %v4409_v19, %v200_v5  ;;  %3893 = vmatprep.subr.bf16.mxu0 %v4133_v9 }
  0xb3   :  { %v707_v17 = vadd.f32 %v645_v62, %v573_v10  ;;  %v4513_v18 = vmax.f32 %v955_v4, %v956_v13  ;;  %v647_v21 = vmul.f32 %v4419_v23, %v200_v5  ;;  %v442_v22 = vmul.f32 %v4414_v20, %v195_v6 }
  0xb4   :  { %v4518_v25 = vadd.f32 %v4438_v37, %v706_v12  ;;  %v513_v30 = vmul.f32 %v4409_v19, %v195_v6  ;;  %v646_v26 = vmul.f32 %v4419_v23, %v195_v6  ;;  %vm833_vm8 = vcmp.ge.f32.partialorder %v4474_v43, 0.0  ;;  %v210_v27 = vpop.permute.xlu1 %209  ;;  %v205_v28 = vpop.permute.xlu0 %204 }
  0xb5   :  { %v4524_v29 = vadd.f32 %v4438_v37, %v707_v17  ;;  %3392 = vmatmul.mubr.msk.f32.gmra.mrb[4].mxu0 %vm1051_vm1, %v4513_v18  ;;  %3490 = vmatmul.mubr.msk.f32.vlgmr.msra.gmra.mrb[0].mxu1 %vm1051_vm1, %v4513_v18  ;;  %v576_v31 = vadd.f32 %v514_v16, %v442_v22  ;;  %vm834_vm9 = vcmp.ge.f32.partialorder %v4482_v50, 0.0  ;;  %v896_v32 = vmul.f32 0.1, %v4482_v50 }
  0xb6   :  { %v899_v33 = vmul.f32 0.1, %v4518_v25  ;;  %v575_v34 = vadd.f32 %v513_v30, %v441_v60  ;;  %v708_v38 = vadd.f32 %v646_v26, %v574_v11  ;;  %3394 = vmatprep.mubr.msk.f32.mxu0 %vm4134_vm0, %v4135_v14  ;;  %3492 = vmatprep.mubr.msk.f32.mxu1 %vm4134_vm0, %v4135_v14  ;;  %v957_v39 = vsel %vm833_vm8, %v4474_v43, %v895_v51 }
  0xb7   :  { %v958_v40 = vsel %vm834_vm9, %v4482_v50, %v896_v32  ;;  %v445_v41 = vmul.f32 %v4414_v20, %v210_v27  ;;  %v516_v42 = vmul.f32 %v4409_v19, %v210_v27  ;;  %v649_v45 = vmul.f32 %v4419_v23, %v210_v27 }
  0xb8   :  { %v709_v46 = vadd.f32 %v647_v21, %v575_v34  ;;  %v4543_v47 = vadd.f32 %v4438_v37, %v708_v38  ;;  %v4545_v48 = vmax.f32 %v957_v39, %v958_v40  ;;  %v444_v52 = vmul.f32 %v4414_v20, %v205_v28  ;;  %v220_v53 = vpop.permute.xlu1 %219  ;;  %v215_v54 = vpop.permute.xlu0 %214 }
  0xb9   :  { %v515_v43 = vmul.f32 %v4409_v19, %v205_v28  ;;  %v648_v50 = vmul.f32 %v4419_v23, %v205_v28  ;;  %vm835_vm10 = vcmp.ge.f32.partialorder %v4498_v24, 0.0  ;;  %vm836_vm11 = vcmp.ge.f32.partialorder %v774_v7, 0.0 }
  0xba   :  { %v4552_v51 = vadd.f32 %v4438_v37, %v709_v46  ;;  %v901_v55 = vmul.f32 0.1, %v4543_v47  ;;  %3395 = vmatmul.mubr.msk.f32.gmra.mrb[6].mxu0 %vm1051_vm1, %v4545_v48  ;;  %3493 = vmatmul.mubr.msk.f32.gmra.mrb[2].mxu1 %vm1051_vm1, %v4545_v48  ;;  %v578_v56 = vadd.f32 %v516_v42, %v444_v52  ;;  %v898_v57 = vmul.f32 0.1, %v774_v7 }
  0xbb   :  { %v577_v58 = vadd.f32 %v515_v43, %v443_v15  ;;  %v710_v60 = vadd.f32 %v648_v50, %v576_v31  ;;  %3397 = vmatprep.mubr.msk.f32.mxu0 %vm4134_vm0, %v4135_v14  ;;  %3495 = vmatprep.mubr.msk.f32.mxu1 %vm4134_vm0, %v4135_v14  ;;  %v959_v61 = vsel %vm835_vm10, %v4498_v24, %v897_v8  ;;  %vm837_vm12 = vcmp.ge.f32.partialorder %v4518_v25, 0.0 }
  0xbc   :  { %v960_v62 = vsel %vm836_vm11, %v774_v7, %v898_v57  ;;  %v447_v63 = vmul.f32 %v4414_v20, %v220_v53  ;;  %v518_v0 = vmul.f32 %v4409_v19, %v220_v53  ;;  %v651_v1 = vmul.f32 %v4419_v23, %v220_v53  ;;  %v230_v2 = vpop.permute.xlu1 %229  ;;  %v225_v3 = vpop.permute.xlu0 %224 }
  0xbd   :  { %v711_v4 = vadd.f32 %v649_v45, %v577_v58  ;;  %v4569_v5 = vadd.f32 %v4438_v37, %v710_v60  ;;  %v4571_v6 = vmax.f32 %v959_v61, %v960_v62  ;;  %v446_v10 = vmul.f32 %v4414_v20, %v215_v54 }
  0xbe   :  { %v517_v24 = vmul.f32 %v4409_v19, %v215_v54  ;;  %v650_v7 = vmul.f32 %v4419_v23, %v215_v54  ;;  %vm838_vm13 = vcmp.ge.f32.partialorder %v4524_v29, 0.0  ;;  %v900_v8 = vmul.f32 0.1, %v4524_v29 }
  0xbf   :  { %v4579_v11 = vadd.f32 %v4438_v37, %v711_v4  ;;  %v903_v12 = vmul.f32 0.1, %v4569_v5  ;;  %3398 = vmatmul.mubr.msk.f32.gmra.mrb[8].mxu0 %vm1051_vm1, %v4571_v6  ;;  %3496 = vmatmul.mubr.msk.f32.gmra.mrb[4].mxu1 %vm1051_vm1, %v4571_v6  ;;  %v580_v13 = vadd.f32 %v518_v0, %v446_v10  ;;  %v961_v15 = vsel %vm837_vm12, %v4518_v25, %v899_v33 }
  0xc0   :  { %v579_v16 = vadd.f32 %v517_v24, %v445_v41  ;;  %v712_v17 = vadd.f32 %v650_v7, %v578_v56  ;;  %3400 = vmatprep.mubr.msk.f32.mxu0 %vm4134_vm0, %v4135_v14  ;;  %3498 = vmatprep.mubr.msk.f32.mxu1 %vm4134_vm0, %v4135_v14  ;;  %v962_v21 = vsel %vm838_vm13, %v4524_v29, %v900_v8  ;;  %vm839_vm14 = vcmp.ge.f32.partialorder %v4543_v47, 0.0  ;;  %v240_v22 = vpop.permute.xlu1 %239  ;;  %v235_v30 = vpop.permute.xlu0 %234 }
  0xc1   :  { %v4595_v26 = vmax.f32 %v961_v15, %v962_v21  ;;  %v449_v27 = vmul.f32 %v4414_v20, %v230_v2  ;;  %v520_v25 = vmul.f32 %v4409_v19, %v230_v2  ;;  %v653_v28 = vmul.f32 %v4419_v23, %v230_v2 }
  0xc2   :  { %v713_v31 = vadd.f32 %v651_v1, %v579_v16  ;;  %v4601_v32 = vadd.f32 %v4438_v37, %v712_v17  ;;  %v448_v33 = vmul.f32 %v4414_v20, %v225_v3  ;;  %v519_v29 = vmul.f32 %v4409_v19, %v225_v3 }
  0xc3   :  { %3401 = vmatmul.mubr.msk.f32.gmra.mrb[10].mxu0 %vm1051_vm1, %v4595_v26  ;;  %3499 = vmatmul.mubr.msk.f32.gmra.mrb[6].mxu1 %vm1051_vm1, %v4595_v26  ;;  %v652_v34 = vmul.f32 %v4419_v23, %v225_v3  ;;  %vm840_vm15 = vcmp.ge.f32.partialorder %v4552_v51, 0.0  ;;  %v902_v38 = vmul.f32 0.1, %v4552_v51  ;;  %v963_v39 = vsel %vm839_vm14, %v4543_v47, %v901_v55 }
  0xc4   :  { %v782_v40 = vadd.f32 %v4438_v37, %v713_v31  ;;  %v905_v41 = vmul.f32 0.1, %v4601_v32  ;;  %v581_v42 = vadd.f32 %v519_v29, %v447_v63  ;;  %v582_v45 = vadd.f32 %v520_v25, %v448_v33  ;;  %3403 = vmatprep.mubr.msk.f32.mxu0 %vm4134_vm0, %v4135_v14  ;;  %3501 = vmatprep.mubr.msk.f32.mxu1 %vm4134_vm0, %v4135_v14  ;;  %v250_v46 = vpop.permute.xlu1 %249  ;;  %v245_v52 = vpop.permute.xlu0 %244 }
  0xc5   :  { %v714_v53 = vadd.f32 %v652_v34, %v580_v13  ;;  %v964_v54 = vsel %vm840_vm15, %v4552_v51, %v902_v38  ;;  %v451_v43 = vmul.f32 %v4414_v20, %v240_v22  ;;  %v522_v47 = vmul.f32 %v4409_v19, %v240_v22 }
  0xc6   :  { %v715_v50 = vadd.f32 %v653_v28, %v581_v42  ;;  %v4624_v55 = vmax.f32 %v963_v39, %v964_v54  ;;  %v655_v56 = vmul.f32 %v4419_v23, %v240_v22  ;;  %v450_v57 = vmul.f32 %v4414_v20, %v235_v30 }
  0xc7   :  { %v4629_v58 = vadd.f32 %v4438_v37, %v714_v53  ;;  %v521_v60 = vmul.f32 %v4409_v19, %v235_v30  ;;  %v654_v61 = vmul.f32 %v4419_v23, %v235_v30  ;;  %vm841_vm2 = vcmp.ge.f32.partialorder %v4569_v5, 0.0 }
  0xc8   :  { %v4635_v51 = vadd.f32 %v4438_v37, %v715_v50  ;;  %3404 = vmatmul.mubr.msk.f32.gmra.mrb[12].mxu0 %vm1051_vm1, %v4624_v55  ;;  %3502 = vmatmul.mubr.msk.f32.gmra.mrb[8].mxu1 %vm1051_vm1, %v4624_v55  ;;  %v584_v62 = vadd.f32 %v522_v47, %v450_v57  ;;  %vm842_vm3 = vcmp.ge.f32.partialorder %v4579_v11, 0.0  ;;  %v904_v63 = vmul.f32 0.1, %v4579_v11  ;;  %v260_v0 = vpop.permute.xlu1 %259  ;;  %v255_v1 = vpop.permute.xlu0 %254 }
  0xc9   :  { %v907_v2 = vmul.f32 0.1, %v4629_v58  ;;  %v583_v3 = vadd.f32 %v521_v60, %v449_v27  ;;  %v716_v4 = vadd.f32 %v654_v61, %v582_v45  ;;  %3406 = vmatprep.mubr.msk.f32.mxu0 %vm4134_vm0, %v4135_v14  ;;  %3504 = vmatprep.mubr.msk.f32.mxu1 %vm4134_vm0, %v4135_v14  ;;  %v965_v10 = vsel %vm841_vm2, %v4569_v5, %v903_v12 }
  0xca   :  { %v966_v24 = vsel %vm842_vm3, %v4579_v11, %v904_v63  ;;  %v453_v7 = vmul.f32 %v4414_v20, %v250_v46  ;;  %v524_v8 = vmul.f32 %v4409_v19, %v250_v46  ;;  %v657_v13 = vmul.f32 %v4419_v23, %v250_v46 }
  0xcb   :  { %v717_v15 = vadd.f32 %v655_v56, %v583_v3  ;;  %v4654_v16 = vadd.f32 %v4438_v37, %v716_v4  ;;  %v4656_v17 = vmax.f32 %v965_v10, %v966_v24  ;;  %v452_v21 = vmul.f32 %v4414_v20, %v245_v52 }
  0xcc   :  { %v523_v22 = vmul.f32 %v4409_v19, %v245_v52  ;;  %v656_v5 = vmul.f32 %v4419_v23, %v245_v52  ;;  %vm843_vm4 = vcmp.ge.f32.partialorder %v4601_v32, 0.0  ;;  %vm844_vm5 = vcmp.ge.f32.partialorder %v782_v40, 0.0  ;;  %v270_v11 = vpop.permute.xlu1 %269  ;;  %v265_v12 = vpop.permute.xlu0 %264 }
  0xcd   :  { %v786_v30 = vadd.f32 %v4438_v37, %v717_v15  ;;  %v909_v27 = vmul.f32 0.1, %v4654_v16  ;;  %3407 = vmatmul.mubr.msk.f32.gmra.mrb[14].mxu0 %vm1051_vm1, %v4656_v17  ;;  %3505 = vmatmul.mubr.msk.f32.gmra.mrb[10].mxu1 %vm1051_vm1, %v4656_v17  ;;  %v586_v25 = vadd.f32 %v524_v8, %v452_v21  ;;  %v906_v28 = vmul.f32 0.1, %v782_v40 }
  0xce   :  { %v585_v31 = vadd.f32 %v523_v22, %v451_v43  ;;  %v718_v33 = vadd.f32 %v656_v5, %v584_v62  ;;  %3409 = vmatprep.mubr.msk.f32.mxu0 %vm4134_vm0, %v4135_v14  ;;  %3507 = vmatprep.mubr.msk.f32.mxu1 %vm4134_vm0, %v4135_v14  ;;  %v967_v29 = vsel %vm843_vm4, %v4601_v32, %v905_v41  ;;  %vm845_vm6 = vcmp.ge.f32.partialorder %v4629_v58, 0.0 }
  0xcf   :  { %v968_v34 = vsel %vm844_vm5, %v782_v40, %v906_v28  ;;  %v455_v38 = vmul.f32 %v4414_v20, %v260_v0  ;;  %v526_v39 = vmul.f32 %v4409_v19, %v260_v0  ;;  %v659_v42 = vmul.f32 %v4419_v23, %v260_v0 }
  0xd0   :  { %v719_v45 = vadd.f32 %v657_v13, %v585_v31  ;;  %v4678_v46 = vadd.f32 %v4438_v37, %v718_v33  ;;  %v4680_v52 = vmax.f32 %v967_v29, %v968_v34  ;;  %v454_v53 = vmul.f32 %v4414_v20, %v255_v1  ;;  %v280_v54 = vpop.permute.xlu1 %279  ;;  %v275_v43 = vpop.permute.xlu0 %274 }
  0xd1   :  { %v525_v32 = vmul.f32 %v4409_v19, %v255_v1  ;;  %v658_v40 = vmul.f32 %v4419_v23, %v255_v1  ;;  %vm846_vm7 = vcmp.ge.f32.partialorder %v4635_v51, 0.0  ;;  %v908_v41 = vmul.f32 0.1, %v4635_v51 }
  0xd2   :  { %v4688_v47 = vadd.f32 %v4438_v37, %v719_v45  ;;  %v911_v50 = vmul.f32 0.1, %v4678_v46  ;;  %3410 = vmatmul.mubr.msk.f32.gmra.mrb[16].mxu0 %vm1051_vm1, %v4680_v52  ;;  %3508 = vmatmul.mubr.msk.f32.gmra.mrb[12].mxu1 %vm1051_vm1, %v4680_v52  ;;  %v588_v56 = vadd.f32 %v526_v39, %v454_v53  ;;  %v969_v57 = vsel %vm845_vm6, %v4629_v58, %v907_v2 }
  0xd3   :  { %v587_v60 = vadd.f32 %v525_v32, %v453_v7  ;;  %v720_v61 = vadd.f32 %v658_v40, %v586_v25  ;;  %3412 = vmatprep.mubr.msk.f32.mxu0 %vm4134_vm0, %v4135_v14  ;;  %3510 = vmatprep.mubr.msk.f32.mxu1 %vm4134_vm0, %v4135_v14  ;;  %v970_v62 = vsel %vm846_vm7, %v4635_v51, %v908_v41  ;;  %vm847_vm8 = vcmp.ge.f32.partialorder %v4654_v16, 0.0 }
  0xd4   :  { %v4704_v63 = vmax.f32 %v969_v57, %v970_v62  ;;  %v457_v0 = vmul.f32 %v4414_v20, %v270_v11  ;;  %v528_v1 = vmul.f32 %v4409_v19, %v270_v11  ;;  %v661_v58 = vmul.f32 %v4419_v23, %v270_v11  ;;  %v290_v2 = vpop.permute.xlu1 %289  ;;  %v285_v3 = vpop.permute.xlu0 %284 }
  0xd5   :  { %v721_v4 = vadd.f32 %v659_v42, %v587_v60  ;;  %v4710_v10 = vadd.f32 %v4438_v37, %v720_v61  ;;  %v456_v24 = vmul.f32 %v4414_v20, %v265_v12  ;;  %v527_v51 = vmul.f32 %v4409_v19, %v265_v12 }
  0xd6   :  { %3413 = vmatmul.mubr.msk.f32.gmra.mrb[18].mxu0 %vm1051_vm1, %v4704_v63  ;;  %3511 = vmatmul.mubr.msk.f32.gmra.mrb[14].mxu1 %vm1051_vm1, %v4704_v63  ;;  %v660_v7 = vmul.f32 %v4419_v23, %v265_v12  ;;  %vm848_vm9 = vcmp.ge.f32.partialorder %v786_v30, 0.0  ;;  %v910_v8 = vmul.f32 0.1, %v786_v30  ;;  %v971_v13 = vsel %vm847_vm8, %v4654_v16, %v909_v27 }
  0xd7   :  { %v790_v15 = vadd.f32 %v4438_v37, %v721_v4  ;;  %v913_v21 = vmul.f32 0.1, %v4710_v10  ;;  %v589_v22 = vadd.f32 %v527_v51, %v455_v38  ;;  %v590_v5 = vadd.f32 %v528_v1, %v456_v24  ;;  %3415 = vmatprep.mubr.msk.f32.mxu0 %vm4134_vm0, %v4135_v14  ;;  %3513 = vmatprep.mubr.msk.f32.mxu1 %vm4134_vm0, %v4135_v14 }
  0xd8   :  { %v722_v11 = vadd.f32 %v660_v7, %v588_v56  ;;  %v972_v12 = vsel %vm848_vm9, %v786_v30, %v910_v8  ;;  %v459_v25 = vmul.f32 %v4414_v20, %v280_v54  ;;  %v530_v28 = vmul.f32 %v4409_v19, %v280_v54  ;;  %v300_v31 = vpop.permute.xlu1 %299  ;;  %v295_v16 = vpop.permute.xlu0 %294 }
  0xd9   :  { %v723_v27 = vadd.f32 %v661_v58, %v589_v22  ;;  %v4730_v33 = vmax.f32 %v971_v13, %v972_v12  ;;  %v663_v29 = vmul.f32 %v4419_v23, %v280_v54  ;;  %v458_v34 = vmul.f32 %v4414_v20, %v275_v43 }
  0xda   :  { %v4735_v38 = vadd.f32 %v4438_v37, %v722_v11  ;;  %v529_v39 = vmul.f32 %v4409_v19, %v275_v43  ;;  %v662_v30 = vmul.f32 %v4419_v23, %v275_v43  ;;  %vm849_vm10 = vcmp.ge.f32.partialorder %v4678_v46, 0.0 }
  0xdb   :  { %v4741_v42 = vadd.f32 %v4438_v37, %v723_v27  ;;  %3416 = vmatmul.mubr.msk.f32.gmra.mrb[20].mxu0 %vm1051_vm1, %v4730_v33  ;;  %3514 = vmatmul.mubr.msk.f32.gmra.mrb[16].mxu1 %vm1051_vm1, %v4730_v33  ;;  %v592_v45 = vadd.f32 %v530_v28, %v458_v34  ;;  %vm850_vm11 = vcmp.ge.f32.partialorder %v4688_v47, 0.0  ;;  %v912_v53 = vmul.f32 0.1, %v4688_v47 }
  0xdc   :  { %v915_v54 = vmul.f32 0.1, %v4735_v38  ;;  %v591_v32 = vadd.f32 %v529_v39, %v457_v0  ;;  %v724_v43 = vadd.f32 %v662_v30, %v590_v5  ;;  %3418 = vmatprep.mubr.msk.f32.mxu0 %vm4134_vm0, %v4135_v14  ;;  %3516 = vmatprep.mubr.msk.f32.mxu1 %vm4134_vm0, %v4135_v14  ;;  %v973_v40 = vsel %vm849_vm10, %v4678_v46, %v911_v50  ;;  %v310_v41 = vpop.permute.xlu1 %309  ;;  %v4755_v56 = vpop.permute.xlu0 %304 }
  0xdd   :  { %v974_v57 = vsel %vm850_vm11, %v4688_v47, %v912_v53  ;;  %v461_v60 = vmul.f32 %v4414_v20, %v290_v2  ;;  %v532_v61 = vmul.f32 %v4409_v19, %v290_v2  ;;  %v665_v62 = vmul.f32 %v4419_v23, %v290_v2 }
  0xde   :  { %v725_v0 = vadd.f32 %v663_v29, %v591_v32  ;;  %v4762_v1 = vadd.f32 %v4438_v37, %v724_v43  ;;  %v4764_v58 = vmax.f32 %v973_v40, %v974_v57  ;;  %v460_v4 = vmul.f32 %v4414_v20, %v285_v3 }
  0xdf   :  { %v531_v46 = vmul.f32 %v4409_v19, %v285_v3  ;;  %v664_v50 = vmul.f32 %v4419_v23, %v285_v3  ;;  %vm851_vm12 = vcmp.ge.f32.partialorder %v4710_v10, 0.0  ;;  %vm852_vm13 = vcmp.ge.f32.partialorder %v790_v15, 0.0 }
  0xe0   :  { %v4771_v47 = vadd.f32 %v4438_v37, %v725_v0  ;;  %v917_v2 = vmul.f32 0.1, %v4762_v1  ;;  %3419 = vmatmul.mubr.msk.f32.gmra.mrb[22].mxu0 %vm1051_vm1, %v4764_v58  ;;  %3517 = vmatmul.mubr.msk.f32.gmra.mrb[18].mxu1 %vm1051_vm1, %v4764_v58  ;;  %v594_v24 = vadd.f32 %v532_v61, %v460_v4  ;;  %v914_v51 = vmul.f32 0.1, %v790_v15  ;;  %v320_v7 = vpop.permute.xlu1 %319  ;;  %v4778_v8 = vpop.permute.xlu0 %314 }
  0xe1   :  { %v593_v3 = vadd.f32 %v531_v46, %v459_v25  ;;  %v726_v13 = vadd.f32 %v664_v50, %v592_v45  ;;  %3421 = vmatprep.mubr.msk.f32.mxu0 %vm4134_vm0, %v4135_v14  ;;  %3519 = vmatprep.mubr.msk.f32.mxu1 %vm4134_vm0, %v4135_v14  ;;  %v975_v22 = vsel %vm851_vm12, %v4710_v10, %v913_v21  ;;  %vm853_vm14 = vcmp.ge.f32.partialorder %v4735_v38, 0.0 }
  0xe2   :  { %v976_v5 = vsel %vm852_vm13, %v790_v15, %v914_v51  ;;  %v463_v11 = vmul.f32 %v4414_v20, %v300_v31  ;;  %v534_v12 = vmul.f32 %v4409_v19, %v300_v31  ;;  %v667_v28 = vmul.f32 %v4419_v23, %v300_v31 }
  0xe3   :  { %v727_v27 = vadd.f32 %v665_v62, %v593_v3  ;;  %v4790_v25 = vadd.f32 %v4438_v37, %v726_v13  ;;  %v4792_v29 = vmax.f32 %v975_v22, %v976_v5  ;;  %v462_v34 = vmul.f32 %v4414_v20, %v295_v16 }
  0xe4   :  { %v533_v39 = vmul.f32 %v4409_v19, %v295_v16  ;;  %v666_v10 = vmul.f32 %v4419_v23, %v295_v16  ;;  %vm854_vm15 = vcmp.ge.f32.partialorder %v4741_v42, 0.0  ;;  %v916_v15 = vmul.f32 0.1, %v4741_v42  ;;  %v4799_v21 = vpop.permute.xlu1 %329  ;;  %v4801_v30 = vpop.permute.xlu0 %324 }
  0xe5   :  { %v796_v31 = vadd.f32 %v4438_v37, %v727_v27  ;;  %v919_v45 = vmul.f32 0.1, %v4790_v25  ;;  %3422 = vmatmul.mubr.msk.f32.gmra.mrb[24].mxu0 %vm1051_vm1, %v4792_v29  ;;  %3520 = vmatmul.mubr.msk.f32.gmra.mrb[20].mxu1 %vm1051_vm1, %v4792_v29  ;;  %v596_v53 = vadd.f32 %v534_v12, %v462_v34  ;;  %v977_v16 = vsel %vm853_vm14, %v4735_v38, %v915_v54 }
  0xe6   :  { %v595_v32 = vadd.f32 %v533_v39, %v461_v60  ;;  %v728_v43 = vadd.f32 %v666_v10, %v594_v24  ;;  %3424 = vmatprep.mubr.msk.f32.mxu0 %vm4134_vm0, %v4135_v14  ;;  %3522 = vmatprep.mubr.msk.f32.mxu1 %vm4134_vm0, %v4135_v14  ;;  %v978_v40 = vsel %vm854_vm15, %v4741_v42, %v916_v15  ;;  %vm855_vm2 = vcmp.ge.f32.partialorder %v4762_v1, 0.0 }
  0xe7   :  { %v4818_v57 = vmax.f32 %v977_v16, %v978_v40  ;;  %v465_v61 = vmul.f32 %v4414_v20, %v310_v41  ;;  %v536_v62 = vmul.f32 %v4409_v19, %v310_v41  ;;  %v669_v38 = vmul.f32 %v4419_v23, %v310_v41 }
  0xe8   :  { %v729_v54 = vadd.f32 %v667_v28, %v595_v32  ;;  %v4824_v60 = vadd.f32 %v4438_v37, %v728_v43  ;;  %v464_v0 = vmul.f32 %v4414_v20, %v4755_v56  ;;  %v535_v42 = vmul.f32 %v4409_v19, %v4755_v56  ;;  %v4830_v4 = vpop.permute.xlu1 %339  ;;  %v4832_v46 = vpop.permute.xlu0 %334 }
  0xe9   :  { %3425 = vmatmul.mubr.msk.f32.gmra.mrb[26].mxu0 %vm1051_vm1, %v4818_v57  ;;  %3523 = vmatmul.mubr.msk.f32.gmra.mrb[22].mxu1 %vm1051_vm1, %v4818_v57  ;;  %v668_v41 = vmul.f32 %v4419_v23, %v4755_v56  ;;  %vm856_vm3 = vcmp.ge.f32.partialorder %v4771_v47, 0.0  ;;  %v918_v50 = vmul.f32 0.1, %v4771_v47  ;;  %v979_v24 = vsel %vm855_vm2, %v4762_v1, %v917_v2 }
  0xea   :  { %v798_v51 = vadd.f32 %v4438_v37, %v729_v54  ;;  %v921_v3 = vmul.f32 0.1, %v4824_v60  ;;  %v597_v13 = vadd.f32 %v535_v42, %v463_v11  ;;  %v598_v22 = vadd.f32 %v536_v62, %v464_v0  ;;  %3427 = vmatprep.mubr.msk.f32.mxu0 %vm4134_vm0, %v4135_v14  ;;  %3525 = vmatprep.mubr.msk.f32.mxu1 %vm4134_vm0, %v4135_v14 }
  0xeb   :  { %v730_v56 = vadd.f32 %v668_v41, %v596_v53  ;;  %v980_v5 = vsel %vm856_vm3, %v4771_v47, %v918_v50  ;;  %v467_v12 = vmul.f32 %v4414_v20, %v320_v7  ;;  %v538_v28 = vmul.f32 %v4409_v19, %v320_v7 }
  0xec   :  { %v731_v1 = vadd.f32 %v669_v38, %v597_v13  ;;  %v4854_v2 = vmax.f32 %v979_v24, %v980_v5  ;;  %v671_v27 = vmul.f32 %v4419_v23, %v320_v7  ;;  %v466_v11 = vmul.f32 %v4414_v20, %v4778_v8  ;;  %v4859_v34 = vpop.permute.xlu1 %349  ;;  %v4861_v39 = vpop.permute.xlu0 %344 }
  0xed   :  { %v799_v10 = vadd.f32 %v4438_v37, %v730_v56  ;;  %v537_v47 = vmul.f32 %v4409_v19, %v4778_v8  ;;  %v670_v15 = vmul.f32 %v4419_v23, %v4778_v8  ;;  %vm857_vm4 = vcmp.ge.f32.partialorder %v4790_v25, 0.0 }
  0xee   :  { %v4870_v53 = vadd.f32 %v4438_v37, %v731_v1  ;;  %3428 = vmatmul.mubr.msk.f32.gmra.mrb[28].mxu0 %vm1051_vm1, %v4854_v2  ;;  %3526 = vmatmul.mubr.msk.f32.gmra.mrb[24].mxu1 %vm1051_vm1, %v4854_v2  ;;  %v600_v7 = vadd.f32 %v538_v28, %v466_v11  ;;  %vm858_vm5 = vcmp.ge.f32.partialorder %v796_v31, 0.0  ;;  %v920_v16 = vmul.f32 0.1, %v796_v31 }
  0xef   :  { %v923_v32 = vmul.f32 0.1, %v799_v10  ;;  %v599_v43 = vadd.f32 %v537_v47, %v465_v61  ;;  %v732_v40 = vadd.f32 %v670_v15, %v598_v22  ;;  %3430 = vmatprep.mubr.msk.f32.mxu0 %vm4134_vm0, %v4135_v14  ;;  %3528 = vmatprep.mubr.msk.f32.mxu1 %vm4134_vm0, %v4135_v14  ;;  %v981_v8 = vsel %vm857_vm4, %v4790_v25, %v919_v45 }
  0xf0   :  { %v982_v62 = vsel %vm858_vm5, %v796_v31, %v920_v16  ;;  %v469_v38 = vmul.f32 %v4414_v20, %v4799_v21  ;;  %v540_v54 = vmul.f32 %v4409_v19, %v4799_v21  ;;  %v673_v0 = vmul.f32 %v4419_v23, %v4799_v21  ;;  %v4887_v61 = vpop.permute.xlu1 %359  ;;  %v4899_v21 = vpop.permute.xlu0 %354 }
  0xf1   :  { %v733_v42 = vadd.f32 %v671_v27, %v599_v43  ;;  %v801_v41 = vadd.f32 %v4438_v37, %v732_v40  ;;  %v4890_v50 = vmax.f32 %v981_v8, %v982_v62  ;;  %v468_v25 = vmul.f32 %v4414_v20, %v4801_v30 }
  0xf2   :  { %v539_v31 = vmul.f32 %v4409_v19, %v4801_v30  ;;  %v672_v45 = vmul.f32 %v4419_v23, %v4801_v30  ;;  %vm859_vm6 = vcmp.ge.f32.partialorder %v4824_v60, 0.0  ;;  %vm860_vm7 = vcmp.ge.f32.partialorder %v798_v51, 0.0 }
  0xf3   :  { %v802_v24 = vadd.f32 %v4438_v37, %v733_v42  ;;  %v925_v13 = vmul.f32 0.1, %v801_v41  ;;  %3431 = vmatmul.mubr.msk.f32.gmra.mrb[30].mxu0 %vm1051_vm1, %v4890_v50  ;;  %3529 = vmatmul.mubr.msk.f32.gmra.mrb[26].mxu1 %vm1051_vm1, %v4890_v50  ;;  %v602_v22 = vadd.f32 %v540_v54, %v468_v25  ;;  %v922_v56 = vmul.f32 0.1, %v798_v51 }
  0xf4   :  { %v601_v5 = vadd.f32 %v539_v31, %v467_v12  ;;  %v734_v28 = vadd.f32 %v672_v45, %v600_v7  ;;  %3433 = vmatprep.mubr.msk.f32.mxu0 %vm4134_vm0, %v4135_v14  ;;  %3531 = vmatprep.mubr.msk.f32.mxu1 %vm4134_vm0, %v4135_v14  ;;  %v983_v30 = vsel %vm859_vm6, %v4824_v60, %v921_v3  ;;  %vm861_vm8 = vcmp.ge.f32.partialorder %v799_v10, 0.0  ;;  %v4924_v3 = vpop.permute.xlu1 %369  ;;  %v4941_v54 = vpop.permute.xlu0 %364 }
  0xf5   :  { %v984_v1 = vsel %vm860_vm7, %v798_v51, %v922_v56  ;;  %v471_v27 = vmul.f32 %v4414_v20, %v4830_v4  ;;  %v542_v11 = vmul.f32 %v4409_v19, %v4830_v4  ;;  %v675_v12 = vmul.f32 %v4419_v23, %v4830_v4 }
  0xf6   :  { %v735_v47 = vadd.f32 %v673_v0, %v601_v5  ;;  %v4918_v15 = vadd.f32 %v4438_v37, %v734_v28  ;;  %v4920_v7 = vmax.f32 %v983_v30, %v984_v1  ;;  %v470_v60 = vmul.f32 %v4414_v20, %v4832_v46 }
  0xf7   :  { %v541_v51 = vmul.f32 %v4409_v19, %v4832_v46  ;;  %v674_v16 = vmul.f32 %v4419_v23, %v4832_v46  ;;  %vm862_vm9 = vcmp.ge.f32.partialorder %v4870_v53, 0.0  ;;  %v924_v4 = vmul.f32 0.1, %v4870_v53 }
  0xf8   :  { %v4933_v43 = vadd.f32 %v4438_v37, %v735_v47  ;;  %v927_v40 = vmul.f32 0.1, %v4918_v15  ;;  %3434 = vmatmul.mubr.msk.f32.gmra.mrb[32].mxu0 %vm1051_vm1, %v4920_v7  ;;  %3532 = vmatmul.mubr.msk.f32.gmra.mrb[28].mxu1 %vm1051_vm1, %v4920_v7  ;;  %v604_v8 = vadd.f32 %v542_v11, %v470_v60  ;;  %v985_v62 = vsel %vm861_vm8, %v799_v10, %v923_v32  ;;  %v4974_v5 = vpop.permute.xlu1 %379  ;;  %v4996_v60 = vld [vmem:[%s5876_s1 + $0x2] ss:$0 sm:$0xff] }
  0xf9   :  { %v603_v46 = vadd.f32 %v541_v51, %v469_v38  ;;  %v736_v0 = vadd.f32 %v674_v16, %v602_v22  ;;  %3436 = vmatprep.mubr.msk.f32.mxu0 %vm4134_vm0, %v4135_v14  ;;  %3534 = vmatprep.mubr.msk.f32.mxu1 %vm4134_vm0, %v4135_v14  ;;  %v986_v42 = vsel %vm862_vm9, %v4870_v53, %v924_v4  ;;  %vm863_vm10 = vcmp.ge.f32.partialorder %v801_v41, 0.0  ;;  %v4964_v53 = vld [vmem:[%s5876_s1 + $0x1] ss:$0 sm:$0xff]  ;;  %v5005_v16 = vld [vmem:[%s5877_s2] ss:$0 sm:$0xff] }
  0xfa   :  { %v4948_v25 = vmax.f32 %v985_v62, %v986_v42  ;;  %v473_v31 = vmul.f32 %v4414_v20, %v4859_v34  ;;  %v544_v10 = vmul.f32 %v4409_v19, %v4859_v34  ;;  %v677_v32 = vmul.f32 %v4419_v23, %v4859_v34 }
  0xfb   :  { %v737_v38 = vadd.f32 %v675_v12, %v603_v46  ;;  %v4957_v45 = vadd.f32 %v4438_v37, %v736_v0  ;;  %v472_v22 = vmul.f32 %v4414_v20, %v4861_v39  ;;  %v543_v56 = vmul.f32 %v4964_v53, %v4861_v39 }
  0xfc   :  { %3437 = vmatmul.mubr.msk.f32.gmra.mrb[34].mxu0 %vm1051_vm1, %v4948_v25  ;;  %3535 = vmatmul.mubr.msk.f32.gmra.mrb[30].mxu1 %vm1051_vm1, %v4948_v25  ;;  %v676_v19 = vmul.f32 %v4419_v23, %v4861_v39  ;;  %vm864_vm11 = vcmp.ge.f32.partialorder %v802_v24, 0.0  ;;  %v926_v34 = vmul.f32 0.1, %v802_v24  ;;  %v987_v20 = vsel %vm863_vm10, %v801_v41, %v925_v13  ;;  %v4985_v23 = vld [vmem:[%s5876_s1] ss:$0 sm:$0xff]  ;;  %v375_v41 = vpop.permute.xlu0 %374 }
  0xfd   :  { %v806_v28 = vadd.f32 %v4438_v37, %v737_v38  ;;  %v929_v30 = vmul.f32 0.1, %v4957_v45  ;;  %v605_v1 = vadd.f32 %v543_v56, %v471_v27  ;;  %v606_v11 = vadd.f32 %v544_v10, %v472_v22  ;;  %3439 = vmatprep.mubr.msk.f32.mxu0 %vm4134_vm0, %v4135_v14  ;;  %3537 = vmatprep.mubr.msk.f32.mxu1 %vm4134_vm0, %v4135_v14  ;;  %v390_v38 = vpop.permute.xlu1 %389 }
  0xfe   :  { %v738_v12 = vadd.f32 %v676_v19, %v604_v8  ;;  %v988_v47 = vsel %vm864_vm11, %v802_v24, %v926_v34  ;;  %v475_v37 = vmul.f32 %v4985_v23, %v4887_v61  ;;  %v546_v39 = vmul.f32 %v4964_v53, %v4887_v61 }
  0xff   :  { %v739_v13 = vadd.f32 %v677_v32, %v605_v1  ;;  %v4991_v27 = vmax.f32 %v987_v20, %v988_v47  ;;  %v679_v24 = vmul.f32 %v4996_v60, %v4887_v61  ;;  %v474_v51 = vmul.f32 %v4985_v23, %v4899_v21 }
 0x100   :  { %v807_v4 = vadd.f32 %v5005_v16, %v738_v12  ;;  %v545_v8 = vmul.f32 %v4964_v53, %v4899_v21  ;;  %v678_v62 = vmul.f32 %v4996_v60, %v4899_v21  ;;  %vm865_vm12 = vcmp.ge.f32.partialorder %v4918_v15, 0.0 }
 0x101   :  { %v5014_v61 = vadd.f32 %v5005_v16, %v739_v13  ;;  %3440 = vmatmul.mubr.msk.f32.gmra.mrb[36].mxu0 %vm1051_vm1, %v4991_v27  ;;  %3538 = vmatmul.mubr.msk.f32.gmra.mrb[32].mxu1 %vm1051_vm1, %v4991_v27  ;;  %v608_v46 = vadd.f32 %v546_v39, %v474_v51  ;;  %vm866_vm13 = vcmp.ge.f32.partialorder %v4933_v43, 0.0  ;;  %v928_v0 = vmul.f32 0.1, %v4933_v43 }
 0x102   :  { %v931_v42 = vmul.f32 0.1, %v807_v4  ;;  %v607_v10 = vadd.f32 %v545_v8, %v473_v31  ;;  %v740_v32 = vadd.f32 %v678_v62, %v606_v11  ;;  %3442 = vmatprep.mubr.msk.f32.mxu0 %vm4134_vm0, %v4135_v14  ;;  %3540 = vmatprep.mubr.msk.f32.mxu1 %vm4134_vm0, %v4135_v14  ;;  %v989_v21 = vsel %vm865_vm12, %v4918_v15, %v927_v40  ;;  %v385_v40 = vpop.permute.xlu0 %384 }
 0x103   :  { %v990_v22 = vsel %vm866_vm13, %v4933_v43, %v928_v0  ;;  %v477_v56 = vmul.f32 %v4985_v23, %v4924_v3  ;;  %v548_v19 = vmul.f32 %v4964_v53, %v4924_v3  ;;  %v681_v31 = vmul.f32 %v4996_v60, %v4924_v3 }
 0x104   :  { %v741_v34 = vadd.f32 %v679_v24, %v607_v10  ;;  %v809_v20 = vadd.f32 %v5005_v16, %v740_v32  ;;  %v5035_v1 = vmax.f32 %v989_v21, %v990_v22  ;;  %v476_v15 = vmul.f32 %v4985_v23, %v4941_v54 }
 0x105   :  { %v547_v43 = vmul.f32 %v4964_v53, %v4941_v54  ;;  %v680_v11 = vmul.f32 %v4996_v60, %v4941_v54  ;;  %vm867_vm14 = vcmp.ge.f32.partialorder %v4957_v45, 0.0  ;;  %vm868_vm15 = vcmp.ge.f32.partialorder %v806_v28, 0.0 }
 0x106   :  { %v810_v3 = vadd.f32 %v5005_v16, %v741_v34  ;;  %v933_v12 = vmul.f32 0.1, %v809_v20  ;;  %3443 = vmatmul.mubr.msk.f32.gmra.mrb[38].mxu0 %vm1051_vm1, %v5035_v1  ;;  %3541 = vmatmul.mubr.msk.f32.gmra.mrb[34].mxu1 %vm1051_vm1, %v5035_v1  ;;  %v610_v47 = vadd.f32 %v548_v19, %v476_v15  ;;  %v930_v39 = vmul.f32 0.1, %v806_v28  ;;  %v395_v22 = vpop.permute.xlu0 %394 }
 0x107   :  { %v609_v13 = vadd.f32 %v547_v43, %v475_v37  ;;  %v742_v24 = vadd.f32 %v680_v11, %v608_v46  ;;  %3445 = vmatprep.mubr.msk.f32.mxu0 %vm4134_vm0, %v4135_v14  ;;  %3543 = vmatprep.mubr.msk.f32.mxu1 %vm4134_vm0, %v4135_v14  ;;  %v991_v54 = vsel %vm867_vm14, %v4957_v45, %v929_v30  ;;  %vm869_vm2 = vcmp.ge.f32.partialorder %v807_v4, 0.0  ;;  %v400_v46 = vpop.permute.xlu1 %399 }
 0x108   :  { %v992_v51 = vsel %vm868_vm15, %v806_v28, %v930_v39  ;;  %v479_v8 = vmul.f32 %v4985_v23, %v4974_v5  ;;  %v550_v62 = vmul.f32 %v4964_v53, %v4974_v5  ;;  %v683_v37 = vmul.f32 %v4996_v60, %v4974_v5 }
 0x109   :  { %v743_v0 = vadd.f32 %v681_v31, %v609_v13  ;;  %v5061_v10 = vadd.f32 %v5005_v16, %v742_v24  ;;  %v5063_v32 = vmax.f32 %v991_v54, %v992_v51  ;;  %v478_v45 = vmul.f32 %v4985_v23, %v375_v41 }
 0x10a   :  { %v549_v28 = vmul.f32 %v4964_v53, %v375_v41  ;;  %v682_v30 = vmul.f32 %v4996_v60, %v375_v41  ;;  %vm870_vm3 = vcmp.ge.f32.partialorder %v5014_v61, 0.0  ;;  %v932_v21 = vmul.f32 0.1, %v5014_v61 }
 0x10b   :  { %v812_v5 = vadd.f32 %v5005_v16, %v743_v0  ;;  %v935_v19 = vmul.f32 0.1, %v5061_v10  ;;  %3446 = vmatmul.mubr.msk.f32.gmra.mrb[40].mxu0 %vm1051_vm1, %v5063_v32  ;;  %3544 = vmatmul.mubr.msk.f32.gmra.mrb[36].mxu1 %vm1051_vm1, %v5063_v32  ;;  %v612_v31 = vadd.f32 %v550_v62, %v478_v45  ;;  %v993_v34 = vsel %vm869_vm2, %v807_v4, %v931_v42  ;;  %v410_v54 = vpop.permute.xlu1 %409 }
 0x10c   :  { %v611_v15 = vadd.f32 %v549_v28, %v477_v56  ;;  %v744_v41 = vadd.f32 %v682_v30, %v610_v47  ;;  %3448 = vmatprep.mubr.msk.f32.mxu0 %vm4134_vm0, %v4135_v14  ;;  %3546 = vmatprep.mubr.msk.f32.mxu1 %vm4134_vm0, %v4135_v14  ;;  %v994_v43 = vsel %vm870_vm3, %v5014_v61, %v932_v21  ;;  %vm871_vm4 = vcmp.ge.f32.partialorder %v809_v20, 0.0  ;;  %v405_v28 = vpop.permute.xlu0 %404 }
 0x10d   :  { %v5082_v11 = vmax.f32 %v993_v34, %v994_v43  ;;  %v481_v39 = vmul.f32 %v4985_v23, %v390_v38  ;;  %v552_v13 = vmul.f32 %v4964_v53, %v390_v38  ;;  %v685_v24 = vmul.f32 %v4996_v60, %v390_v38 }
 0x10e   :  { %v745_v4 = vadd.f32 %v683_v37, %v611_v15  ;;  %v5088_v42 = vadd.f32 %v5005_v16, %v744_v41  ;;  %v480_v56 = vmul.f32 %v4985_v23, %v385_v40  ;;  %v551_v47 = vmul.f32 %v4964_v53, %v385_v40 }
 0x10f   :  { %3449 = vmatmul.mubr.msk.f32.gmra.mrb[42].mxu0 %vm1051_vm1, %v5082_v11  ;;  %3547 = vmatmul.mubr.msk.f32.gmra.mrb[38].mxu1 %vm1051_vm1, %v5082_v11  ;;  %v684_v61 = vmul.f32 %v4996_v60, %v385_v40  ;;  %vm872_vm5 = vcmp.ge.f32.partialorder %v810_v3, 0.0  ;;  %v934_v51 = vmul.f32 0.1, %v810_v3  ;;  %v995_v38 = vsel %vm871_vm4, %v809_v20, %v933_v12 }
 0x110   :  { %v814_v62 = vadd.f32 %v5005_v16, %v745_v4  ;;  %v937_v37 = vmul.f32 0.1, %v5088_v42  ;;  %v613_v0 = vadd.f32 %v551_v47, %v479_v8  ;;  %v614_v45 = vadd.f32 %v552_v13, %v480_v56  ;;  %3451 = vmatprep.mubr.msk.f32.mxu0 %vm4134_vm0, %v4135_v14  ;;  %3549 = vmatprep.mubr.msk.f32.mxu1 %vm4134_vm0, %v4135_v14 }
 0x111   :  { %v746_v30 = vadd.f32 %v684_v61, %v612_v31  ;;  %v996_v21 = vsel %vm872_vm5, %v810_v3, %v934_v51  ;;  %v483_v40 = vmul.f32 %v4985_v23, %v400_v46  ;;  %v554_v34 = vmul.f32 %v4964_v53, %v400_v46 }
 0x112   :  { %v747_v20 = vadd.f32 %v685_v24, %v613_v0  ;;  %v5105_v12 = vmax.f32 %v995_v38, %v996_v21  ;;  %v687_v15 = vmul.f32 %v4996_v60, %v400_v46  ;;  %v482_v8 = vmul.f32 %v4985_v23, %v395_v22  ;;  %v420_v24 = vpop.permute.xlu1 %419 }
 0x113   :  { %v815_v41 = vadd.f32 %v5005_v16, %v746_v30  ;;  %v553_v43 = vmul.f32 %v4964_v53, %v395_v22  ;;  %v686_v13 = vmul.f32 %v4996_v60, %v395_v22  ;;  %vm873_vm6 = vcmp.ge.f32.partialorder %v5061_v10, 0.0  ;;  %v415_v30 = vpop.permute.xlu0 %414 }
 0x114   :  { %v5114_v3 = vadd.f32 %v5005_v16, %v747_v20  ;;  %3452 = vmatmul.mubr.msk.f32.gmra.mrb[44].mxu0 %vm1051_vm1, %v5105_v12  ;;  %3550 = vmatmul.mubr.msk.f32.gmra.mrb[40].mxu1 %vm1051_vm1, %v5105_v12  ;;  %v616_v46 = vadd.f32 %v554_v34, %v482_v8  ;;  %vm874_vm7 = vcmp.ge.f32.partialorder %v812_v5, 0.0  ;;  %v936_v31 = vmul.f32 0.1, %v812_v5 }
 0x115   :  { %v939_v4 = vmul.f32 0.1, %v815_v41  ;;  %v615_v56 = vadd.f32 %v553_v43, %v481_v39  ;;  %v748_v47 = vadd.f32 %v686_v13, %v614_v45  ;;  %3454 = vmatprep.mubr.msk.f32.mxu0 %vm4134_vm0, %v4135_v14  ;;  %3552 = vmatprep.mubr.msk.f32.mxu1 %vm4134_vm0, %v4135_v14  ;;  %v997_v22 = vsel %vm873_vm6, %v5061_v10, %v935_v19 }
 0x116   :  { %v998_v61 = vsel %vm874_vm7, %v812_v5, %v936_v31  ;;  %v485_v51 = vmul.f32 %v4985_v23, %v410_v54  ;;  %v556_v38 = vmul.f32 %v4964_v53, %v410_v54  ;;  %v689_v0 = vmul.f32 %v4996_v60, %v410_v54  ;;  %v120_v13 = vpop.permute.xlu1 %119 }
 0x117   :  { %v749_v21 = vadd.f32 %v687_v15, %v615_v56  ;;  %v817_v39 = vadd.f32 %v5005_v16, %v748_v47  ;;  %v5129_v45 = vmax.f32 %v997_v22, %v998_v61  ;;  %v484_v34 = vmul.f32 %v4985_v23, %v405_v28 }
 0x118   :  { %v555_v20 = vmul.f32 %v4964_v53, %v405_v28  ;;  %v688_v8 = vmul.f32 %v4996_v60, %v405_v28  ;;  %vm875_vm8 = vcmp.ge.f32.partialorder %v5088_v42, 0.0  ;;  %vm876_vm9 = vcmp.ge.f32.partialorder %v814_v62, 0.0 }
 0x119   :  { %v818_v10 = vadd.f32 %v5005_v16, %v749_v21  ;;  %v941_v5 = vmul.f32 0.1, %v817_v39  ;;  %3455 = vmatmul.mubr.msk.f32.gmra.mrb[46].mxu0 %vm1051_vm1, %v5129_v45  ;;  %3553 = vmatmul.mubr.msk.f32.gmra.mrb[42].mxu1 %vm1051_vm1, %v5129_v45  ;;  %v618_v19 = vadd.f32 %v556_v38, %v484_v34  ;;  %v938_v54 = vmul.f32 0.1, %v814_v62  ;;  %v115_v21 = vpop.permute.xlu0 %114 }
 0x11a   :  { %v617_v15 = vadd.f32 %v555_v20, %v483_v40  ;;  %v750_v43 = vadd.f32 %v688_v8, %v616_v46  ;;  %3457 = vmatprep.mubr.msk.f32.mxu0 %vm4134_vm0, %v4135_v14  ;;  %3555 = vmatprep.mubr.msk.f32.mxu1 %vm4134_vm0, %v4135_v14  ;;  %v999_v28 = vsel %vm875_vm8, %v5088_v42, %v937_v37  ;;  %vm877_vm10 = vcmp.ge.f32.partialorder %v815_v41, 0.0 }
 0x11b   :  { %v1000_v31 = vsel %vm876_vm9, %v814_v62, %v938_v54  ;;  %v487_v56 = vmul.f32 %v4985_v23, %v420_v24  ;;  %v558_v47 = vmul.f32 %v4964_v53, %v420_v24  ;;  %v691_v22 = vmul.f32 %v4996_v60, %v420_v24 }
 0x11c   :  { %v751_v61 = vadd.f32 %v689_v0, %v617_v15  ;;  %v819_v40 = vadd.f32 %v5005_v16, %v750_v43  ;;  %v5149_v46 = vmax.f32 %v999_v28, %v1000_v31  ;;  %v486_v38 = vmul.f32 %v4985_v23, %v415_v30 }
 0x11d   :  { %v557_v34 = vmul.f32 %v4964_v53, %v415_v30  ;;  %v690_v42 = vmul.f32 %v4996_v60, %v415_v30  ;;  %vm878_vm11 = vcmp.ge.f32.partialorder %v5114_v3, 0.0  ;;  %v940_v62 = vmul.f32 0.1, %v5114_v3 }
 0x11e   :  { %v820_v37 = vadd.f32 %v5005_v16, %v751_v61  ;;  %v943_v20 = vmul.f32 0.1, %v819_v40  ;;  %3458 = vmatmul.mubr.msk.f32.gmra.mrb[48].mxu0 %vm1051_vm1, %v5149_v46  ;;  %3556 = vmatmul.mubr.msk.f32.gmra.mrb[44].mxu1 %vm1051_vm1, %v5149_v46  ;;  %v1001_v24 = vsel %vm877_vm10, %v815_v41, %v939_v4  ;;  %v427_v0 = vmul.f32 %v4985_v23, %v120_v13  ;;  %v626_v4 = vpop.permute.xlu1 %625 }
 0x11f   :  { %v619_v8 = vadd.f32 %v557_v34, %v485_v51  ;;  %v752_v54 = vadd.f32 %v690_v42, %v618_v19  ;;  %3460 = vmatprep.mubr.msk.f32.mxu0 %vm4134_vm0, %v4135_v14  ;;  %3558 = vmatprep.mubr.msk.f32.mxu1 %vm4134_vm0, %v4135_v14  ;;  %v1002_v30 = vsel %vm878_vm11, %v5114_v3, %v940_v62  ;;  %vm879_vm12 = vcmp.ge.f32.partialorder %v817_v39, 0.0  ;;  %v492_v34 = vpop.permute.xlu0 %491 }
 0x120   :  { %v5168_v15 = vmax.f32 %v1001_v24, %v1002_v30  ;;  %v498_v43 = vmul.f32 %v4964_v53, %v120_v13  ;;  %v561_v28 = vadd.f32 %v4430_v35, %v427_v0  ;;  %v426_v41 = vmul.f32 %v4985_v23, %v115_v21 }
 0x121   :  { %v753_v51 = vadd.f32 %v691_v22, %v619_v8  ;;  %v821_v19 = vadd.f32 %v5005_v16, %v752_v54  ;;  %vm880_vm13 = vcmp.ge.f32.partialorder %v818_v10, 0.0  ;;  %v942_v31 = vmul.f32 0.1, %v818_v10 }
 0x122   :  { %3461 = vmatmul.mubr.msk.f32.gmra.mrb[50].mxu0 %vm1051_vm1, %v5168_v15  ;;  %3559 = vmatmul.mubr.msk.f32.gmra.mrb[46].mxu1 %vm1051_vm1, %v5168_v15  ;;  %v695_v3 = vadd.f32 %v4446_v49, %v561_v28  ;;  %v560_v61 = vadd.f32 %v498_v43, %v426_v41  ;;  %v1003_v13 = vsel %vm879_vm12, %v817_v39, %v941_v5  ;;  %vm881_vm14 = vcmp.ge.f32.partialorder %v819_v40, 0.0 }
 0x123   :  { %v822_v35 = vadd.f32 %v5005_v16, %v753_v51  ;;  %v945_v23 = vmul.f32 0.1, %v821_v19  ;;  %3463 = vmatprep.mubr.msk.f32.mxu0 %vm4134_vm0, %v4135_v14  ;;  %3561 = vmatprep.mubr.msk.f32.mxu1 %vm4134_vm0, %v4135_v14  ;;  %v1004_v22 = vsel %vm880_vm13, %v818_v10, %v942_v31  ;;  %v693_v21 = vmul.f32 %v4996_v60, %v626_v4 }
 0x124   :  { %v764_v42 = vadd.f32 %v5005_v16, %v695_v3  ;;  %v694_v49 = vadd.f32 %v4433_v36, %v560_v61  ;;  %v5187_v62 = vmax.f32 %v1003_v13, %v1004_v22  ;;  %v620_v39 = vadd.f32 %v558_v47, %v486_v38  ;;  %v1561_v61 = vld [vmem:[#allocation2 + $0x40] sm:$0xff]  ;;  %v1562_v13 = vld [vmem:[#allocation2 + $0x48] sm:$0xff] }
 0x125   :  { %v559_v5 = vmul.f32 %v4964_v53, %v492_v34  ;;  %v692_v24 = vmul.f32 %v4996_v60, %v492_v34  ;;  %vm882_vm15 = vcmp.ge.f32.partialorder %v820_v37, 0.0  ;;  %v944_v0 = vmul.f32 0.1, %v820_v37 }
 0x126   :  { %vm826_vm2 = vcmp.ge.f32.partialorder %v764_v42, 0.0  ;;  %v888_v8 = vmul.f32 0.1, %v764_v42  ;;  %v763_v54 = vadd.f32 %v5005_v16, %v694_v49  ;;  %3464 = vmatmul.mubr.msk.f32.gmra.mrb[52].mxu0 %vm1051_vm1, %v5187_v62  ;;  %3562 = vmatmul.mubr.msk.f32.gmra.mrb[48].mxu1 %vm1051_vm1, %v5187_v62  ;;  %v1005_v36 = vsel %vm881_vm14, %v819_v40, %v943_v20 }
 0x127   :  { %v621_v10 = vadd.f32 %v559_v5, %v487_v56  ;;  %v754_v47 = vadd.f32 %v692_v24, %v620_v39  ;;  %3466 = vmatprep.mubr.msk.f32.mxu0 %vm4134_vm0, %v4135_v14  ;;  %3564 = vmatprep.mubr.msk.f32.mxu1 %vm4134_vm0, %v4135_v14  ;;  %v1006_v53 = vsel %vm882_vm15, %v820_v37, %v944_v0  ;;  %vm883_vm3 = vcmp.ge.f32.partialorder %v821_v19, 0.0 }
 0x128   :  { %v950_v60 = vsel %vm826_vm2, %v764_v42, %v888_v8  ;;  %vm825_vm4 = vcmp.ge.f32.partialorder %v763_v54, 0.0  ;;  %v887_v38 = vmul.f32 0.1, %v763_v54  ;;  %v5201_v30 = vmax.f32 %v1005_v36, %v1006_v53  ;;  %v3047_v53 = vld [vmem:[%s5880_s5 + $0x58] sm:$0xff] }
 0x129   :  { %v755_v43 = vadd.f32 %v693_v21, %v621_v10  ;;  %v823_v28 = vadd.f32 %v5005_v16, %v754_v47  ;;  %vm884_vm5 = vcmp.ge.f32.partialorder %v822_v35, 0.0  ;;  %v946_v40 = vmul.f32 0.1, %v822_v35  ;;  %v3046_v47 = vld [vmem:[%s5880_s5 + $0x50] sm:$0xff] }
 0x12a   :  { %v949_v56 = vsel %vm825_vm4, %v763_v54, %v887_v38  ;;  %3467 = vmatmul.mubr.msk.f32.gmra.mrb[54].mxu0 %vm1051_vm1, %v5201_v30  ;;  %3565 = vmatmul.mubr.msk.f32.gmra.mrb[50].mxu1 %vm1051_vm1, %v5201_v30  ;;  %v1007_v4 = vsel %vm883_vm3, %v821_v19, %v945_v23  ;;  %v3894_v22 = vpack.c.bf16 %v1562_v13, %v1561_v61  ;;  %v1564_v23 = vld [vmem:[#allocation2 + $0x58] sm:$0xff]  ;;  %vm1955_vm10 = vcmask 523264  }
 0x12b   :  { %v1011_v20 = vmax.f32 %v949_v56, %v950_v60  ;;  %v824_v37 = vadd.f32 %v5005_v16, %v755_v43  ;;  %v947_v41 = vmul.f32 0.1, %v823_v28  ;;  %3469 = vmatprep.mubr.msk.f32.mxu0 %vm4134_vm0, %v4135_v14  ;;  %vm885_vm6 = vcmp.ge.f32.partialorder %v823_v28, 0.0  ;;  %v3048_v43 = vld [vmem:[%s5880_s5 + $0x60] sm:$0xff] }
 0x12c   :  { %v1008_v51 = vsel %vm884_vm5, %v822_v35, %v946_v40  ;;  %v1563_v35 = vld [vmem:[#allocation2 + $0x50] sm:$0xff]  ;;  %v3903_v60 = vpack.c.bf16 %v3047_v53, %v3046_v47 }
 0x12d   :  { %v948_v31 = vmul.f32 0.1, %v824_v37  ;;  %v5212_v3 = vmax.f32 %v1007_v4, %v1008_v51  ;;  %vm886_vm7 = vcmp.ge.f32.partialorder %v824_v37, 0.0  ;;  %v5216_v34 = vsel %vm885_vm6, %v823_v28, %v947_v41  ;;  %v3049_v28 = vld [vmem:[%s5880_s5 + $0x68] sm:$0xff]  ;;  %v3050_v4 = vld [vmem:[%s5880_s5 + $0x70] sm:$0xff]  ;;  %v3051_v51 = vld [vmem:[%s5880_s5 + $0x78] sm:$0xff] }
 0x12e   :  { %v3897_v21 = vpack.c.bf16 %v1564_v23, %v1563_v35 }
 0x12f   :  { %3470 = vmatmul.mubr.msk.f32.gmra.mrb[56].mxu0 %vm1051_vm1, %v5212_v3  ;;  %v5218_v16 = vsel %vm886_vm7, %v824_v37, %v948_v31 }
 0x130   :  { %3480 = vmatprep.mubr.msk.f32.mxu0 %vm4134_vm0, %v4135_v14  ;;  %v1041_v19 = vmax.f32 %v5216_v34, %v5218_v16 }
 0x133   :  { %3481 = vmatmul.mubr.msk.f32.vlgmr.msra.gmra.mrb[58].mxu0 %vm1051_vm1, %v1011_v20 }
 0x134   :  { %3895 = vmatpush3.bf16.msra.mxu0 %v3894_v22  ;;  %3483 = vmatprep.mubr.msk.f32.mxu0 %vm4134_vm0, %v4135_v14 }
 0x135   :  { %3896 = vmatprep.subr.bf16.mxu0 %v4133_v9 }
 0x137   :  { %3484 = vmatmul.mubr.msk.f32.gmra.mrb[60].mxu0 %vm1051_vm1, %v4476_v44 }
 0x138   :  { %3898 = vmatpush3.bf16.msra.mxu0 %v3897_v21  ;;  %3486 = vmatprep.mubr.msk.f32.mxu0 %vm4134_vm0, %v4135_v14 }
 0x13b   :  { %3487 = vmatmul.mubr.msk.f32.gmra.mrb[62].mxu0 %vm1051_vm1, %v4491_v59 }
 0x13c   :  { %3575 = vmatprep.mubr.msk.f32.mxu0 %vm4134_vm0, %v4135_v14 }
 0x13f   :  { %3576 = vmatmul.mubr.msk.f32.vlgmr.msra.gmra.mrb[64].mxu0 %vm1051_vm1, %v4491_v59 }
 0x140   :  { %3578 = vmatprep.mubr.msk.f32.mxu0 %vm4134_vm0, %v4135_v14 }
 0x143   :  { %3579 = vmatmul.mubr.msk.f32.gmra.mrb[66].mxu0 %vm1051_vm1, %v4513_v18  ;;  %v3044_v18 = vld [vmem:[%s5880_s5 + $0x40] sm:$0xff] }
 0x144   :  { %3581 = vmatprep.mubr.msk.f32.mxu0 %vm4134_vm0, %v4135_v14 }
 0x147   :  { %3582 = vmatmul.mubr.msk.f32.gmra.mrb[68].mxu0 %vm1051_vm1, %v4545_v48  ;;  %v3045_v48 = vld [vmem:[%s5880_s5 + $0x48] sm:$0xff] }
 0x148   :  { %3584 = vmatprep.mubr.msk.f32.mxu0 %vm4134_vm0, %v4135_v14 }
 0x14b   :  { %3585 = vmatmul.mubr.msk.f32.gmra.mrb[70].mxu0 %vm1051_vm1, %v4571_v6 }
 0x14c   :  { %3587 = vmatprep.mubr.msk.f32.mxu0 %vm4134_vm0, %v4135_v14 }
 0x14f   :  { %3588 = vmatmul.mubr.msk.f32.gmra.mrb[72].mxu0 %vm1051_vm1, %v4595_v26  ;;  %v3899_v26 = vpack.c.bf16 %v3045_v48, %v3044_v18 }
 0x150   :  { %3590 = vmatprep.mubr.msk.f32.mxu0 %vm4134_vm0, %v4135_v14 }
 0x151   :  { %3900 = vmatprep.subr.bf16.mxu1 %v3899_v26 }
 0x152   :  { %3902 = vmatpush3.bf16.msra.mxu1 %v3899_v26 }
 0x153   :  { %3591 = vmatmul.mubr.msk.f32.gmra.mrb[74].mxu0 %vm1051_vm1, %v4624_v55  ;;  %3904 = vmatprep.subr.bf16.mxu1 %v3903_v60 }
 0x154   :  { %3593 = vmatprep.mubr.msk.f32.mxu0 %vm4134_vm0, %v4135_v14 }
 0x156   :  { %3906 = vmatpush3.bf16.msra.mxu1 %v3903_v60 }
 0x157   :  { %3594 = vmatmul.mubr.msk.f32.gmra.mrb[76].mxu0 %vm1051_vm1, %v4656_v17 }
 0x158   :  { %3596 = vmatprep.mubr.msk.f32.mxu0 %vm4134_vm0, %v4135_v14 }
 0x15b   :  { %3597 = vmatmul.mubr.msk.f32.gmra.mrb[78].mxu0 %vm1051_vm1, %v4680_v52 }
 0x15c   :  { %3599 = vmatprep.mubr.msk.f32.mxu0 %vm4134_vm0, %v4135_v14 }
 0x15f   :  { %3600 = vmatmul.mubr.msk.f32.gmra.mrb[80].mxu0 %vm1051_vm1, %v4704_v63 }
 0x160   :  { %3602 = vmatprep.mubr.msk.f32.mxu0 %vm4134_vm0, %v4135_v14 }
 0x163   :  { %3603 = vmatmul.mubr.msk.f32.gmra.mrb[82].mxu0 %vm1051_vm1, %v4730_v33 }
 0x164   :  { %3605 = vmatprep.mubr.msk.f32.mxu0 %vm4134_vm0, %v4135_v14 }
 0x167   :  { %3606 = vmatmul.mubr.msk.f32.gmra.mrb[84].mxu0 %vm1051_vm1, %v4764_v58 }
 0x168   :  { %3608 = vmatprep.mubr.msk.f32.mxu0 %vm4134_vm0, %v4135_v14 }
 0x16b   :  { %3609 = vmatmul.mubr.msk.f32.gmra.mrb[86].mxu0 %vm1051_vm1, %v4792_v29 }
 0x16c   :  { %3611 = vmatprep.mubr.msk.f32.mxu0 %vm4134_vm0, %v4135_v14 }
 0x16f   :  { %3612 = vmatmul.mubr.msk.f32.gmra.mrb[88].mxu0 %vm1051_vm1, %v4818_v57 }
 0x170   :  { %3614 = vmatprep.mubr.msk.f32.mxu0 %vm4134_vm0, %v4135_v14 }
 0x173   :  { %3615 = vmatmul.mubr.msk.f32.gmra.mrb[90].mxu0 %vm1051_vm1, %v4854_v2 }
 0x174   :  { %3617 = vmatprep.mubr.msk.f32.mxu0 %vm4134_vm0, %v4135_v14 }
 0x177   :  { %3618 = vmatmul.mubr.msk.f32.gmra.mrb[92].mxu0 %vm1051_vm1, %v4890_v50 }
 0x178   :  { %3620 = vmatprep.mubr.msk.f32.mxu0 %vm4134_vm0, %v4135_v14 }
 0x17b   :  { %3621 = vmatmul.mubr.msk.f32.gmra.mrb[94].mxu0 %vm1051_vm1, %v4920_v7 }
 0x17c   :  { %3623 = vmatprep.mubr.msk.f32.mxu0 %vm4134_vm0, %v4135_v14 }
 0x17f   :  { %3624 = vmatmul.mubr.msk.f32.gmra.mrb[96].mxu0 %vm1051_vm1, %v4948_v25  ;;  %v5302_v9 = vpop.f32.mrb[0].mxu0 }
 0x180   :  { %3626 = vmatprep.mubr.msk.f32.mxu0 %vm4134_vm0, %v4135_v14  ;;  %v3387_v44 = vpop.f32.mrb[1].mxu0 }
 0x183   :  { %3627 = vmatmul.mubr.msk.f32.gmra.mrb[98].mxu0 %vm1051_vm1, %v4991_v27  ;;  %v5308_v59 = vpop.f32.mrb[2].mxu0 }
 0x184   :  { %3629 = vmatprep.mubr.msk.f32.mxu0 %vm4134_vm0, %v4135_v14  ;;  %v3390_v6 = vpop.f32.mrb[3].mxu0 }
 0x187   :  { %3630 = vmatmul.mubr.msk.f32.gmra.mrb[100].mxu0 %vm1051_vm1, %v5035_v1 }
 0x188   :  { %3632 = vmatprep.mubr.msk.f32.mxu0 %vm4134_vm0, %v4135_v14  ;;  %v5322_v55 = vpop.f32.mrb[4].mxu0  ;;  %v1432_v17 = vpop.f32.mrb[0].mxu1 }
 0x189   :  { %v3393_v52 = vpop.f32.mrb[5].mxu0  ;;  %v3491_v63 = vpop.f32.mrb[1].mxu1 }
 0x18b   :  { %3633 = vmatmul.mubr.msk.f32.gmra.mrb[102].mxu0 %vm1051_vm1, %v5063_v32 }
 0x18c   :  { %3635 = vmatprep.mubr.msk.f32.mxu0 %vm4134_vm0, %v4135_v14 }
 0x18d   :  { %v1220_v33 = vpop.f32.mrb[6].mxu0  ;;  %v1437_v58 = vpop.f32.mrb[2].mxu1 }
 0x18e   :  { %v5328_v29 = vadd.f32 %v1432_v17, %v1220_v33  ;;  %v3396_v57 = vpop.f32.mrb[7].mxu0  ;;  %v3494_v2 = vpop.f32.mrb[3].mxu1 }
 0x18f   :  { %3636 = vmatmul.mubr.msk.f32.gmra.mrb[104].mxu0 %vm1051_vm1, %v5082_v11 }
 0x190   :  { %3638 = vmatprep.mubr.msk.f32.mxu0 %vm4134_vm0, %v4135_v14 }
 0x192   :  { %v1225_v50 = vpop.f32.mrb[8].mxu0  ;;  %v1442_v7 = vpop.f32.mrb[4].mxu1 }
 0x193   :  { %3639 = vmatmul.mubr.msk.f32.gmra.mrb[106].mxu0 %vm1051_vm1, %v5105_v12  ;;  %v5336_v25 = vadd.f32 %v1437_v58, %v1225_v50  ;;  %v3399_v27 = vpop.f32.mrb[9].mxu0  ;;  %v3497_v1 = vpop.f32.mrb[5].mxu1 }
 0x194   :  { %3641 = vmatprep.mubr.msk.f32.mxu0 %vm4134_vm0, %v4135_v14 }
 0x196   :  { %v1230_v32 = vpop.f32.mrb[10].mxu0  ;;  %v1447_v42 = vpop.f32.mrb[6].mxu1 }
 0x197   :  { %3642 = vmatmul.mubr.msk.f32.gmra.mrb[108].mxu0 %vm1051_vm1, %v5129_v45  ;;  %v5342_v11 = vadd.f32 %v1442_v7, %v1230_v32  ;;  %v3402_v49 = vpop.f32.mrb[11].mxu0  ;;  %v3500_v39 = vpop.f32.mrb[7].mxu1 }
 0x198   :  { %3644 = vmatprep.mubr.msk.f32.mxu0 %vm4134_vm0, %v4135_v14 }
 0x19b   :  { %3645 = vmatmul.mubr.msk.f32.gmra.mrb[110].mxu0 %vm1051_vm1, %v5149_v46  ;;  %v1235_v12 = vpop.f32.mrb[12].mxu0  ;;  %v1452_v5 = vpop.f32.mrb[8].mxu1 }
 0x19c   :  { %3647 = vmatprep.mubr.msk.f32.mxu0 %vm4134_vm0, %v4135_v14  ;;  %v5350_v24 = vadd.f32 %v1447_v42, %v1235_v12  ;;  %v3405_v0 = vpop.f32.mrb[13].mxu0  ;;  %v3503_v8 = vpop.f32.mrb[9].mxu1 }
 0x19f   :  { %3648 = vmatmul.mubr.msk.f32.gmra.mrb[112].mxu0 %vm1051_vm1, %v5168_v15 }
 0x1a0   :  { %3650 = vmatprep.mubr.msk.f32.mxu0 %vm4134_vm0, %v4135_v14  ;;  %v1240_v45 = vpop.f32.mrb[14].mxu0  ;;  %v1457_v54 = vpop.f32.mrb[10].mxu1 }
 0x1a1   :  { %v5356_v36 = vadd.f32 %v1452_v5, %v1240_v45  ;;  %v3408_v46 = vpop.f32.mrb[15].mxu0  ;;  %v3506_v10 = vpop.f32.mrb[11].mxu1 }
 0x1a3   :  { %3651 = vmatmul.mubr.msk.f32.gmra.mrb[114].mxu0 %vm1051_vm1, %v5187_v62  ;;  %v3907_v62 = vpack.c.bf16 %v3049_v28, %v3048_v43 }
 0x1a4   :  { %3653 = vmatprep.mubr.msk.f32.mxu0 %vm4134_vm0, %v4135_v14 }
 0x1a5   :  { %v1245_v15 = vpop.f32.mrb[16].mxu0  ;;  %v1462_v38 = vpop.f32.mrb[12].mxu1  ;;  %3908 = vmatprep.subr.bf16.mxu1 %v3907_v62 }
 0x1a6   :  { %v5374_v40 = vadd.f32 %v1457_v54, %v1245_v15  ;;  %v3411_v56 = vpop.f32.mrb[17].mxu0  ;;  %v3509_v20 = vpop.f32.mrb[13].mxu1  ;;  %3910 = vmatpush3.bf16.msra.mxu1 %v3907_v62 }
 0x1a7   :  { %3654 = vmatmul.mubr.msk.f32.gmra.mrb[116].mxu0 %vm1051_vm1, %v5201_v30  ;;  %v3911_v30 = vpack.c.bf16 %v3051_v51, %v3050_v4 }
 0x1a8   :  { %3656 = vmatprep.mubr.msk.f32.mxu0 %vm4134_vm0, %v4135_v14 }
 0x1a9   :  { %v1250_v37 = vpop.f32.mrb[18].mxu0  ;;  %v1467_v41 = vpop.f32.mrb[14].mxu1  ;;  %3912 = vmatprep.subr.bf16.mxu1 %v3911_v30 }
 0x1aa   :  { %v5386_v31 = vadd.f32 %v1462_v38, %v1250_v37  ;;  %v3414_v61 = vpop.f32.mrb[19].mxu0  ;;  %v3512_v13 = vpop.f32.mrb[15].mxu1  ;;  %3914 = vmatpush3.bf16.msra.mxu1 %v3911_v30 }
 0x1ab   :  { %3657 = vmatmul.mubr.msk.f32.gmra.mrb[118].mxu0 %vm1051_vm1, %v5212_v3 }
 0x1ac   :  { %3659 = vmatprep.mubr.msk.f32.mxu0 %vm4134_vm0, %v4135_v14 }
 0x1ae   :  { %v1255_v22 = vpop.f32.mrb[20].mxu0  ;;  %v1472_v35 = vpop.f32.mrb[16].mxu1 }
 0x1af   :  { %3660 = vmatmul.mubr.msk.f32.gmra.mrb[120].mxu0 %vm1051_vm1, %v1041_v19  ;;  %v5396_v23 = vadd.f32 %v1467_v41, %v1255_v22  ;;  %v3417_v21 = vpop.f32.mrb[21].mxu0  ;;  %v3515_v44 = vpop.f32.mrb[17].mxu1 }
 0x1b3   :  { %v1260_v18 = vpop.f32.mrb[22].mxu0  ;;  %v1477_v48 = vpop.f32.mrb[18].mxu1 }
 0x1b4   :  { %v5398_v6 = vadd.f32 %v1472_v35, %v1260_v18  ;;  %v3420_v3 = vpop.f32.mrb[23].mxu0  ;;  %v3518_v26 = vpop.f32.mrb[19].mxu1 }
 0x1b8   :  { %v1265_v14 = vpop.f32.mrb[24].mxu0  ;;  %v1482_v17 = vpop.f32.mrb[20].mxu1 }
 0x1b9   :  { %v5400_v52 = vadd.f32 %v1477_v48, %v1265_v14  ;;  %v3423_v63 = vpop.f32.mrb[25].mxu0  ;;  %v3521_v33 = vpop.f32.mrb[21].mxu1 }
 0x1bc   :  { %v1270_v58 = vpop.f32.mrb[26].mxu0  ;;  %v1487_v34 = vpop.f32.mrb[22].mxu1 }
 0x1bd   :  { %v5402_v16 = vadd.f32 %v1482_v17, %v1270_v58  ;;  %v3426_v19 = vpop.f32.mrb[27].mxu0  ;;  %v3524_v57 = vpop.f32.mrb[23].mxu1 }
 0x1c1   :  { %v1275_v2 = vpop.f32.mrb[28].mxu0  ;;  %v1492_v50 = vpop.f32.mrb[24].mxu1 }
 0x1c2   :  { %v5404_v7 = vadd.f32 %v1487_v34, %v1275_v2  ;;  %v3429_v27 = vpop.f32.mrb[29].mxu0  ;;  %v3527_v1 = vpop.f32.mrb[25].mxu1 }
 0x1c3   :  { %v1938_v27 = vld [vmem:[%s5880_s5] sm:$0xff]  ;;  %v1939_v1 = vld [vmem:[%s5880_s5 + $0x8] sm:$0xff] }
 0x1c6   :  { %v1280_v32 = vpop.f32.mrb[30].mxu0  ;;  %v1497_v42 = vpop.f32.mrb[26].mxu1 }
 0x1c7   :  { %v5406_v49 = vadd.f32 %v1492_v50, %v1280_v32  ;;  %v3432_v39 = vpop.f32.mrb[31].mxu0  ;;  %v3530_v12 = vpop.f32.mrb[27].mxu1 }
 0x1c8   :  { %v5432_v12 = vpack.c.bf16 %v1939_v1, %v1938_v27 }
 0x1ca   :  { %3916 = vmatprep.subr.bf16.mxu1 %v5432_v12 }
 0x1cb   :  { %v1285_v5 = vpop.f32.mrb[32].mxu0  ;;  %v1502_v0 = vpop.f32.mrb[28].mxu1 }
 0x1cc   :  { %v5408_v8 = vadd.f32 %v1497_v42, %v1285_v5  ;;  %v3435_v45 = vpop.f32.mrb[33].mxu0  ;;  %v3533_v54 = vpop.f32.mrb[29].mxu1 }
 0x1cf   :  { %v1290_v46 = vpop.f32.mrb[34].mxu0  ;;  %v1507_v10 = vpop.f32.mrb[30].mxu1 }
 0x1d0   :  { %v5410_v47 = vadd.f32 %v1502_v0, %v1290_v46  ;;  %v3438_v53 = vpop.f32.mrb[35].mxu0  ;;  %v3536_v60 = vpop.f32.mrb[31].mxu1 }
 0x1d4   :  { %v1295_v15 = vpop.f32.mrb[36].mxu0  ;;  %v1512_v38 = vpop.f32.mrb[32].mxu1 }
 0x1d5   :  { %v5412_v43 = vadd.f32 %v1507_v10, %v1295_v15  ;;  %v3441_v28 = vpop.f32.mrb[37].mxu0  ;;  %v3539_v56 = vpop.f32.mrb[33].mxu1 }
 0x1d9   :  { %v1300_v20 = vpop.f32.mrb[38].mxu0  ;;  %v1517_v62 = vpop.f32.mrb[34].mxu1 }
 0x1da   :  { %v5414_v37 = vadd.f32 %v1512_v38, %v1300_v20  ;;  %v3444_v41 = vpop.f32.mrb[39].mxu0  ;;  %v3542_v4 = vpop.f32.mrb[35].mxu1 }
 0x1de   :  { %v1305_v51 = vpop.f32.mrb[40].mxu0  ;;  %v1522_v61 = vpop.f32.mrb[36].mxu1 }
 0x1df   :  { %v5416_v13 = vadd.f32 %v1517_v62, %v1305_v51  ;;  %v3447_v30 = vpop.f32.mrb[41].mxu0  ;;  %v3545_v22 = vpop.f32.mrb[37].mxu1 }
 0x1e2   :  { %v1310_v35 = vpop.f32.mrb[42].mxu0  ;;  %v1527_v21 = vpop.f32.mrb[38].mxu1 }
 0x1e3   :  { %v5418_v44 = vadd.f32 %v1522_v61, %v1310_v35  ;;  %v3450_v18 = vpop.f32.mrb[43].mxu0  ;;  %v3548_v48 = vpop.f32.mrb[39].mxu1 }
 0x1e7   :  { %v1315_v3 = vpop.f32.mrb[44].mxu0  ;;  %v1532_v26 = vpop.f32.mrb[40].mxu1 }
 0x1e8   :  { %v5420_v14 = vadd.f32 %v1527_v21, %v1315_v3  ;;  %v3453_v17 = vpop.f32.mrb[45].mxu0  ;;  %v3551_v63 = vpop.f32.mrb[41].mxu1 }
 0x1e9   :  { %v5447_v63 = vld [vmem:[%s5879_s4] ss:$0 sm:$0xff] }
 0x1ec   :  { %v1320_v33 = vpop.f32.mrb[46].mxu0  ;;  %v1537_v58 = vpop.f32.mrb[42].mxu1 }
 0x1ed   :  { %v5422_v34 = vadd.f32 %v1532_v26, %v1320_v33  ;;  %v3456_v19 = vpop.f32.mrb[47].mxu0  ;;  %v3554_v57 = vpop.f32.mrb[43].mxu1 }
 0x1f1   :  { %v1325_v2 = vpop.f32.mrb[48].mxu0  ;;  %v1542_v50 = vpop.f32.mrb[44].mxu1 }
 0x1f2   :  { %v5430_v32 = vadd.f32 %v1537_v58, %v1325_v2  ;;  %v3459_v42 = vpop.f32.mrb[49].mxu0  ;;  %v3557_v39 = vpop.f32.mrb[45].mxu1 }
 0x1f5   :  { %v1330_v5 = vpop.f32.mrb[50].mxu0  ;;  %v1547_v0 = vpop.f32.mrb[46].mxu1 }
 0x1f6   :  { %v5435_v45 = vadd.f32 %v1542_v50, %v1330_v5  ;;  %v3462_v54 = vpop.f32.mrb[51].mxu0  ;;  %v3560_v46 = vpop.f32.mrb[47].mxu1 }
 0x1f9   :  { %v1335_v10 = vpop.f32.mrb[52].mxu0  ;;  %v1552_v53 = vpop.f32.mrb[48].mxu1 }
 0x1fa   :  { %v5437_v60 = vadd.f32 %v1547_v0, %v1335_v10  ;;  %v3465_v15 = vpop.f32.mrb[53].mxu0  ;;  %v3563_v38 = vpop.f32.mrb[49].mxu1 }
 0x1fd   :  { %v1340_v28 = vpop.f32.mrb[54].mxu0  ;;  %v1557_v56 = vpop.f32.mrb[50].mxu1 }
 0x1fe   :  { %v5439_v20 = vadd.f32 %v1552_v53, %v1340_v28  ;;  %v3468_v62 = vpop.f32.mrb[55].mxu0  ;;  %v3566_v41 = vpop.f32.mrb[51].mxu1 }
 0x202   :  { %v1345_v4 = vpop.f32.mrb[56].mxu0 }
 0x203   :  { %v3471_v51 = vpop.f32.mrb[57].mxu0 }
 0x206   :  { %v1417_v61 = vpop.f32.mrb[58].mxu0 }
 0x207   :  { %v1418_v30 = vadd.f32 %v1417_v61, %v5302_v9  ;;  %v3482_v22 = vpop.f32.mrb[59].mxu0 }
 0x20a   :  { %v1422_v35 = vpop.f32.mrb[60].mxu0 }
 0x20b   :  { %v1423_v21 = vadd.f32 %v1422_v35, %v5308_v59  ;;  %v3485_v18 = vpop.f32.mrb[61].mxu0 }
 0x20e   :  { %v1427_v48 = vpop.f32.mrb[62].mxu0 }
 0x20f   :  { %v1428_v3 = vadd.f32 %v1427_v48, %v5322_v55  ;;  %v3488_v26 = vpop.f32.mrb[63].mxu0 }
 0x212   :  { %v1634_v17 = vpop.f32.mrb[64].mxu0 }
 0x213   :  { %v1777_v33 = vadd.f32 %v1634_v17, %v1418_v30  ;;  %v3577_v58 = vpop.f32.mrb[65].mxu0  ;;  %v1940_v17 = vld [vmem:[%s5880_s5 + $0x10] sm:$0xff] }
 0x215   :  { %v1812_v19 = vadd.f32 %v5447_v63, %v1777_v33 }
 0x216   :  { %v1639_v9 = vpop.f32.mrb[66].mxu0 }
 0x217   :  { %v1778_v57 = vadd.f32 %v1639_v9, %v1423_v21  ;;  %v3580_v2 = vpop.f32.mrb[67].mxu0  ;;  %v1868_v50 = vmul.f32 0.1, %v1812_v19  ;;  %vm1840_vm0 = vcmp.ge.f32.partialorder %v1812_v19, 0.0 }
 0x219   :  { %v1813_v59 = vadd.f32 %v5447_v63, %v1778_v57  ;;  %v5451_v39 = vsel %vm1840_vm0, %v1812_v19, %v1868_v50 }
 0x21a   :  { %v1644_v27 = vpop.f32.mrb[68].mxu0 }
 0x21b   :  { %vm1841_vm1 = vcmp.ge.f32.partialorder %v1813_v59, 0.0  ;;  %v1869_v55 = vmul.f32 0.1, %v1813_v59  ;;  %v1779_v1 = vadd.f32 %v1644_v27, %v1428_v3  ;;  %v3583_v42 = vpop.f32.mrb[69].mxu0  ;;  %v1943_v27 = vld [vmem:[%s5880_s5 + $0x28] sm:$0xff] }
 0x21d   :  { %v5453_v5 = vsel %vm1841_vm1, %v1813_v59, %v1869_v55  ;;  %v1814_v0 = vadd.f32 %v5447_v63, %v1779_v1  ;;  %v1942_v59 = vld [vmem:[%s5880_s5 + $0x20] sm:$0xff] }
 0x21e   :  { %v1649_v54 = vpop.f32.mrb[70].mxu0  ;;  %v1924_v46 = vmax.f32 %v5451_v39, %v5453_v5 }
 0x21f   :  { %v1780_v10 = vadd.f32 %v1649_v54, %v5328_v29  ;;  %v3586_v53 = vpop.f32.mrb[71].mxu0  ;;  %v1870_v15 = vmul.f32 0.1, %v1814_v0  ;;  %vm1842_vm8 = vcmp.ge.f32.partialorder %v1814_v0, 0.0 }
 0x220   :  { %v1944_v53 = vld [vmem:[%s5880_s5 + $0x30] sm:$0xff] }
 0x221   :  { %v1815_v38 = vadd.f32 %v5447_v63, %v1780_v10  ;;  %v1898_v4 = vsel %vm1842_vm8, %v1814_v0, %v1870_v15  ;;  %v1945_v15 = vld [vmem:[%s5880_s5 + $0x38] sm:$0xff] }
 0x222   :  { %v1654_v28 = vpop.f32.mrb[72].mxu0 }
 0x223   :  { %vm1843_vm9 = vcmp.ge.f32.partialorder %v1815_v38, 0.0  ;;  %v1871_v56 = vmul.f32 0.1, %v1815_v38  ;;  %v1781_v62 = vadd.f32 %v1654_v28, %v5336_v25  ;;  %v3589_v41 = vpop.f32.mrb[73].mxu0 }
 0x224   :  { %v3927_v41 = vpack.c.bf16 %v1945_v15, %v1944_v53 }
 0x225   :  { %v1899_v51 = vsel %vm1843_vm9, %v1815_v38, %v1871_v56  ;;  %v1816_v61 = vadd.f32 %v5447_v63, %v1781_v62 }
 0x226   :  { %v1659_v30 = vpop.f32.mrb[74].mxu0  ;;  %v5462_v22 = vmax.f32 %v1898_v4, %v1899_v51  ;;  %v3076_v51 = vld [vmem:[%s5880_s5 + $0x80] sm:$0xff] }
 0x227   :  { %v1782_v29 = vadd.f32 %v1659_v30, %v5342_v11  ;;  %v3592_v35 = vpop.f32.mrb[75].mxu0  ;;  %v1872_v21 = vmul.f32 0.1, %v1816_v61  ;;  %vm1844_vm11 = vcmp.ge.f32.partialorder %v1816_v61, 0.0  ;;  %v1941_v11 = vld [vmem:[%s5880_s5 + $0x18] sm:$0xff] }
 0x228   :  { %3678 = vmatprep.mubr.msk.f32.mxu1 %vm1955_vm10, %v5462_v22  ;;  %v3919_v2 = vpack.c.bf16 %v1941_v11, %v1940_v17 }
 0x229   :  { %v1817_v18 = vadd.f32 %v5447_v63, %v1782_v29  ;;  %v1900_v33 = vsel %vm1844_vm11, %v1816_v61, %v1872_v21  ;;  %v3077_v61 = vld [vmem:[%s5880_s5 + $0x88] sm:$0xff] }
 0x22a   :  { %v1664_v25 = vpop.f32.mrb[76].mxu0 }
 0x22b   :  { %vm1845_vm12 = vcmp.ge.f32.partialorder %v1817_v18, 0.0  ;;  %v1873_v48 = vmul.f32 0.1, %v1817_v18  ;;  %v1783_v3 = vadd.f32 %v1664_v25, %v5350_v24  ;;  %v3595_v26 = vpop.f32.mrb[77].mxu0 }
 0x22d   :  { %v1901_v58 = vsel %vm1845_vm12, %v1817_v18, %v1873_v48  ;;  %v1818_v19 = vadd.f32 %v5447_v63, %v1783_v3 }
 0x22e   :  { %v5476_v9 = vmax.f32 %v1900_v33, %v1901_v58  ;;  %v1669_v57 = vpop.f32.mrb[78].mxu0 }
 0x22f   :  { %v1784_v50 = vadd.f32 %v1669_v57, %v5356_v36  ;;  %v3598_v24 = vpop.f32.mrb[79].mxu0  ;;  %v1874_v55 = vmul.f32 0.1, %v1818_v19  ;;  %vm1846_vm13 = vcmp.ge.f32.partialorder %v1818_v19, 0.0  ;;  %v3923_v36 = vpack.c.bf16 %v1943_v27, %v1942_v59 }
 0x230   :  { %3679 = vmatmul.mubr.msk.f32.vlgmr.msra.gmra.mrb[52].mxu1 %vm1955_vm10, %v5476_v9 }
 0x231   :  { %v1819_v1 = vadd.f32 %v5447_v63, %v1784_v50  ;;  %3918 = vmatpush3.bf16.msra.mxu1 %v5432_v12  ;;  %v1902_v38 = vsel %vm1846_vm13, %v1818_v19, %v1874_v55 }
 0x232   :  { %v1674_v42 = vpop.f32.mrb[80].mxu0  ;;  %3920 = vmatprep.subr.bf16.mxu1 %v3919_v2 }
 0x233   :  { %vm1847_vm14 = vcmp.ge.f32.partialorder %v1819_v1, 0.0  ;;  %v1875_v0 = vmul.f32 0.1, %v1819_v1  ;;  %v1785_v54 = vadd.f32 %v1674_v42, %v5374_v40  ;;  %v3601_v10 = vpop.f32.mrb[81].mxu0 }
 0x235   :  { %v1903_v28 = vsel %vm1847_vm14, %v1819_v1, %v1875_v0  ;;  %v1820_v12 = vadd.f32 %v5447_v63, %v1785_v54  ;;  %3922 = vmatpush3.bf16.msra.mxu1 %v3919_v2 }
 0x236   :  { %v1679_v56 = vpop.f32.mrb[82].mxu0  ;;  %v5497_v62 = vmax.f32 %v1902_v38, %v1903_v28  ;;  %3924 = vmatprep.subr.bf16.mxu1 %v3923_v36 }
 0x237   :  { %v1786_v40 = vadd.f32 %v1679_v56, %v5386_v31  ;;  %v3604_v4 = vpop.f32.mrb[83].mxu0  ;;  %v1876_v30 = vmul.f32 0.1, %v1820_v12  ;;  %vm1848_vm15 = vcmp.ge.f32.partialorder %v1820_v12, 0.0  ;;  %v5509_v31 = vpack.c.bf16 %v3077_v61, %v3076_v51 }
 0x238   :  { %3681 = vmatprep.mubr.msk.f32.mxu1 %vm1955_vm10, %v5497_v62 }
 0x239   :  { %v1821_v29 = vadd.f32 %v5447_v63, %v1786_v40  ;;  %3926 = vmatpush3.bf16.msra.mxu1 %v3923_v36  ;;  %v1904_v48 = vsel %vm1848_vm15, %v1820_v12, %v1876_v30 }
 0x23a   :  { %v1684_v35 = vpop.f32.mrb[84].mxu0  ;;  %3928 = vmatprep.subr.bf16.mxu1 %v3927_v41 }
 0x23b   :  { %vm1849_vm2 = vcmp.ge.f32.partialorder %v1821_v29, 0.0  ;;  %v1877_v21 = vmul.f32 0.1, %v1821_v29  ;;  %v1787_v18 = vadd.f32 %v1684_v35, %v5396_v23  ;;  %v3607_v25 = vpop.f32.mrb[85].mxu0 }
 0x23d   :  { %v1905_v3 = vsel %vm1849_vm2, %v1821_v29, %v1877_v21  ;;  %v1822_v26 = vadd.f32 %v5447_v63, %v1787_v18  ;;  %3930 = vmatpush3.bf16.msra.mxu1 %v3927_v41 }
 0x23e   :  { %v1689_v17 = vpop.f32.mrb[86].mxu0  ;;  %v5513_v11 = vmax.f32 %v1904_v48, %v1905_v3  ;;  %3932 = vmatprep.subr.bf16.mxu1 %v5509_v31 }
 0x23f   :  { %v1788_v33 = vadd.f32 %v1689_v17, %v5398_v6  ;;  %v3610_v58 = vpop.f32.mrb[87].mxu0  ;;  %v1878_v19 = vmul.f32 0.1, %v1822_v26  ;;  %vm1850_vm3 = vcmp.ge.f32.partialorder %v1822_v26, 0.0 }
 0x240   :  { %3682 = vmatmul.mubr.msk.f32.gmra.mrb[54].mxu1 %vm1955_vm10, %v5513_v11 }
 0x241   :  { %v1823_v23 = vadd.f32 %v5447_v63, %v1788_v33  ;;  %v1906_v59 = vsel %vm1850_vm3, %v1822_v26, %v1878_v19 }
 0x242   :  { %v1694_v57 = vpop.f32.mrb[88].mxu0 }
 0x243   :  { %vm1851_vm4 = vcmp.ge.f32.partialorder %v1823_v23, 0.0  ;;  %v1879_v2 = vmul.f32 0.1, %v1823_v23  ;;  %v1789_v50 = vadd.f32 %v1694_v57, %v5400_v52  ;;  %v3613_v24 = vpop.f32.mrb[89].mxu0 }
 0x245   :  { %v1907_v27 = vsel %vm1851_vm4, %v1823_v23, %v1879_v2  ;;  %v1824_v55 = vadd.f32 %v5447_v63, %v1789_v50 }
 0x246   :  { %v1699_v1 = vpop.f32.mrb[90].mxu0  ;;  %v5522_v6 = vmax.f32 %v1906_v59, %v1907_v27 }
 0x247   :  { %v1790_v42 = vadd.f32 %v1699_v1, %v5402_v16  ;;  %v3616_v36 = vpop.f32.mrb[91].mxu0  ;;  %v1880_v0 = vmul.f32 0.1, %v1824_v55  ;;  %vm1852_vm5 = vcmp.ge.f32.partialorder %v1824_v55, 0.0 }
 0x248   :  { %3684 = vmatprep.mubr.msk.f32.mxu1 %vm1955_vm10, %v5522_v6 }
 0x249   :  { %v1825_v54 = vadd.f32 %v5447_v63, %v1790_v42  ;;  %v1908_v38 = vsel %vm1852_vm5, %v1824_v55, %v1880_v0 }
 0x24a   :  { %v1704_v10 = vpop.f32.mrb[92].mxu0 }
 0x24b   :  { %vm1853_vm6 = vcmp.ge.f32.partialorder %v1825_v54, 0.0  ;;  %v1881_v52 = vmul.f32 0.1, %v1825_v54  ;;  %v1791_v53 = vadd.f32 %v1704_v10, %v5404_v7  ;;  %v3619_v15 = vpop.f32.mrb[93].mxu0 }
 0x24d   :  { %v1909_v28 = vsel %vm1853_vm6, %v1825_v54, %v1881_v52  ;;  %v1826_v12 = vadd.f32 %v5447_v63, %v1791_v53  ;;  %vm2474_vm6 = vcmask 785408  }
 0x24e   :  { %v1709_v56 = vpop.f32.mrb[94].mxu0  ;;  %v5530_v16 = vmax.f32 %v1908_v38, %v1909_v28 }
 0x24f   :  { %v1792_v41 = vadd.f32 %v1709_v56, %v5406_v49  ;;  %v3622_v40 = vpop.f32.mrb[95].mxu0  ;;  %v1882_v4 = vmul.f32 0.1, %v1826_v12  ;;  %vm1854_vm7 = vcmp.ge.f32.partialorder %v1826_v12, 0.0 }
 0x250   :  { %3685 = vmatmul.mubr.msk.f32.gmra.mrb[56].mxu1 %vm1955_vm10, %v5530_v16 }
 0x251   :  { %v1827_v51 = vadd.f32 %v5447_v63, %v1792_v41  ;;  %v1910_v35 = vsel %vm1854_vm7, %v1826_v12, %v1882_v4 }
 0x252   :  { %v1714_v61 = vpop.f32.mrb[96].mxu0 }
 0x253   :  { %vm1855_vm0 = vcmp.ge.f32.partialorder %v1827_v51, 0.0  ;;  %v1883_v7 = vmul.f32 0.1, %v1827_v51  ;;  %v1793_v30 = vadd.f32 %v1714_v61, %v5408_v8  ;;  %v3625_v29 = vpop.f32.mrb[97].mxu0 }
 0x255   :  { %v1911_v21 = vsel %vm1855_vm0, %v1827_v51, %v1883_v7  ;;  %v1828_v18 = vadd.f32 %v5447_v63, %v1793_v30 }
 0x256   :  { %v1719_v25 = vpop.f32.mrb[98].mxu0  ;;  %v5538_v49 = vmax.f32 %v1910_v35, %v1911_v21 }
 0x257   :  { %v1794_v48 = vadd.f32 %v1719_v25, %v5410_v47  ;;  %v3628_v3 = vpop.f32.mrb[99].mxu0  ;;  %v1884_v26 = vmul.f32 0.1, %v1828_v18  ;;  %vm1856_vm1 = vcmp.ge.f32.partialorder %v1828_v18, 0.0 }
 0x258   :  { %3687 = vmatprep.mubr.msk.f32.mxu1 %vm1955_vm10, %v5538_v49 }
 0x259   :  { %v1829_v17 = vadd.f32 %v5447_v63, %v1794_v48  ;;  %v1912_v23 = vsel %vm1856_vm1, %v1828_v18, %v1884_v26 }
 0x25a   :  { %v1724_v33 = vpop.f32.mrb[100].mxu0 }
 0x25b   :  { %vm1857_vm8 = vcmp.ge.f32.partialorder %v1829_v17, 0.0  ;;  %v1885_v8 = vmul.f32 0.1, %v1829_v17  ;;  %v1795_v58 = vadd.f32 %v1724_v33, %v5412_v43  ;;  %v3631_v19 = vpop.f32.mrb[101].mxu0 }
 0x25d   :  { %v1913_v57 = vsel %vm1857_vm8, %v1829_v17, %v1885_v8  ;;  %v1830_v2 = vadd.f32 %v5447_v63, %v1795_v58 }
 0x25e   :  { %v1729_v50 = vpop.f32.mrb[102].mxu0  ;;  %v5546_v47 = vmax.f32 %v1912_v23, %v1913_v57 }
 0x25f   :  { %v1796_v24 = vadd.f32 %v1729_v50, %v5414_v37  ;;  %v3634_v59 = vpop.f32.mrb[103].mxu0  ;;  %v1886_v27 = vmul.f32 0.1, %v1830_v2  ;;  %vm1858_vm9 = vcmp.ge.f32.partialorder %v1830_v2, 0.0 }
 0x260   :  { %3688 = vmatmul.mubr.msk.f32.gmra.mrb[58].mxu1 %vm1955_vm10, %v5546_v47 }
 0x261   :  { %v1831_v55 = vadd.f32 %v5447_v63, %v1796_v24  ;;  %v1914_v0 = vsel %vm1858_vm9, %v1830_v2, %v1886_v27 }
 0x262   :  { %v1734_v1 = vpop.f32.mrb[104].mxu0 }
 0x263   :  { %vm1859_vm11 = vcmp.ge.f32.partialorder %v1831_v55, 0.0  ;;  %v1887_v43 = vmul.f32 0.1, %v1831_v55  ;;  %v1797_v42 = vadd.f32 %v1734_v1, %v5416_v13  ;;  %v3637_v36 = vpop.f32.mrb[105].mxu0 }
 0x265   :  { %v1915_v54 = vsel %vm1859_vm11, %v1831_v55, %v1887_v43  ;;  %v1832_v10 = vadd.f32 %v5447_v63, %v1797_v42  ;;  %v3078_v43 = vld [vmem:[%s5880_s5 + $0x90] sm:$0xff]  ;;  %v3079_v42 = vld [vmem:[%s5880_s5 + $0x98] sm:$0xff] }
 0x266   :  { %v1739_v52 = vpop.f32.mrb[106].mxu0  ;;  %v5554_v37 = vmax.f32 %v1914_v0, %v1915_v54  ;;  %v3935_v0 = vpack.c.bf16 %v3079_v42, %v3078_v43 }
 0x267   :  { %v1798_v53 = vadd.f32 %v1739_v52, %v5418_v44  ;;  %v3640_v15 = vpop.f32.mrb[107].mxu0  ;;  %v1888_v38 = vmul.f32 0.1, %v1832_v10  ;;  %vm1860_vm12 = vcmp.ge.f32.partialorder %v1832_v10, 0.0  ;;  %v3080_v52 = vld [vmem:[%s5880_s5 + $0xa0] sm:$0xff] }
 0x268   :  { %3690 = vmatprep.mubr.msk.f32.mxu1 %vm1955_vm10, %v5554_v37  ;;  %v3082_v15 = vld [vmem:[%s5880_s5 + $0xb0] sm:$0xff] }
 0x269   :  { %v1833_v28 = vadd.f32 %v5447_v63, %v1798_v53  ;;  %v1916_v40 = vsel %vm1860_vm12, %v1832_v10, %v1888_v38  ;;  %v3081_v53 = vld [vmem:[%s5880_s5 + $0xa8] sm:$0xff]  ;;  %v3083_v38 = vld [vmem:[%s5880_s5 + $0xb8] sm:$0xff] }
 0x26a   :  { %v1744_v12 = vpop.f32.mrb[108].mxu0  ;;  %v3939_v5 = vpack.c.bf16 %v3081_v53, %v3080_v52 }
 0x26b   :  { %vm1861_vm13 = vcmp.ge.f32.partialorder %v1833_v28, 0.0  ;;  %v1889_v13 = vmul.f32 0.1, %v1833_v28  ;;  %v1799_v56 = vadd.f32 %v1744_v12, %v5420_v14  ;;  %v3643_v41 = vpop.f32.mrb[109].mxu0 }
 0x26d   :  { %v1917_v4 = vsel %vm1861_vm13, %v1833_v28, %v1889_v13  ;;  %v1834_v51 = vadd.f32 %v5447_v63, %v1799_v56  ;;  %v3098_v28 = vld [vmem:[%s5882_s7 + $0x68] sm:$0xff]  ;;  %v3099_v13 = vld [vmem:[%s5882_s7 + $0x70] sm:$0xff]  ;;  %v3100_v56 = vld [vmem:[%s5882_s7 + $0x78] sm:$0xff] }
 0x26e   :  { %v1749_v61 = vpop.f32.mrb[110].mxu0  ;;  %v5562_v44 = vmax.f32 %v1916_v40, %v1917_v4  ;;  %v3951_v41 = vpack.c.bf16 %v3100_v56, %v3099_v13  ;;  %v3101_v40 = vld [vmem:[%s5882_s7 + $0x80] sm:$0xff]  ;;  %v3102_v4 = vld [vmem:[%s5882_s7 + $0x88] sm:$0xff] }
 0x26f   :  { %v1800_v7 = vadd.f32 %v1749_v61, %v5422_v34  ;;  %v3646_v30 = vpop.f32.mrb[111].mxu0  ;;  %v1890_v29 = vmul.f32 0.1, %v1834_v51  ;;  %vm1862_vm14 = vcmp.ge.f32.partialorder %v1834_v51, 0.0  ;;  %v3104_v61 = vld [vmem:[%s5882_s7 + $0x98] sm:$0xff] }
 0x270   :  { %3691 = vmatmul.mubr.msk.f32.gmra.mrb[60].mxu1 %vm1955_vm10, %v5562_v44 }
 0x271   :  { %v1835_v35 = vadd.f32 %v5447_v63, %v1800_v7  ;;  %v1918_v48 = vsel %vm1862_vm14, %v1834_v51, %v1890_v29  ;;  %v3955_v51 = vpack.c.bf16 %v3102_v4, %v3101_v40  ;;  %v2450_v7 = vld [vmem:[%s5882_s7 + $0x8] sm:$0xff]  ;;  %v5697_v29 = vld [vmem:[%s5881_s6] ss:$0 sm:$0xff] }
 0x272   :  { %v1754_v21 = vpop.f32.mrb[112].mxu0 }
 0x273   :  { %vm1863_vm15 = vcmp.ge.f32.partialorder %v1835_v35, 0.0  ;;  %v1891_v14 = vmul.f32 0.1, %v1835_v35  ;;  %v1801_v18 = vadd.f32 %v1754_v21, %v5430_v32  ;;  %v3649_v25 = vpop.f32.mrb[113].mxu0 }
 0x275   :  { %v1919_v3 = vsel %vm1863_vm15, %v1835_v35, %v1891_v14  ;;  %v1836_v26 = vadd.f32 %v5447_v63, %v1801_v18 }
 0x276   :  { %v1759_v17 = vpop.f32.mrb[114].mxu0  ;;  %v5570_v34 = vmax.f32 %v1918_v48, %v1919_v3 }
 0x277   :  { %v1802_v33 = vadd.f32 %v1759_v17, %v5435_v45  ;;  %v3652_v8 = vpop.f32.mrb[115].mxu0  ;;  %v1892_v58 = vmul.f32 0.1, %v1836_v26  ;;  %vm1864_vm2 = vcmp.ge.f32.partialorder %v1836_v26, 0.0 }
 0x278   :  { %3693 = vmatprep.mubr.msk.f32.mxu1 %vm1955_vm10, %v5570_v34 }
 0x279   :  { %v1837_v19 = vadd.f32 %v5447_v63, %v1802_v33  ;;  %v1920_v50 = vsel %vm1864_vm2, %v1836_v26, %v1892_v58  ;;  %v2452_v33 = vld [vmem:[%s5882_s7 + $0x18] sm:$0xff] }
 0x27a   :  { %v1764_v23 = vpop.f32.mrb[116].mxu0 }
 0x27b   :  { %vm1865_vm3 = vcmp.ge.f32.partialorder %v1837_v19, 0.0  ;;  %v1893_v32 = vmul.f32 0.1, %v1837_v19  ;;  %v1803_v57 = vadd.f32 %v1764_v23, %v5437_v60  ;;  %v3655_v2 = vpop.f32.mrb[117].mxu0 }
 0x27d   :  { %v1921_v24 = vsel %vm1865_vm3, %v1837_v19, %v1893_v32  ;;  %v1838_v59 = vadd.f32 %v5447_v63, %v1803_v57 }
 0x27e   :  { %v1769_v27 = vpop.f32.mrb[118].mxu0  ;;  %v5578_v45 = vmax.f32 %v1920_v50, %v1921_v24  ;;  %v2453_v24 = vld [vmem:[%s5882_s7 + $0x20] sm:$0xff] }
 0x27f   :  { %v1804_v55 = vadd.f32 %v1769_v27, %v5439_v20  ;;  %v3658_v1 = vpop.f32.mrb[119].mxu0  ;;  %v1894_v60 = vmul.f32 0.1, %v1838_v59  ;;  %vm1866_vm4 = vcmp.ge.f32.partialorder %v1838_v59, 0.0 }
 0x280   :  { %3694 = vmatmul.mubr.msk.f32.gmra.mrb[62].mxu1 %vm1955_vm10, %v5578_v45 }
 0x281   :  { %v1839_v36 = vadd.f32 %v5447_v63, %v1804_v55  ;;  %3712 = vmatprep.mubr.msk.f32.mxu1 %vm1955_vm10, %v1924_v46  ;;  %v1922_v63 = vsel %vm1866_vm4, %v1838_v59, %v1894_v60  ;;  %v2454_v59 = vld [vmem:[%s5882_s7 + $0x28] sm:$0xff] }
 0x282   :  { %v1774_v20 = vpop.f32.mrb[120].mxu0  ;;  %v3979_v60 = vpack.c.bf16 %v2454_v59, %v2453_v24 }
 0x283   :  { %vm1867_vm5 = vcmp.ge.f32.partialorder %v1839_v36, 0.0  ;;  %v1895_v54 = vmul.f32 0.1, %v1839_v36  ;;  %v3661_v10 = vpop.f32.mrb[121].mxu0 }
 0x284   :  { %3713 = vmatmul.mubr.msk.f32.vlgmr.msra.gmra.mrb[52].mxu1 %vm1955_vm10, %v5462_v22  ;;  %v3943_v22 = vpack.c.bf16 %v3083_v38, %v3082_v15 }
 0x285   :  { %v1923_v39 = vsel %vm1867_vm5, %v1839_v36, %v1895_v54  ;;  %3934 = vmatpush3.bf16.msra.mxu1 %v5509_v31  ;;  %3715 = vmatprep.mubr.msk.f32.mxu1 %vm1955_vm10, %v5476_v9  ;;  %v3097_v31 = vld [vmem:[%s5882_s7 + $0x60] sm:$0xff]  ;;  %v2456_v54 = vld [vmem:[%s5882_s7 + $0x38] sm:$0xff] }
 0x286   :  { %3936 = vmatprep.subr.bf16.mxu1 %v3935_v0  ;;  %v1937_v46 = vmax.f32 %v1922_v63, %v1923_v39  ;;  %v3947_v12 = vpack.c.bf16 %v3098_v28, %v3097_v31  ;;  %v2458_v31 = vld [vmem:[%s5882_s7 + $0x48] sm:$0xff] }
 0x288   :  { %3716 = vmatmul.mubr.msk.f32.gmra.mrb[54].mxu1 %vm1955_vm10, %v5497_v62 }
 0x289   :  { %3718 = vmatprep.mubr.msk.f32.mxu1 %vm1955_vm10, %v5513_v11  ;;  %3938 = vmatpush3.bf16.msra.mxu1 %v3935_v0  ;;  %v2455_v0 = vld [vmem:[%s5882_s7 + $0x30] sm:$0xff] }
 0x28a   :  { %3940 = vmatprep.subr.bf16.mxu1 %v3939_v5 }
 0x28c   :  { %3719 = vmatmul.mubr.msk.f32.gmra.mrb[56].mxu1 %vm1955_vm10, %v5522_v6 }
 0x28d   :  { %3721 = vmatprep.mubr.msk.f32.mxu1 %vm1955_vm10, %v5530_v16  ;;  %3942 = vmatpush3.bf16.msra.mxu1 %v3939_v5 }
 0x28e   :  { %3944 = vmatprep.subr.bf16.mxu1 %v3943_v22 }
 0x290   :  { %3722 = vmatmul.mubr.msk.f32.gmra.mrb[58].mxu1 %vm1955_vm10, %v5538_v49 }
 0x291   :  { %3724 = vmatprep.mubr.msk.f32.mxu1 %vm1955_vm10, %v5546_v47  ;;  %3946 = vmatpush3.bf16.msra.mxu1 %v3943_v22  ;;  %v2457_v22 = vld [vmem:[%s5882_s7 + $0x40] sm:$0xff] }
 0x292   :  { %3948 = vmatprep.subr.bf16.mxu1 %v3947_v12 }
 0x294   :  { %3725 = vmatmul.mubr.msk.f32.gmra.mrb[60].mxu1 %vm1955_vm10, %v5554_v37 }
 0x295   :  { %3727 = vmatprep.mubr.msk.f32.mxu1 %vm1955_vm10, %v5562_v44 }
 0x298   :  { %3728 = vmatmul.mubr.msk.f32.gmra.mrb[62].mxu1 %vm1955_vm10, %v5570_v34 }
 0x299   :  { %3746 = vmatprep.mubr.msk.f32.mxu1 %vm1955_vm10, %v5476_v9  ;;  %v3103_v9 = vld [vmem:[%s5882_s7 + $0x90] sm:$0xff] }
 0x29c   :  { %3747 = vmatmul.mubr.msk.f32.vlgmr.msra.gmra.mrb[52].mxu1 %vm1955_vm10, %v5497_v62  ;;  %v3959_v62 = vpack.c.bf16 %v3104_v61, %v3103_v9 }
 0x29d   :  { %3749 = vmatprep.mubr.msk.f32.mxu1 %vm1955_vm10, %v5513_v11  ;;  %3950 = vmatpush3.bf16.msra.mxu1 %v3947_v12  ;;  %v3105_v11 = vld [vmem:[%s5882_s7 + $0xa0] sm:$0xff] }
 0x29e   :  { %3952 = vmatprep.subr.bf16.mxu1 %v3951_v41 }
 0x2a0   :  { %3750 = vmatmul.mubr.msk.f32.gmra.mrb[54].mxu1 %vm1955_vm10, %v5522_v6  ;;  %v3106_v6 = vld [vmem:[%s5882_s7 + $0xa8] sm:$0xff] }
 0x2a1   :  { %3752 = vmatprep.mubr.msk.f32.mxu1 %vm1955_vm10, %v5530_v16  ;;  %3954 = vmatpush3.bf16.msra.mxu1 %v3951_v41  ;;  %v3963_v16 = vpack.c.bf16 %v3106_v6, %v3105_v11  ;;  %v2460_v11 = vld [vmem:[%s5882_s7 + $0x58] sm:$0xff] }
 0x2a2   :  { %3956 = vmatprep.subr.bf16.mxu1 %v3955_v51 }
 0x2a4   :  { %3753 = vmatmul.mubr.msk.f32.gmra.mrb[56].mxu1 %vm1955_vm10, %v5538_v49  ;;  %v3107_v49 = vld [vmem:[%s5882_s7 + $0xb0] sm:$0xff] }
 0x2a5   :  { %3755 = vmatprep.mubr.msk.f32.mxu1 %vm1955_vm10, %v5546_v47  ;;  %3958 = vmatpush3.bf16.msra.mxu1 %v3955_v51  ;;  %v3108_v47 = vld [vmem:[%s5882_s7 + $0xb8] sm:$0xff]  ;;  %v3987_v51 = vpack.c.bf16 %v2458_v31, %v2457_v22 }
 0x2a6   :  { %3960 = vmatprep.subr.bf16.mxu1 %v3959_v62 }
 0x2a8   :  { %3756 = vmatmul.mubr.msk.f32.gmra.mrb[58].mxu1 %vm1955_vm10, %v5554_v37  ;;  %v3967_v37 = vpack.c.bf16 %v3108_v47, %v3107_v49 }
 0x2a9   :  { %3758 = vmatprep.mubr.msk.f32.mxu1 %vm1955_vm10, %v5562_v44  ;;  %3962 = vmatpush3.bf16.msra.mxu1 %v3959_v62  ;;  %v2449_v44 = vld [vmem:[%s5882_s7] sm:$0xff]  ;;  %v2459_v62 = vld [vmem:[%s5882_s7 + $0x50] sm:$0xff] }
 0x2aa   :  { %3964 = vmatprep.subr.bf16.mxu1 %v3963_v16  ;;  %v3971_v30 = vpack.c.bf16 %v2450_v7, %v2449_v44  ;;  %v3991_v47 = vpack.c.bf16 %v2460_v11, %v2459_v62  ;;  %v3129_v44 = vld [vmem:[%s5882_s7 + $0xc0] sm:$0xff]  ;;  %v3130_v7 = vld [vmem:[%s5882_s7 + $0xc8] sm:$0xff] }
 0x2ac   :  { %3759 = vmatmul.mubr.msk.f32.gmra.mrb[60].mxu1 %vm1955_vm10, %v5570_v34  ;;  %v2451_v34 = vld [vmem:[%s5882_s7 + $0x10] sm:$0xff] }
 0x2ad   :  { %3761 = vmatprep.mubr.msk.f32.mxu1 %vm1955_vm10, %v5578_v45  ;;  %3966 = vmatpush3.bf16.msra.mxu1 %v3963_v16  ;;  %v3975_v57 = vpack.c.bf16 %v2452_v33, %v2451_v34  ;;  %v3137_v34 = vld [vmem:[%s5882_s7 + $0x100] sm:$0xff]  ;;  %v3138_v33 = vld [vmem:[%s5882_s7 + $0x108] sm:$0xff] }
 0x2ae   :  { %3968 = vmatprep.subr.bf16.mxu1 %v3967_v37 }
 0x2b0   :  { %3762 = vmatmul.mubr.msk.f32.gmra.mrb[62].mxu1 %vm1955_vm10, %v1937_v46  ;;  %v3983_v46 = vpack.c.bf16 %v2456_v54, %v2455_v0 }
 0x2b1   :  { %3970 = vmatpush3.bf16.msra.mxu1 %v3967_v37 }
 0x2b2   :  { %3972 = vmatprep.subr.bf16.mxu1 %v3971_v30 }
 0x36f   :  { %v3748_v35 = vpop.f32.mrb[52].mxu1 }
 0x370   :  { %v2402_v21 = vadd.f32 %v3748_v35, %v5697_v29  ;;  %v2323_v14 = vpop.f32.mrb[53].mxu1  ;;  %v3131_v35 = vld [vmem:[%s5882_s7 + $0xd0] sm:$0xff] }
 0x371   :  { %v2401_v28 = vadd.f32 %v5697_v29, %v2323_v14 }
 0x372   :  { %vm2414_vm10 = vcmp.ge.f32.partialorder %v2402_v21, 0.0  ;;  %v2426_v18 = vmul.f32 0.1, %v2402_v21 }
 0x373   :  { %v3751_v25 = vpop.f32.mrb[54].mxu1  ;;  %v2425_v6 = vmul.f32 0.1, %v2401_v28  ;;  %vm2413_vm14 = vcmp.ge.f32.partialorder %v2401_v28, 0.0 }
 0x374   :  { %v2404_v48 = vadd.f32 %v3751_v25, %v5697_v29  ;;  %v2333_v3 = vpop.f32.mrb[55].mxu1  ;;  %v5701_v26 = vsel %vm2414_vm10, %v2402_v21, %v2426_v18  ;;  %v3132_v21 = vld [vmem:[%s5882_s7 + $0xd8] sm:$0xff]  ;;  %v3133_v18 = vld [vmem:[%s5882_s7 + $0xe0] sm:$0xff]  ;;  %v3134_v25 = vld [vmem:[%s5882_s7 + $0xe8] sm:$0xff] }
 0x375   :  { %v2403_v17 = vadd.f32 %v5697_v29, %v2333_v3  ;;  %3788 = vmatprep.mubr.msk.f32.mxu1 %vm2474_vm6, %v5701_v26  ;;  %v3999_v14 = vpack.c.bf16 %v3132_v21, %v3131_v35  ;;  %v3135_v3 = vld [vmem:[%s5882_s7 + $0xf0] sm:$0xff] }
 0x376   :  { %v2428_v8 = vmul.f32 0.1, %v2404_v48  ;;  %vm2416_vm7 = vcmp.ge.f32.partialorder %v2404_v48, 0.0 }
 0x377   :  { %vm2415_vm0 = vcmp.ge.f32.partialorder %v2403_v17, 0.0  ;;  %v2427_v58 = vmul.f32 0.1, %v2403_v17  ;;  %v3754_v19 = vpop.f32.mrb[56].mxu1 }
 0x378   :  { %v2406_v23 = vadd.f32 %v3754_v19, %v5697_v29  ;;  %v2343_v32 = vpop.f32.mrb[57].mxu1  ;;  %v5724_v45 = vsel %vm2416_vm7, %v2404_v48, %v2428_v8  ;;  %v4003_v48 = vpack.c.bf16 %v3134_v25, %v3133_v18  ;;  %v4011_v8 = vpack.c.bf16 %v3138_v33, %v3137_v34  ;;  %v3140_v19 = vld [vmem:[%s5882_s7 + $0x118] sm:$0xff] }
 0x379   :  { %v5713_v2 = vsel %vm2415_vm0, %v2403_v17, %v2427_v58  ;;  %v2405_v50 = vadd.f32 %v5697_v29, %v2343_v32  ;;  %v3136_v17 = vld [vmem:[%s5882_s7 + $0xf8] sm:$0xff]  ;;  %v3139_v58 = vld [vmem:[%s5882_s7 + $0x110] sm:$0xff] }
 0x37a   :  { %v2430_v27 = vmul.f32 0.1, %v2406_v23  ;;  %3789 = vmatmul.mubr.msk.f32.vlgmr.msra.gmra.mrb[64].mxu1 %vm2474_vm6, %v5713_v2  ;;  %vm2418_vm1 = vcmp.ge.f32.partialorder %v2406_v23, 0.0 }
 0x37b   :  { %vm2417_vm8 = vcmp.ge.f32.partialorder %v2405_v50, 0.0  ;;  %v2429_v55 = vmul.f32 0.1, %v2405_v50  ;;  %3974 = vmatpush3.bf16.msra.mxu1 %v3971_v30  ;;  %v3757_v1 = vpop.f32.mrb[58].mxu1  ;;  %3791 = vmatprep.mubr.msk.f32.mxu1 %vm2474_vm6, %v5724_v45  ;;  %v2437_v30 = vsel %vm2413_vm14, %v2401_v28, %v2425_v6 }
 0x37c   :  { %v2408_v43 = vadd.f32 %v3757_v1, %v5697_v29  ;;  %v2353_v42 = vpop.f32.mrb[59].mxu1  ;;  %3976 = vmatprep.subr.bf16.mxu1 %v3975_v57  ;;  %v5741_v52 = vsel %vm2418_vm1, %v2406_v23, %v2430_v27  ;;  %v4015_v23 = vpack.c.bf16 %v3140_v19, %v3139_v58 }
 0x37d   :  { %v2407_v36 = vadd.f32 %v5697_v29, %v2353_v42  ;;  %v5730_v20 = vsel %vm2417_vm8, %v2405_v50, %v2429_v55 }
 0x37e   :  { %v2432_v10 = vmul.f32 0.1, %v2408_v43  ;;  %3792 = vmatmul.mubr.msk.f32.gmra.mrb[66].mxu1 %vm2474_vm6, %v5730_v20  ;;  %vm2420_vm9 = vcmp.ge.f32.partialorder %v2408_v43, 0.0 }
 0x37f   :  { %vm2419_vm11 = vcmp.ge.f32.partialorder %v2407_v36, 0.0  ;;  %v2431_v53 = vmul.f32 0.1, %v2407_v36  ;;  %3978 = vmatpush3.bf16.msra.mxu1 %v3975_v57  ;;  %v3760_v63 = vpop.f32.mrb[60].mxu1  ;;  %3794 = vmatprep.mubr.msk.f32.mxu1 %vm2474_vm6, %v5741_v52 }
 0x380   :  { %v2410_v39 = vadd.f32 %v3760_v63, %v5697_v29  ;;  %v2363_v5 = vpop.f32.mrb[61].mxu1  ;;  %3980 = vmatprep.subr.bf16.mxu1 %v3979_v60  ;;  %v5759_v13 = vsel %vm2420_vm9, %v2408_v43, %v2432_v10 }
 0x381   :  { %v2409_v15 = vadd.f32 %v5697_v29, %v2363_v5  ;;  %v5747_v38 = vsel %vm2419_vm11, %v2407_v36, %v2431_v53 }
 0x382   :  { %v2434_v12 = vmul.f32 0.1, %v2410_v39  ;;  %3795 = vmatmul.mubr.msk.f32.gmra.mrb[68].mxu1 %vm2474_vm6, %v5747_v38  ;;  %vm2422_vm12 = vcmp.ge.f32.partialorder %v2410_v39, 0.0 }
 0x383   :  { %vm2421_vm13 = vcmp.ge.f32.partialorder %v2409_v15, 0.0  ;;  %v2433_v56 = vmul.f32 0.1, %v2409_v15  ;;  %3982 = vmatpush3.bf16.msra.mxu1 %v3979_v60  ;;  %v3763_v41 = vpop.f32.mrb[62].mxu1  ;;  %3797 = vmatprep.mubr.msk.f32.mxu1 %vm2474_vm6, %v5759_v13 }
 0x384   :  { %v5764_v40 = vadd.f32 %v3763_v41, %v5697_v29  ;;  %v2373_v4 = vpop.f32.mrb[63].mxu1  ;;  %3984 = vmatprep.subr.bf16.mxu1 %v3983_v46  ;;  %v5778_v16 = vsel %vm2422_vm12, %v2410_v39, %v2434_v12 }
 0x385   :  { %v2411_v9 = vadd.f32 %v5697_v29, %v2373_v4  ;;  %v5767_v61 = vsel %vm2421_vm13, %v2409_v15, %v2433_v56  ;;  %v3995_v29 = vpack.c.bf16 %v3130_v7, %v3129_v44 }
 0x386   :  { %3798 = vmatmul.mubr.msk.f32.gmra.mrb[70].mxu1 %vm2474_vm6, %v5767_v61  ;;  %v2436_v32 = vmul.f32 0.1, %v5764_v40  ;;  %vm2424_vm2 = vcmp.ge.f32.partialorder %v5764_v40, 0.0 }
 0x387   :  { %vm2423_vm15 = vcmp.ge.f32.partialorder %v2411_v9, 0.0  ;;  %v2435_v49 = vmul.f32 0.1, %v2411_v9  ;;  %3986 = vmatpush3.bf16.msra.mxu1 %v3983_v46  ;;  %3800 = vmatprep.mubr.msk.f32.mxu1 %vm2474_vm6, %v5778_v16 }
 0x388   :  { %3988 = vmatprep.subr.bf16.mxu1 %v3987_v51  ;;  %v2448_v57 = vsel %vm2424_vm2, %v5764_v40, %v2436_v32 }
 0x389   :  { %v2447_v37 = vsel %vm2423_vm15, %v2411_v9, %v2435_v49 }
 0x38a   :  { %3801 = vmatmul.mubr.msk.f32.gmra.mrb[72].mxu1 %vm2474_vm6, %v2447_v37 }
 0x38b   :  { %3990 = vmatpush3.bf16.msra.mxu1 %v3987_v51  ;;  %3827 = vmatprep.mubr.msk.f32.mxu1 %vm2474_vm6, %v2437_v30 }
 0x38c   :  { %3992 = vmatprep.subr.bf16.mxu1 %v3991_v47 }
 0x38f   :  { %3994 = vmatpush3.bf16.msra.mxu1 %v3991_v47 }
 0x390   :  { %3996 = vmatprep.subr.bf16.mxu1 %v3995_v29 }
 0x392   :  { %3828 = vmatmul.mubr.msk.f32.vlgmr.msra.gmra.mrb[64].mxu1 %vm2474_vm6, %v5701_v26  ;;  %v4007_v26 = vpack.c.bf16 %v3136_v17, %v3135_v3 }
 0x393   :  { %3830 = vmatprep.mubr.msk.f32.mxu1 %vm2474_vm6, %v5713_v2  ;;  %3998 = vmatpush3.bf16.msra.mxu1 %v3995_v29 }
 0x394   :  { %4000 = vmatprep.subr.bf16.mxu1 %v3999_v14 }
 0x396   :  { %3831 = vmatmul.mubr.msk.f32.gmra.mrb[66].mxu1 %vm2474_vm6, %v5724_v45 }
 0x397   :  { %3833 = vmatprep.mubr.msk.f32.mxu1 %vm2474_vm6, %v5730_v20  ;;  %4002 = vmatpush3.bf16.msra.mxu1 %v3999_v14 }
 0x398   :  { %4004 = vmatprep.subr.bf16.mxu1 %v4003_v48 }
 0x39a   :  { %3834 = vmatmul.mubr.msk.f32.gmra.mrb[68].mxu1 %vm2474_vm6, %v5741_v52 }
 0x39b   :  { %3836 = vmatprep.mubr.msk.f32.mxu1 %vm2474_vm6, %v5747_v38  ;;  %4006 = vmatpush3.bf16.msra.mxu1 %v4003_v48 }
 0x39c   :  { %4008 = vmatprep.subr.bf16.mxu1 %v4007_v26 }
 0x39e   :  { %3837 = vmatmul.mubr.msk.f32.gmra.mrb[70].mxu1 %vm2474_vm6, %v5759_v13 }
 0x39f   :  { %3839 = vmatprep.mubr.msk.f32.mxu1 %vm2474_vm6, %v5767_v61  ;;  %4010 = vmatpush3.bf16.msra.mxu1 %v4007_v26 }
 0x3a0   :  { %4012 = vmatprep.subr.bf16.mxu1 %v4011_v8 }
 0x3a2   :  { %3840 = vmatmul.mubr.msk.f32.gmra.mrb[72].mxu1 %vm2474_vm6, %v5778_v16 }
 0x3a3   :  { %4014 = vmatpush3.bf16.msra.mxu1 %v4011_v8  ;;  %3866 = vmatprep.mubr.msk.f32.mxu1 %vm2474_vm6, %v5713_v2  ;;  %v3151_v2 = vld [vmem:[%s5883_s8] ss:$0 sm:$0xff]  ;;  %s4136_s8 = smov [#allocation5]  }
 0x3a4   :  { %4016 = vmatprep.subr.bf16.mxu1 %v4015_v23  ;;  %s2943_s25 = sshll.u32 %s4136_s8, 4  ;;  %s2944_s25 = int_to_ptr.vmem [resolvable:$true] %s2943_s25 }
 0x3a5   :  { %s4103_s26 = scalar_lea.vmem %s2944_s25, 128  ;;  %p4108_p9 = scmp.lt.s32.totalorder %s2944_s25, %s2944_s25 }
 0x3a6   :  { %p4104_p8 = scmp.ne.s32.totalorder %s2944_s25, %s4103_s26  ;;  %p4109_p10 = scmp.lt.s32.totalorder %s4103_s26, %s4103_s26 }
 0x3a7   :  { %4018 = vmatpush3.bf16.msra.mxu1 %v4015_v23 }
 0x3a8   :  { %p4110_p11 = por %p4109_p10, %p4108_p9 }
 0x3aa   :  { %3867 = vmatmul.mubr.msk.f32.vlgmr.msra.gmra.mrb[64].mxu1 %vm2474_vm6, %v5724_v45  ;;  %p4111_p12 = pnand %p4110_p11, %p4104_p8 }
 0x3ab   :  { %3869 = vmatprep.mubr.msk.f32.mxu1 %vm2474_vm6, %v5730_v20 }
 0x3ae   :  { %3870 = vmatmul.mubr.msk.f32.gmra.mrb[66].mxu1 %vm2474_vm6, %v5741_v52 }
 0x3af   :  { %3872 = vmatprep.mubr.msk.f32.mxu1 %vm2474_vm6, %v5747_v38 }
 0x3b2   :  { %3873 = vmatmul.mubr.msk.f32.gmra.mrb[68].mxu1 %vm2474_vm6, %v5759_v13 }
 0x3b3   :  { %3875 = vmatprep.mubr.msk.f32.mxu1 %vm2474_vm6, %v5767_v61 }
 0x3b6   :  { %3876 = vmatmul.mubr.msk.f32.gmra.mrb[70].mxu1 %vm2474_vm6, %v5778_v16 }
 0x3b7   :  { %3878 = vmatprep.mubr.msk.f32.mxu1 %vm2474_vm6, %v2447_v37 }
 0x3ba   :  { %3879 = vmatmul.mubr.msk.f32.gmra.mrb[72].mxu1 %vm2474_vm6, %v2448_v57 }
 0x47d   :  { %v3868_v50 = vpop.f32.mrb[64].mxu1 }
 0x47e   :  { %v2887_v24 = vadd.f32 %v3868_v50, %v3151_v2  ;;  %v2820_v59 = vpop.f32.mrb[65].mxu1 }
 0x47f   :  { %v2886_v27 = vadd.f32 %v3151_v2, %v2820_v59 }
 0x480   :  { %vm2897_vm3 = vcmp.ge.f32.partialorder %v2887_v24, 0.0  ;;  %v2907_v45 = vmul.f32 0.1, %v2887_v24 }
 0x481   :  { %vm2896_vm4 = vcmp.ge.f32.partialorder %v2886_v27, 0.0  ;;  %v2906_v55 = vmul.f32 0.1, %v2886_v27  ;;  %v3871_v1 = vpop.f32.mrb[66].mxu1 }
 0x482   :  { %v2917_v43 = vsel %vm2897_vm3, %v2887_v24, %v2907_v45  ;;  %v2889_v42 = vadd.f32 %v3871_v1, %v3151_v2  ;;  %v2830_v60 = vpop.f32.mrb[67].mxu1 }
 0x483   :  { %v2916_v36 = vsel %vm2896_vm4, %v2886_v27, %v2906_v55  ;;  %v2888_v20 = vadd.f32 %v3151_v2, %v2830_v60 }
 0x484   :  { %v2926_v0 = vadd.f32 %v2917_v43, %v2916_v36  ;;  %v2909_v54 = vmul.f32 0.1, %v2889_v42  ;;  %vm2899_vm10 = vcmp.ge.f32.partialorder %v2889_v42, 0.0 }
 0x485   :  { %vm2898_vm5 = vcmp.ge.f32.partialorder %v2888_v20, 0.0  ;;  %v2908_v10 = vmul.f32 0.1, %v2888_v20  ;;  %v3874_v52 = vpop.f32.mrb[68].mxu1 }
 0x486   :  { %v2891_v53 = vadd.f32 %v3874_v52, %v3151_v2  ;;  %v2840_v63 = vpop.f32.mrb[69].mxu1  ;;  %v2919_v15 = vsel %vm2899_vm10, %v2889_v42, %v2909_v54 }
 0x487   :  { %v2918_v39 = vsel %vm2898_vm5, %v2888_v20, %v2908_v10  ;;  %v2890_v5 = vadd.f32 %v3151_v2, %v2840_v63 }
 0x488   :  { %v2927_v46 = vadd.f32 %v2926_v0, %v2918_v39  ;;  %v2911_v38 = vmul.f32 0.1, %v2891_v53  ;;  %vm2901_vm0 = vcmp.ge.f32.partialorder %v2891_v53, 0.0 }
 0x489   :  { %vm2900_vm7 = vcmp.ge.f32.partialorder %v2890_v5, 0.0  ;;  %v2910_v22 = vmul.f32 0.1, %v2890_v5  ;;  %v3877_v31 = vpop.f32.mrb[70].mxu1 }
 0x48a   :  { %v2928_v28 = vadd.f32 %v2927_v46, %v2919_v15  ;;  %v2893_v12 = vadd.f32 %v3877_v31, %v3151_v2  ;;  %v2850_v13 = vpop.f32.mrb[71].mxu1  ;;  %v2921_v4 = vsel %vm2901_vm0, %v2891_v53, %v2911_v38 }
 0x48b   :  { %v2920_v56 = vsel %vm2900_vm7, %v2890_v5, %v2910_v22  ;;  %v2892_v41 = vadd.f32 %v3151_v2, %v2850_v13 }
 0x48c   :  { %v2929_v40 = vadd.f32 %v2928_v28, %v2920_v56  ;;  %v2913_v51 = vmul.f32 0.1, %v2893_v12  ;;  %vm2903_vm8 = vcmp.ge.f32.partialorder %v2893_v12, 0.0 }
 0x48d   :  { %vm2902_vm1 = vcmp.ge.f32.partialorder %v2892_v41, 0.0  ;;  %v2912_v9 = vmul.f32 0.1, %v2892_v41  ;;  %v3880_v61 = vpop.f32.mrb[72].mxu1 }
 0x48e   :  { %v2930_v62 = vadd.f32 %v2929_v40, %v2921_v4  ;;  %v2895_v11 = vadd.f32 %v3880_v61, %v3151_v2  ;;  %v2860_v6 = vpop.f32.mrb[73].mxu1  ;;  %v2923_v37 = vsel %vm2903_vm8, %v2893_v12, %v2913_v51 }
 0x48f   :  { %v2922_v16 = vsel %vm2902_vm1, %v2892_v41, %v2912_v9  ;;  %v2894_v49 = vadd.f32 %v3151_v2, %v2860_v6 }
 0x490   :  { %v2931_v47 = vadd.f32 %v2930_v62, %v2922_v16  ;;  %v2915_v44 = vmul.f32 0.1, %v2895_v11  ;;  %vm2905_vm11 = vcmp.ge.f32.partialorder %v2895_v11, 0.0 }
 0x491   :  { %vm2904_vm9 = vcmp.ge.f32.partialorder %v2894_v49, 0.0  ;;  %v2914_v7 = vmul.f32 0.1, %v2894_v49 }
 0x492   :  { %v2932_v30 = vadd.f32 %v2931_v47, %v2923_v37  ;;  %v2925_v21 = vsel %vm2905_vm11, %v2895_v11, %v2915_v44 }
 0x493   :  { %v2924_v29 = vsel %vm2904_vm9, %v2894_v49, %v2914_v7 }
 0x494   :  { %v2933_v35 = vadd.f32 %v2932_v30, %v2924_v29 }
 0x496   :  { %v2934_v14 = vadd.f32 %v2933_v35, %v2925_v21 }
 0x498   :  { %v2935_v18 = vmul.f32 0.1, %v2934_v14 }
 0x49a   :  { %2936 = vst.msk [vmem:[#allocation5] sm:$0xff] %vm2474_vm6, %v2935_v18 }
 0x49b   :  { %4114 = shalt.err (!%p4111_p12)
}
 0x49c   :  { %s4115_s3 = scalar_lea.hbm %s5884_s9, 128 }
 0x49d   :  { %p4116_p13 = scmp.ne.s32.totalorder %s5884_s9, %s4115_s3  ;;  %p4119_p0 = scmp.lt.u32.totalorder %s4115_s3, %s5884_s9 }
 0x49f   :  { %p4121_p1 = pnand %p4119_p0, %p4116_p13 }
 0x4a1   :  { %4124 = shalt.err (!%p4121_p1)
}
 0x4a2   :  { %2946 = dma.vmem_to_hbm [thread:$0]  %s2944_s25, 128, %s5884_s9, [#allocation4]  }
 0x4a3   :  { %4127 = dma.done.wait [#allocation4], 128  }
 0x4a4   :  { %4128 = vsyncadd [#allocation4], 4294967168 }
 0x4a5   :  { %2950 = vsyncpa [#allocation3], 1 }
 0x4a6   :  { %2951 = vsyncpa [#allocation4], 1 }

</bundles_post_ra>
